<compile_context>
chip_gen: v7x
topology: tpu7x:2x2x1
jax: 0.10.0
libtpu: 0.0.40
codegen_flags: <defaults>
</compile_context>

<pallas_src>
import functools
import math

import jax
import jax.numpy as jnp
from jax.experimental import pallas as pl
from jax.experimental.pallas import tpu as pltpu

# ----------------------------- model dims (small) ----------------------------
SEQ = 8          # seq_dim
IN_DIM = 4       # input_dim (attributes)
HID = 32         # hidden_dim
LAYERS = 3       # layer_dim
OUT_DIM = 1      # output_dim
FF = 1024        # layer1 width (fixed by the module)
GATE_PAD = 128   # 3*HID = 96 gate lanes padded to 128 (lane-dense)
LANE = 128       # lane-dense output width

assert IN_DIM <= HID       # layer-0 input weights are zero-padded to HID rows
assert 3 * HID <= GATE_PAD


# ---------------------------------- kernel -----------------------------------
def rnn_kernel(x_ref, w_gru_ref, b_gates_ref, w1_ref, ff_ref, scal_ref,
               out_ref,
               seq_scr,
               *, num_layers, hidden_dim, seq_len):
    H = hidden_dim

    # layer-0 input sequence (features already zero-padded to H)
    seq_scr[...] = x_ref[...]

    for l in range(num_layers):                      # static unroll over layers
        # input projection for ALL timesteps: (S,H) @ (H,GATE_PAD) + b_ih
        gx = (jnp.dot(seq_scr[...], w_gru_ref[l, 0],
                      preferred_element_type=jnp.float32)
              + b_gates_ref[l, 0])                   # (S, GATE_PAD)
        w_hh = w_gru_ref[l, 1]                       # (H, GATE_PAD), loop-invariant
        b_hh = b_gates_ref[l, 1]                     # (1, GATE_PAD)

        h = jnp.zeros((1, H), jnp.float32)           # h0 = zeros (as in forward())
        for t in range(seq_len):                     # static unroll over timesteps
            gh = (jnp.dot(h, w_hh, preferred_element_type=jnp.float32)
                  + b_hh)                            # (1, GATE_PAD)
            # fused r/z sigmoid over lanes [0 : 2H]
            rz = jax.nn.sigmoid(gx[t:t + 1, 0:2 * H] + gh[:, 0:2 * H])
            r = rz[:, 0:H]
            z = rz[:, H:2 * H]
            n = jnp.tanh(gx[t:t + 1, 2 * H:3 * H] + r * gh[:, 2 * H:3 * H])
            h = (1.0 - z) * n + z * h                # carried in vregs
            seq_scr[pl.ds(t, 1), :] = h              # layer output row (static slice)

    # ------------------- layer1 -> PReLU -> layer2 -> PReLU -------------------
    a = scal_ref[0]                                  # shared PReLU slope (SMEM scalar)
    b2 = scal_ref[1]                                 # layer2 bias (SMEM scalar)

    y1 = (jnp.dot(seq_scr[...], w1_ref[...], preferred_element_type=jnp.float32)
          + ff_ref[0:1, :])                          # (S, 1024)
    y1 = jnp.where(y1 > 0, y1, a * y1)

    # (1024 -> 1) as elementwise mul + lane reduce (avoids a lane-1 matmul output)
    y2 = jnp.sum(y1 * ff_ref[1:2, :], axis=-1, keepdims=True) + b2   # (S, 1)
    y2 = jnp.where(y2 > 0, y2, a * y2)

    out_ref[...] = jnp.broadcast_to(y2, out_ref.shape)   # lane-dense (S, 128) store


# --------------------------------- wrapper ------------------------------------
def rnn_forward(x, params):
    S = x.shape[0]

    # zero-pad x features to HID so every layer's input projection is (H, GATE_PAD)
    x_pad = jnp.zeros((S, HID), jnp.float32).at[:, :IN_DIM].set(x)

    vmem = pl.BlockSpec(memory_space=pltpu.MemorySpace.VMEM)
    smem = pl.BlockSpec(memory_space=pltpu.MemorySpace.SMEM)

    out = pl.pallas_call(
        functools.partial(rnn_kernel, num_layers=LAYERS, hidden_dim=HID, seq_len=S),
        out_shape=jax.ShapeDtypeStruct((S, LANE), jnp.float32),
        in_specs=[vmem, vmem, vmem, vmem, vmem, smem],
        out_specs=vmem,
        scratch_shapes=[
            pltpu.VMEM((S, HID), jnp.float32),   # per-layer sequence buffer
        ],
    )(x_pad,
      params["w_gru"],      # (L, 2, H, GATE_PAD)   [0]=W_ih^T  [1]=W_hh^T  (padded)
      params["b_gates"],    # (L, 2, 1, GATE_PAD)   [0]=b_ih    [1]=b_hh    (padded)
      params["w1_t"],       # (H, FF)
      params["ff_vecs"],    # (2, FF)               [0]=b1      [1]=w2 row
      params["scalars"])    # (2,) SMEM             [0]=PReLU a [1]=b2
    return out[:, 0]        # .squeeze() -> (S,)


# ---------------------------- deterministic init -------------------------------
def init_params(key):
    keys = jax.random.split(key, 4 * LAYERS + 4)
    k = iter(keys)

    def u(kk, shape, bound):
        return jax.random.uniform(kk, shape, jnp.float32, -bound, bound)

    gb = 1.0 / math.sqrt(HID)
    w_ih_raw, w_hh_raw, b_ih_raw, b_hh_raw = [], [], [], []
    for l in range(LAYERS):
        in_l = IN_DIM if l == 0 else HID
        w_ih_raw.append(u(next(k), (3 * HID, in_l), gb))
        w_hh_raw.append(u(next(k), (3 * HID, HID), gb))
        b_ih_raw.append(u(next(k), (3 * HID,), gb))
        b_hh_raw.append(u(next(k), (3 * HID,), gb))

    w1 = u(next(k), (FF, HID), 1.0 / math.sqrt(HID))
    b1 = u(next(k), (FF,), 1.0 / math.sqrt(HID))
    w2 = u(next(k), (OUT_DIM, FF), 1.0 / math.sqrt(FF))
    b2 = u(next(k), (OUT_DIM,), 1.0 / math.sqrt(FF))
    prelu_a = jnp.float32(0.25)   # single nn.PReLU shared by both activations (as in the module)

    # --- packed, kernel-side layouts ---
    def pack_w(w):   # (3H, in_l) -> transposed + zero-padded to (HID, GATE_PAD)
        out = jnp.zeros((HID, GATE_PAD), jnp.float32)
        return out.at[: w.shape[1], : w.shape[0]].set(w.T)

    def pack_b(b):   # (3H,) -> (1, GATE_PAD)
        return jnp.zeros((1, GATE_PAD), jnp.float32).at[0, : b.shape[0]].set(b)

    w_gru = jnp.stack([jnp.stack([pack_w(w_ih_raw[l]), pack_w(w_hh_raw[l])])
                       for l in range(LAYERS)])                    # (L, 2, H, GATE_PAD)
    b_gates = jnp.stack([jnp.stack([pack_b(b_ih_raw[l]), pack_b(b_hh_raw[l])])
                         for l in range(LAYERS)])                  # (L, 2, 1, GATE_PAD)
    ff_vecs = jnp.stack([b1, w2[0]])                               # (2, FF)
    scalars = jnp.array([prelu_a, b2[0]], jnp.float32)             # (2,)

    return dict(
        w_gru=w_gru, b_gates=b_gates, w1_t=w1.T, ff_vecs=ff_vecs, scalars=scalars,
        # raw (PyTorch-shaped) copies for the pure-JAX reference
        _raw=dict(w_ih=w_ih_raw, w_hh=w_hh_raw, b_ih=b_ih_raw, b_hh=b_hh_raw,
                  w1=w1, b1=b1, w2=w2, b2=b2, a=prelu_a),
    )


# ----------------------------- pure-JAX reference ------------------------------
def ref_forward(x, params):
    raw = params["_raw"]
    seq = x
    for l in range(LAYERS):
        Wih, Whh = raw["w_ih"][l], raw["w_hh"][l]
        bih, bhh = raw["b_ih"][l], raw["b_hh"][l]
        h = jnp.zeros((HID,), jnp.float32)
        outs = []
        for t in range(SEQ):
            gi = Wih @ seq[t] + bih
            gh = Whh @ h + bhh
            r = jax.nn.sigmoid(gi[:HID] + gh[:HID])
            z = jax.nn.sigmoid(gi[HID:2 * HID] + gh[HID:2 * HID])
            n = jnp.tanh(gi[2 * HID:] + r * gh[2 * HID:])
            h = (1.0 - z) * n + z * h
            outs.append(h)
        seq = jnp.stack(outs)

    a = raw["a"]
    prelu = lambda v: jnp.where(v > 0, v, a * v)
    y1 = prelu(seq @ raw["w1"].T + raw["b1"])
    y2 = prelu(y1 @ raw["w2"].T + raw["b2"])
    return jnp.squeeze(y2)


# ------------------------------------ main --------------------------------------
if __name__ == "__main__":
    key = jax.random.PRNGKey(0)
    k_x, k_p = jax.random.split(key)
    x = jax.random.normal(k_x, (SEQ, IN_DIM), jnp.float32)
    params = init_params(k_p)

    out = jax.block_until_ready(rnn_forward(x, params))
    ref = ref_forward(x, params)

    assert out.shape == (SEQ,), out.shape
    assert jnp.allclose(out, ref, rtol=1e-4, atol=1e-4), (out, ref)
    print("KERNEL_OK")
</pallas_src>

<mosaic_0001>
module attributes {stable_mosaic.version = 11 : i64} {
  func.func @rnn_kernel(%arg0: memref<8x32xf32, #tpu.memory_space<vmem>>, %arg1: memref<3x2x32x128xf32, #tpu.memory_space<vmem>>, %arg2: memref<3x2x1x128xf32, #tpu.memory_space<vmem>>, %arg3: memref<32x1024xf32, #tpu.memory_space<vmem>>, %arg4: memref<2x1024xf32, #tpu.memory_space<vmem>>, %arg5: memref<2xf32, #tpu.memory_space<smem>>, %arg6: memref<8x128xf32, #tpu.memory_space<vmem>>, %arg7: memref<8x32xf32, #tpu.memory_space<vmem>>) attributes {dimension_semantics = [], scalar_prefetch = 0 : i64, scratch_operands = 1 : i64, tpu.core_type = #tpu.core_type<tc>} {
    %c0 = arith.constant 0 : index
    %c0_0 = arith.constant 0 : index
    %0 = vector.load %arg0[%c0, %c0_0] : memref<8x32xf32, #tpu.memory_space<vmem>>, vector<8x32xf32>
    %c0_1 = arith.constant 0 : index
    %c0_2 = arith.constant 0 : index
    %1 = vector.load %arg7[%c0_1, %c0_2] : memref<8x32xf32, #tpu.memory_space<vmem>>, vector<8x32xf32>
    tpu.vector_store %arg7[%c0_1, %c0_2], %0 {strides = array<i32>} : memref<8x32xf32, #tpu.memory_space<vmem>>, vector<8x32xf32>,
    %c0_3 = arith.constant 0 : index
    %c0_4 = arith.constant 0 : index
    %2 = vector.load %arg7[%c0_3, %c0_4] : memref<8x32xf32, #tpu.memory_space<vmem>>, vector<8x32xf32>
    %c0_5 = arith.constant 0 : index
    %c0_6 = arith.constant 0 : index
    %c0_7 = arith.constant 0 : index
    %c0_8 = arith.constant 0 : index
    %3 = vector.load %arg1[%c0_5, %c0_6, %c0_7, %c0_8] : memref<3x2x32x128xf32, #tpu.memory_space<vmem>>, vector<1x1x32x128xf32>
    %4 = vector.shape_cast %3 : vector<1x1x32x128xf32> to vector<32x128xf32>
    %cst = arith.constant dense<0.000000e+00> : vector<8x128xf32>
    %5 = tpu.matmul %2, %4, %cst {dimension_numbers = #tpu.dot_dimension_numbers<[1], [0], [0], [1], [0, 0, 1, 1], [], []>} : vector<8x32xf32>, vector<32x128xf32>, vector<8x128xf32> -> vector<8x128xf32>
    %c0_9 = arith.constant 0 : index
    %c0_10 = arith.constant 0 : index
    %c0_11 = arith.constant 0 : index
    %c0_12 = arith.constant 0 : index
    %6 = vector.load %arg2[%c0_9, %c0_10, %c0_11, %c0_12] : memref<3x2x1x128xf32, #tpu.memory_space<vmem>>, vector<1x1x1x128xf32>
    %7 = vector.shape_cast %6 : vector<1x1x1x128xf32> to vector<1x128xf32>
    %8 = vector.broadcast %7 : vector<1x128xf32> to vector<8x128xf32>
    %9 = arith.addf %5, %8 : vector<8x128xf32>
    %c0_13 = arith.constant 0 : index
    %c1 = arith.constant 1 : index
    %c0_14 = arith.constant 0 : index
    %c0_15 = arith.constant 0 : index
    %10 = vector.load %arg1[%c0_13, %c1, %c0_14, %c0_15] : memref<3x2x32x128xf32, #tpu.memory_space<vmem>>, vector<1x1x32x128xf32>
    %11 = vector.shape_cast %10 : vector<1x1x32x128xf32> to vector<32x128xf32>
    %c0_16 = arith.constant 0 : index
    %c1_17 = arith.constant 1 : index
    %c0_18 = arith.constant 0 : index
    %c0_19 = arith.constant 0 : index
    %12 = vector.load %arg2[%c0_16, %c1_17, %c0_18, %c0_19] : memref<3x2x1x128xf32, #tpu.memory_space<vmem>>, vector<1x1x1x128xf32>
    %13 = vector.shape_cast %12 : vector<1x1x1x128xf32> to vector<1x128xf32>
    %cst_20 = arith.constant 0.000000e+00 : f32
    %14 = vector.broadcast %cst_20 : f32 to vector<1x32xf32>
    %cst_21 = arith.constant dense<0.000000e+00> : vector<1x128xf32>
    %15 = tpu.matmul %14, %11, %cst_21 {dimension_numbers = #tpu.dot_dimension_numbers<[1], [0], [0], [1], [0, 0, 1, 1], [], []>} : vector<1x32xf32>, vector<32x128xf32>, vector<1x128xf32> -> vector<1x128xf32>
    %16 = arith.addf %15, %13 : vector<1x128xf32>
    %17 = vector.extract_strided_slice %9 {offsets = [0, 0], sizes = [1, 64], strides = [1, 1]} : vector<8x128xf32> to vector<1x64xf32>
    %18 = vector.extract_strided_slice %16 {offsets = [0, 0], sizes = [1, 64], strides = [1, 1]} : vector<1x128xf32> to vector<1x64xf32>
    %19 = arith.addf %17, %18 : vector<1x64xf32>
    %20 = arith.negf %19 : vector<1x64xf32>
    %21 = math.exp %20 : vector<1x64xf32>
    %cst_22 = arith.constant 1.000000e+00 : f32
    %22 = vector.broadcast %cst_22 : f32 to vector<1x64xf32>
    %23 = arith.addf %22, %21 : vector<1x64xf32>
    %24 = arith.divf %22, %23 : vector<1x64xf32>
    %25 = vector.extract_strided_slice %24 {offsets = [0, 0], sizes = [1, 32], strides = [1, 1]} : vector<1x64xf32> to vector<1x32xf32>
    %26 = vector.extract_strided_slice %24 {offsets = [0, 32], sizes = [1, 32], strides = [1, 1]} : vector<1x64xf32> to vector<1x32xf32>
    %27 = vector.extract_strided_slice %9 {offsets = [0, 64], sizes = [1, 32], strides = [1, 1]} : vector<8x128xf32> to vector<1x32xf32>
    %28 = vector.extract_strided_slice %16 {offsets = [0, 64], sizes = [1, 32], strides = [1, 1]} : vector<1x128xf32> to vector<1x32xf32>
    %29 = arith.mulf %25, %28 : vector<1x32xf32>
    %30 = arith.addf %27, %29 : vector<1x32xf32>
    %31 = math.tanh %30 : vector<1x32xf32>
    %cst_23 = arith.constant 1.000000e+00 : f32
    %32 = vector.broadcast %cst_23 : f32 to vector<1x32xf32>
    %33 = arith.subf %32, %26 : vector<1x32xf32>
    %34 = arith.mulf %33, %31 : vector<1x32xf32>
    %35 = arith.mulf %26, %14 : vector<1x32xf32>
    %36 = arith.addf %34, %35 : vector<1x32xf32>
    %c0_24 = arith.constant 0 : index
    %c0_25 = arith.constant 0 : index
    %37 = vector.load %arg7[%c0_24, %c0_25] : memref<8x32xf32, #tpu.memory_space<vmem>>, vector<1x32xf32>
    tpu.vector_store %arg7[%c0_24, %c0_25], %36 {strides = array<i32>} : memref<8x32xf32, #tpu.memory_space<vmem>>, vector<1x32xf32>,
    %cst_26 = arith.constant dense<0.000000e+00> : vector<1x128xf32>
    %38 = tpu.matmul %36, %11, %cst_26 {dimension_numbers = #tpu.dot_dimension_numbers<[1], [0], [0], [1], [0, 0, 1, 1], [], []>} : vector<1x32xf32>, vector<32x128xf32>, vector<1x128xf32> -> vector<1x128xf32>
    %39 = arith.addf %38, %13 : vector<1x128xf32>
    %40 = vector.extract_strided_slice %9 {offsets = [1, 0], sizes = [1, 64], strides = [1, 1]} : vector<8x128xf32> to vector<1x64xf32>
    %41 = vector.extract_strided_slice %39 {offsets = [0, 0], sizes = [1, 64], strides = [1, 1]} : vector<1x128xf32> to vector<1x64xf32>
    %42 = arith.addf %40, %41 : vector<1x64xf32>
    %43 = arith.negf %42 : vector<1x64xf32>
    %44 = math.exp %43 : vector<1x64xf32>
    %cst_27 = arith.constant 1.000000e+00 : f32
    %45 = vector.broadcast %cst_27 : f32 to vector<1x64xf32>
    %46 = arith.addf %45, %44 : vector<1x64xf32>
    %47 = arith.divf %45, %46 : vector<1x64xf32>
    %48 = vector.extract_strided_slice %47 {offsets = [0, 0], sizes = [1, 32], strides = [1, 1]} : vector<1x64xf32> to vector<1x32xf32>
    %49 = vector.extract_strided_slice %47 {offsets = [0, 32], sizes = [1, 32], strides = [1, 1]} : vector<1x64xf32> to vector<1x32xf32>
    %50 = vector.extract_strided_slice %9 {offsets = [1, 64], sizes = [1, 32], strides = [1, 1]} : vector<8x128xf32> to vector<1x32xf32>
    %51 = vector.extract_strided_slice %39 {offsets = [0, 64], sizes = [1, 32], strides = [1, 1]} : vector<1x128xf32> to vector<1x32xf32>
    %52 = arith.mulf %48, %51 : vector<1x32xf32>
    %53 = arith.addf %50, %52 : vector<1x32xf32>
    %54 = math.tanh %53 : vector<1x32xf32>
    %cst_28 = arith.constant 1.000000e+00 : f32
    %55 = vector.broadcast %cst_28 : f32 to vector<1x32xf32>
    %56 = arith.subf %55, %49 : vector<1x32xf32>
    %57 = arith.mulf %56, %54 : vector<1x32xf32>
    %58 = arith.mulf %49, %36 : vector<1x32xf32>
    %59 = arith.addf %57, %58 : vector<1x32xf32>
    %c1_29 = arith.constant 1 : index
    %c0_30 = arith.constant 0 : index
    %60 = vector.load %arg7[%c1_29, %c0_30] : memref<8x32xf32, #tpu.memory_space<vmem>>, vector<1x32xf32>
    tpu.vector_store %arg7[%c1_29, %c0_30], %59 {strides = array<i32>} : memref<8x32xf32, #tpu.memory_space<vmem>>, vector<1x32xf32>,
    %cst_31 = arith.constant dense<0.000000e+00> : vector<1x128xf32>
    %61 = tpu.matmul %59, %11, %cst_31 {dimension_numbers = #tpu.dot_dimension_numbers<[1], [0], [0], [1], [0, 0, 1, 1], [], []>} : vector<1x32xf32>, vector<32x128xf32>, vector<1x128xf32> -> vector<1x128xf32>
    %62 = arith.addf %61, %13 : vector<1x128xf32>
    %63 = vector.extract_strided_slice %9 {offsets = [2, 0], sizes = [1, 64], strides = [1, 1]} : vector<8x128xf32> to vector<1x64xf32>
    %64 = vector.extract_strided_slice %62 {offsets = [0, 0], sizes = [1, 64], strides = [1, 1]} : vector<1x128xf32> to vector<1x64xf32>
    %65 = arith.addf %63, %64 : vector<1x64xf32>
    %66 = arith.negf %65 : vector<1x64xf32>
    %67 = math.exp %66 : vector<1x64xf32>
    %cst_32 = arith.constant 1.000000e+00 : f32
    %68 = vector.broadcast %cst_32 : f32 to vector<1x64xf32>
    %69 = arith.addf %68, %67 : vector<1x64xf32>
    %70 = arith.divf %68, %69 : vector<1x64xf32>
    %71 = vector.extract_strided_slice %70 {offsets = [0, 0], sizes = [1, 32], strides = [1, 1]} : vector<1x64xf32> to vector<1x32xf32>
    %72 = vector.extract_strided_slice %70 {offsets = [0, 32], sizes = [1, 32], strides = [1, 1]} : vector<1x64xf32> to vector<1x32xf32>
    %73 = vector.extract_strided_slice %9 {offsets = [2, 64], sizes = [1, 32], strides = [1, 1]} : vector<8x128xf32> to vector<1x32xf32>
    %74 = vector.extract_strided_slice %62 {offsets = [0, 64], sizes = [1, 32], strides = [1, 1]} : vector<1x128xf32> to vector<1x32xf32>
    %75 = arith.mulf %71, %74 : vector<1x32xf32>
    %76 = arith.addf %73, %75 : vector<1x32xf32>
    %77 = math.tanh %76 : vector<1x32xf32>
    %cst_33 = arith.constant 1.000000e+00 : f32
    %78 = vector.broadcast %cst_33 : f32 to vector<1x32xf32>
    %79 = arith.subf %78, %72 : vector<1x32xf32>
    %80 = arith.mulf %79, %77 : vector<1x32xf32>
    %81 = arith.mulf %72, %59 : vector<1x32xf32>
    %82 = arith.addf %80, %81 : vector<1x32xf32>
    %c2 = arith.constant 2 : index
    %c0_34 = arith.constant 0 : index
    %83 = vector.load %arg7[%c2, %c0_34] : memref<8x32xf32, #tpu.memory_space<vmem>>, vector<1x32xf32>
    tpu.vector_store %arg7[%c2, %c0_34], %82 {strides = array<i32>} : memref<8x32xf32, #tpu.memory_space<vmem>>, vector<1x32xf32>,
    %cst_35 = arith.constant dense<0.000000e+00> : vector<1x128xf32>
    %84 = tpu.matmul %82, %11, %cst_35 {dimension_numbers = #tpu.dot_dimension_numbers<[1], [0], [0], [1], [0, 0, 1, 1], [], []>} : vector<1x32xf32>, vector<32x128xf32>, vector<1x128xf32> -> vector<1x128xf32>
    %85 = arith.addf %84, %13 : vector<1x128xf32>
    %86 = vector.extract_strided_slice %9 {offsets = [3, 0], sizes = [1, 64], strides = [1, 1]} : vector<8x128xf32> to vector<1x64xf32>
    %87 = vector.extract_strided_slice %85 {offsets = [0, 0], sizes = [1, 64], strides = [1, 1]} : vector<1x128xf32> to vector<1x64xf32>
    %88 = arith.addf %86, %87 : vector<1x64xf32>
    %89 = arith.negf %88 : vector<1x64xf32>
    %90 = math.exp %89 : vector<1x64xf32>
    %cst_36 = arith.constant 1.000000e+00 : f32
    %91 = vector.broadcast %cst_36 : f32 to vector<1x64xf32>
    %92 = arith.addf %91, %90 : vector<1x64xf32>
    %93 = arith.divf %91, %92 : vector<1x64xf32>
    %94 = vector.extract_strided_slice %93 {offsets = [0, 0], sizes = [1, 32], strides = [1, 1]} : vector<1x64xf32> to vector<1x32xf32>
    %95 = vector.extract_strided_slice %93 {offsets = [0, 32], sizes = [1, 32], strides = [1, 1]} : vector<1x64xf32> to vector<1x32xf32>
    %96 = vector.extract_strided_slice %9 {offsets = [3, 64], sizes = [1, 32], strides = [1, 1]} : vector<8x128xf32> to vector<1x32xf32>
    %97 = vector.extract_strided_slice %85 {offsets = [0, 64], sizes = [1, 32], strides = [1, 1]} : vector<1x128xf32> to vector<1x32xf32>
    %98 = arith.mulf %94, %97 : vector<1x32xf32>
    %99 = arith.addf %96, %98 : vector<1x32xf32>
    %100 = math.tanh %99 : vector<1x32xf32>
    %cst_37 = arith.constant 1.000000e+00 : f32
    %101 = vector.broadcast %cst_37 : f32 to vector<1x32xf32>
    %102 = arith.subf %101, %95 : vector<1x32xf32>
    %103 = arith.mulf %102, %100 : vector<1x32xf32>
    %104 = arith.mulf %95, %82 : vector<1x32xf32>
    %105 = arith.addf %103, %104 : vector<1x32xf32>
    %c3 = arith.constant 3 : index
    %c0_38 = arith.constant 0 : index
    %106 = vector.load %arg7[%c3, %c0_38] : memref<8x32xf32, #tpu.memory_space<vmem>>, vector<1x32xf32>
    tpu.vector_store %arg7[%c3, %c0_38], %105 {strides = array<i32>} : memref<8x32xf32, #tpu.memory_space<vmem>>, vector<1x32xf32>,
    %cst_39 = arith.constant dense<0.000000e+00> : vector<1x128xf32>
    %107 = tpu.matmul %105, %11, %cst_39 {dimension_numbers = #tpu.dot_dimension_numbers<[1], [0], [0], [1], [0, 0, 1, 1], [], []>} : vector<1x32xf32>, vector<32x128xf32>, vector<1x128xf32> -> vector<1x128xf32>
    %108 = arith.addf %107, %13 : vector<1x128xf32>
    %109 = vector.extract_strided_slice %9 {offsets = [4, 0], sizes = [1, 64], strides = [1, 1]} : vector<8x128xf32> to vector<1x64xf32>
    %110 = vector.extract_strided_slice %108 {offsets = [0, 0], sizes = [1, 64], strides = [1, 1]} : vector<1x128xf32> to vector<1x64xf32>
    %111 = arith.addf %109, %110 : vector<1x64xf32>
    %112 = arith.negf %111 : vector<1x64xf32>
    %113 = math.exp %112 : vector<1x64xf32>
    %cst_40 = arith.constant 1.000000e+00 : f32
    %114 = vector.broadcast %cst_40 : f32 to vector<1x64xf32>
    %115 = arith.addf %114, %113 : vector<1x64xf32>
    %116 = arith.divf %114, %115 : vector<1x64xf32>
    %117 = vector.extract_strided_slice %116 {offsets = [0, 0], sizes = [1, 32], strides = [1, 1]} : vector<1x64xf32> to vector<1x32xf32>
    %118 = vector.extract_strided_slice %116 {offsets = [0, 32], sizes = [1, 32], strides = [1, 1]} : vector<1x64xf32> to vector<1x32xf32>
    %119 = vector.extract_strided_slice %9 {offsets = [4, 64], sizes = [1, 32], strides = [1, 1]} : vector<8x128xf32> to vector<1x32xf32>
    %120 = vector.extract_strided_slice %108 {offsets = [0, 64], sizes = [1, 32], strides = [1, 1]} : vector<1x128xf32> to vector<1x32xf32>
    %121 = arith.mulf %117, %120 : vector<1x32xf32>
    %122 = arith.addf %119, %121 : vector<1x32xf32>
    %123 = math.tanh %122 : vector<1x32xf32>
    %cst_41 = arith.constant 1.000000e+00 : f32
    %124 = vector.broadcast %cst_41 : f32 to vector<1x32xf32>
    %125 = arith.subf %124, %118 : vector<1x32xf32>
    %126 = arith.mulf %125, %123 : vector<1x32xf32>
    %127 = arith.mulf %118, %105 : vector<1x32xf32>
    %128 = arith.addf %126, %127 : vector<1x32xf32>
    %c4 = arith.constant 4 : index
    %c0_42 = arith.constant 0 : index
    %129 = vector.load %arg7[%c4, %c0_42] : memref<8x32xf32, #tpu.memory_space<vmem>>, vector<1x32xf32>
    tpu.vector_store %arg7[%c4, %c0_42], %128 {strides = array<i32>} : memref<8x32xf32, #tpu.memory_space<vmem>>, vector<1x32xf32>,
    %cst_43 = arith.constant dense<0.000000e+00> : vector<1x128xf32>
    %130 = tpu.matmul %128, %11, %cst_43 {dimension_numbers = #tpu.dot_dimension_numbers<[1], [0], [0], [1], [0, 0, 1, 1], [], []>} : vector<1x32xf32>, vector<32x128xf32>, vector<1x128xf32> -> vector<1x128xf32>
    %131 = arith.addf %130, %13 : vector<1x128xf32>
    %132 = vector.extract_strided_slice %9 {offsets = [5, 0], sizes = [1, 64], strides = [1, 1]} : vector<8x128xf32> to vector<1x64xf32>
    %133 = vector.extract_strided_slice %131 {offsets = [0, 0], sizes = [1, 64], strides = [1, 1]} : vector<1x128xf32> to vector<1x64xf32>
    %134 = arith.addf %132, %133 : vector<1x64xf32>
    %135 = arith.negf %134 : vector<1x64xf32>
    %136 = math.exp %135 : vector<1x64xf32>
    %cst_44 = arith.constant 1.000000e+00 : f32
    %137 = vector.broadcast %cst_44 : f32 to vector<1x64xf32>
    %138 = arith.addf %137, %136 : vector<1x64xf32>
    %139 = arith.divf %137, %138 : vector<1x64xf32>
    %140 = vector.extract_strided_slice %139 {offsets = [0, 0], sizes = [1, 32], strides = [1, 1]} : vector<1x64xf32> to vector<1x32xf32>
    %141 = vector.extract_strided_slice %139 {offsets = [0, 32], sizes = [1, 32], strides = [1, 1]} : vector<1x64xf32> to vector<1x32xf32>
    %142 = vector.extract_strided_slice %9 {offsets = [5, 64], sizes = [1, 32], strides = [1, 1]} : vector<8x128xf32> to vector<1x32xf32>
    %143 = vector.extract_strided_slice %131 {offsets = [0, 64], sizes = [1, 32], strides = [1, 1]} : vector<1x128xf32> to vector<1x32xf32>
    %144 = arith.mulf %140, %143 : vector<1x32xf32>
    %145 = arith.addf %142, %144 : vector<1x32xf32>
    %146 = math.tanh %145 : vector<1x32xf32>
    %cst_45 = arith.constant 1.000000e+00 : f32
    %147 = vector.broadcast %cst_45 : f32 to vector<1x32xf32>
    %148 = arith.subf %147, %141 : vector<1x32xf32>
    %149 = arith.mulf %148, %146 : vector<1x32xf32>
    %150 = arith.mulf %141, %128 : vector<1x32xf32>
    %151 = arith.addf %149, %150 : vector<1x32xf32>
    %c5 = arith.constant 5 : index
    %c0_46 = arith.constant 0 : index
    %152 = vector.load %arg7[%c5, %c0_46] : memref<8x32xf32, #tpu.memory_space<vmem>>, vector<1x32xf32>
    tpu.vector_store %arg7[%c5, %c0_46], %151 {strides = array<i32>} : memref<8x32xf32, #tpu.memory_space<vmem>>, vector<1x32xf32>,
    %cst_47 = arith.constant dense<0.000000e+00> : vector<1x128xf32>
    %153 = tpu.matmul %151, %11, %cst_47 {dimension_numbers = #tpu.dot_dimension_numbers<[1], [0], [0], [1], [0, 0, 1, 1], [], []>} : vector<1x32xf32>, vector<32x128xf32>, vector<1x128xf32> -> vector<1x128xf32>
    %154 = arith.addf %153, %13 : vector<1x128xf32>
    %155 = vector.extract_strided_slice %9 {offsets = [6, 0], sizes = [1, 64], strides = [1, 1]} : vector<8x128xf32> to vector<1x64xf32>
    %156 = vector.extract_strided_slice %154 {offsets = [0, 0], sizes = [1, 64], strides = [1, 1]} : vector<1x128xf32> to vector<1x64xf32>
    %157 = arith.addf %155, %156 : vector<1x64xf32>
    %158 = arith.negf %157 : vector<1x64xf32>
    %159 = math.exp %158 : vector<1x64xf32>
    %cst_48 = arith.constant 1.000000e+00 : f32
    %160 = vector.broadcast %cst_48 : f32 to vector<1x64xf32>
    %161 = arith.addf %160, %159 : vector<1x64xf32>
    %162 = arith.divf %160, %161 : vector<1x64xf32>
    %163 = vector.extract_strided_slice %162 {offsets = [0, 0], sizes = [1, 32], strides = [1, 1]} : vector<1x64xf32> to vector<1x32xf32>
    %164 = vector.extract_strided_slice %162 {offsets = [0, 32], sizes = [1, 32], strides = [1, 1]} : vector<1x64xf32> to vector<1x32xf32>
    %165 = vector.extract_strided_slice %9 {offsets = [6, 64], sizes = [1, 32], strides = [1, 1]} : vector<8x128xf32> to vector<1x32xf32>
    %166 = vector.extract_strided_slice %154 {offsets = [0, 64], sizes = [1, 32], strides = [1, 1]} : vector<1x128xf32> to vector<1x32xf32>
    %167 = arith.mulf %163, %166 : vector<1x32xf32>
    %168 = arith.addf %165, %167 : vector<1x32xf32>
    %169 = math.tanh %168 : vector<1x32xf32>
    %cst_49 = arith.constant 1.000000e+00 : f32
    %170 = vector.broadcast %cst_49 : f32 to vector<1x32xf32>
    %171 = arith.subf %170, %164 : vector<1x32xf32>
    %172 = arith.mulf %171, %169 : vector<1x32xf32>
    %173 = arith.mulf %164, %151 : vector<1x32xf32>
    %174 = arith.addf %172, %173 : vector<1x32xf32>
    %c6 = arith.constant 6 : index
    %c0_50 = arith.constant 0 : index
    %175 = vector.load %arg7[%c6, %c0_50] : memref<8x32xf32, #tpu.memory_space<vmem>>, vector<1x32xf32>
    tpu.vector_store %arg7[%c6, %c0_50], %174 {strides = array<i32>} : memref<8x32xf32, #tpu.memory_space<vmem>>, vector<1x32xf32>,
    %cst_51 = arith.constant dense<0.000000e+00> : vector<1x128xf32>
    %176 = tpu.matmul %174, %11, %cst_51 {dimension_numbers = #tpu.dot_dimension_numbers<[1], [0], [0], [1], [0, 0, 1, 1], [], []>} : vector<1x32xf32>, vector<32x128xf32>, vector<1x128xf32> -> vector<1x128xf32>
    %177 = arith.addf %176, %13 : vector<1x128xf32>
    %178 = vector.extract_strided_slice %9 {offsets = [7, 0], sizes = [1, 64], strides = [1, 1]} : vector<8x128xf32> to vector<1x64xf32>
    %179 = vector.extract_strided_slice %177 {offsets = [0, 0], sizes = [1, 64], strides = [1, 1]} : vector<1x128xf32> to vector<1x64xf32>
    %180 = arith.addf %178, %179 : vector<1x64xf32>
    %181 = arith.negf %180 : vector<1x64xf32>
    %182 = math.exp %181 : vector<1x64xf32>
    %cst_52 = arith.constant 1.000000e+00 : f32
    %183 = vector.broadcast %cst_52 : f32 to vector<1x64xf32>
    %184 = arith.addf %183, %182 : vector<1x64xf32>
    %185 = arith.divf %183, %184 : vector<1x64xf32>
    %186 = vector.extract_strided_slice %185 {offsets = [0, 0], sizes = [1, 32], strides = [1, 1]} : vector<1x64xf32> to vector<1x32xf32>
    %187 = vector.extract_strided_slice %185 {offsets = [0, 32], sizes = [1, 32], strides = [1, 1]} : vector<1x64xf32> to vector<1x32xf32>
    %188 = vector.extract_strided_slice %9 {offsets = [7, 64], sizes = [1, 32], strides = [1, 1]} : vector<8x128xf32> to vector<1x32xf32>
    %189 = vector.extract_strided_slice %177 {offsets = [0, 64], sizes = [1, 32], strides = [1, 1]} : vector<1x128xf32> to vector<1x32xf32>
    %190 = arith.mulf %186, %189 : vector<1x32xf32>
    %191 = arith.addf %188, %190 : vector<1x32xf32>
    %192 = math.tanh %191 : vector<1x32xf32>
    %cst_53 = arith.constant 1.000000e+00 : f32
    %193 = vector.broadcast %cst_53 : f32 to vector<1x32xf32>
    %194 = arith.subf %193, %187 : vector<1x32xf32>
    %195 = arith.mulf %194, %192 : vector<1x32xf32>
    %196 = arith.mulf %187, %174 : vector<1x32xf32>
    %197 = arith.addf %195, %196 : vector<1x32xf32>
    %c7 = arith.constant 7 : index
    %c0_54 = arith.constant 0 : index
    %198 = vector.load %arg7[%c7, %c0_54] : memref<8x32xf32, #tpu.memory_space<vmem>>, vector<1x32xf32>
    tpu.vector_store %arg7[%c7, %c0_54], %197 {strides = array<i32>} : memref<8x32xf32, #tpu.memory_space<vmem>>, vector<1x32xf32>,
    %c0_55 = arith.constant 0 : index
    %c0_56 = arith.constant 0 : index
    %199 = vector.load %arg7[%c0_55, %c0_56] : memref<8x32xf32, #tpu.memory_space<vmem>>, vector<8x32xf32>
    %c1_57 = arith.constant 1 : index
    %c0_58 = arith.constant 0 : index
    %c0_59 = arith.constant 0 : index
    %c0_60 = arith.constant 0 : index
    %200 = vector.load %arg1[%c1_57, %c0_58, %c0_59, %c0_60] : memref<3x2x32x128xf32, #tpu.memory_space<vmem>>, vector<1x1x32x128xf32>
    %201 = vector.shape_cast %200 : vector<1x1x32x128xf32> to vector<32x128xf32>
    %cst_61 = arith.constant dense<0.000000e+00> : vector<8x128xf32>
    %202 = tpu.matmul %199, %201, %cst_61 {dimension_numbers = #tpu.dot_dimension_numbers<[1], [0], [0], [1], [0, 0, 1, 1], [], []>} : vector<8x32xf32>, vector<32x128xf32>, vector<8x128xf32> -> vector<8x128xf32>
    %c1_62 = arith.constant 1 : index
    %c0_63 = arith.constant 0 : index
    %c0_64 = arith.constant 0 : index
    %c0_65 = arith.constant 0 : index
    %203 = vector.load %arg2[%c1_62, %c0_63, %c0_64, %c0_65] : memref<3x2x1x128xf32, #tpu.memory_space<vmem>>, vector<1x1x1x128xf32>
    %204 = vector.shape_cast %203 : vector<1x1x1x128xf32> to vector<1x128xf32>
    %205 = vector.broadcast %204 : vector<1x128xf32> to vector<8x128xf32>
    %206 = arith.addf %202, %205 : vector<8x128xf32>
    %c1_66 = arith.constant 1 : index
    %c1_67 = arith.constant 1 : index
    %c0_68 = arith.constant 0 : index
    %c0_69 = arith.constant 0 : index
    %207 = vector.load %arg1[%c1_66, %c1_67, %c0_68, %c0_69] : memref<3x2x32x128xf32, #tpu.memory_space<vmem>>, vector<1x1x32x128xf32>
    %208 = vector.shape_cast %207 : vector<1x1x32x128xf32> to vector<32x128xf32>
    %c1_70 = arith.constant 1 : index
    %c1_71 = arith.constant 1 : index
    %c0_72 = arith.constant 0 : index
    %c0_73 = arith.constant 0 : index
    %209 = vector.load %arg2[%c1_70, %c1_71, %c0_72, %c0_73] : memref<3x2x1x128xf32, #tpu.memory_space<vmem>>, vector<1x1x1x128xf32>
    %210 = vector.shape_cast %209 : vector<1x1x1x128xf32> to vector<1x128xf32>
    %cst_74 = arith.constant 0.000000e+00 : f32
    %211 = vector.broadcast %cst_74 : f32 to vector<1x32xf32>
    %cst_75 = arith.constant dense<0.000000e+00> : vector<1x128xf32>
    %212 = tpu.matmul %211, %208, %cst_75 {dimension_numbers = #tpu.dot_dimension_numbers<[1], [0], [0], [1], [0, 0, 1, 1], [], []>} : vector<1x32xf32>, vector<32x128xf32>, vector<1x128xf32> -> vector<1x128xf32>
    %213 = arith.addf %212, %210 : vector<1x128xf32>
    %214 = vector.extract_strided_slice %206 {offsets = [0, 0], sizes = [1, 64], strides = [1, 1]} : vector<8x128xf32> to vector<1x64xf32>
    %215 = vector.extract_strided_slice %213 {offsets = [0, 0], sizes = [1, 64], strides = [1, 1]} : vector<1x128xf32> to vector<1x64xf32>
    %216 = arith.addf %214, %215 : vector<1x64xf32>
    %217 = arith.negf %216 : vector<1x64xf32>
    %218 = math.exp %217 : vector<1x64xf32>
    %cst_76 = arith.constant 1.000000e+00 : f32
    %219 = vector.broadcast %cst_76 : f32 to vector<1x64xf32>
    %220 = arith.addf %219, %218 : vector<1x64xf32>
    %221 = arith.divf %219, %220 : vector<1x64xf32>
    %222 = vector.extract_strided_slice %221 {offsets = [0, 0], sizes = [1, 32], strides = [1, 1]} : vector<1x64xf32> to vector<1x32xf32>
    %223 = vector.extract_strided_slice %221 {offsets = [0, 32], sizes = [1, 32], strides = [1, 1]} : vector<1x64xf32> to vector<1x32xf32>
    %224 = vector.extract_strided_slice %206 {offsets = [0, 64], sizes = [1, 32], strides = [1, 1]} : vector<8x128xf32> to vector<1x32xf32>
    %225 = vector.extract_strided_slice %213 {offsets = [0, 64], sizes = [1, 32], strides = [1, 1]} : vector<1x128xf32> to vector<1x32xf32>
    %226 = arith.mulf %222, %225 : vector<1x32xf32>
    %227 = arith.addf %224, %226 : vector<1x32xf32>
    %228 = math.tanh %227 : vector<1x32xf32>
    %cst_77 = arith.constant 1.000000e+00 : f32
    %229 = vector.broadcast %cst_77 : f32 to vector<1x32xf32>
    %230 = arith.subf %229, %223 : vector<1x32xf32>
    %231 = arith.mulf %230, %228 : vector<1x32xf32>
    %232 = arith.mulf %223, %211 : vector<1x32xf32>
    %233 = arith.addf %231, %232 : vector<1x32xf32>
    %c0_78 = arith.constant 0 : index
    %c0_79 = arith.constant 0 : index
    %234 = vector.load %arg7[%c0_78, %c0_79] : memref<8x32xf32, #tpu.memory_space<vmem>>, vector<1x32xf32>
    tpu.vector_store %arg7[%c0_78, %c0_79], %233 {strides = array<i32>} : memref<8x32xf32, #tpu.memory_space<vmem>>, vector<1x32xf32>,
    %cst_80 = arith.constant dense<0.000000e+00> : vector<1x128xf32>
    %235 = tpu.matmul %233, %208, %cst_80 {dimension_numbers = #tpu.dot_dimension_numbers<[1], [0], [0], [1], [0, 0, 1, 1], [], []>} : vector<1x32xf32>, vector<32x128xf32>, vector<1x128xf32> -> vector<1x128xf32>
    %236 = arith.addf %235, %210 : vector<1x128xf32>
    %237 = vector.extract_strided_slice %206 {offsets = [1, 0], sizes = [1, 64], strides = [1, 1]} : vector<8x128xf32> to vector<1x64xf32>
    %238 = vector.extract_strided_slice %236 {offsets = [0, 0], sizes = [1, 64], strides = [1, 1]} : vector<1x128xf32> to vector<1x64xf32>
    %239 = arith.addf %237, %238 : vector<1x64xf32>
    %240 = arith.negf %239 : vector<1x64xf32>
    %241 = math.exp %240 : vector<1x64xf32>
    %cst_81 = arith.constant 1.000000e+00 : f32
    %242 = vector.broadcast %cst_81 : f32 to vector<1x64xf32>
    %243 = arith.addf %242, %241 : vector<1x64xf32>
    %244 = arith.divf %242, %243 : vector<1x64xf32>
    %245 = vector.extract_strided_slice %244 {offsets = [0, 0], sizes = [1, 32], strides = [1, 1]} : vector<1x64xf32> to vector<1x32xf32>
    %246 = vector.extract_strided_slice %244 {offsets = [0, 32], sizes = [1, 32], strides = [1, 1]} : vector<1x64xf32> to vector<1x32xf32>
    %247 = vector.extract_strided_slice %206 {offsets = [1, 64], sizes = [1, 32], strides = [1, 1]} : vector<8x128xf32> to vector<1x32xf32>
    %248 = vector.extract_strided_slice %236 {offsets = [0, 64], sizes = [1, 32], strides = [1, 1]} : vector<1x128xf32> to vector<1x32xf32>
    %249 = arith.mulf %245, %248 : vector<1x32xf32>
    %250 = arith.addf %247, %249 : vector<1x32xf32>
    %251 = math.tanh %250 : vector<1x32xf32>
    %cst_82 = arith.constant 1.000000e+00 : f32
    %252 = vector.broadcast %cst_82 : f32 to vector<1x32xf32>
    %253 = arith.subf %252, %246 : vector<1x32xf32>
    %254 = arith.mulf %253, %251 : vector<1x32xf32>
    %255 = arith.mulf %246, %233 : vector<1x32xf32>
    %256 = arith.addf %254, %255 : vector<1x32xf32>
    %c1_83 = arith.constant 1 : index
    %c0_84 = arith.constant 0 : index
    %257 = vector.load %arg7[%c1_83, %c0_84] : memref<8x32xf32, #tpu.memory_space<vmem>>, vector<1x32xf32>
    tpu.vector_store %arg7[%c1_83, %c0_84], %256 {strides = array<i32>} : memref<8x32xf32, #tpu.memory_space<vmem>>, vector<1x32xf32>,
    %cst_85 = arith.constant dense<0.000000e+00> : vector<1x128xf32>
    %258 = tpu.matmul %256, %208, %cst_85 {dimension_numbers = #tpu.dot_dimension_numbers<[1], [0], [0], [1], [0, 0, 1, 1], [], []>} : vector<1x32xf32>, vector<32x128xf32>, vector<1x128xf32> -> vector<1x128xf32>
    %259 = arith.addf %258, %210 : vector<1x128xf32>
    %260 = vector.extract_strided_slice %206 {offsets = [2, 0], sizes = [1, 64], strides = [1, 1]} : vector<8x128xf32> to vector<1x64xf32>
    %261 = vector.extract_strided_slice %259 {offsets = [0, 0], sizes = [1, 64], strides = [1, 1]} : vector<1x128xf32> to vector<1x64xf32>
    %262 = arith.addf %260, %261 : vector<1x64xf32>
    %263 = arith.negf %262 : vector<1x64xf32>
    %264 = math.exp %263 : vector<1x64xf32>
    %cst_86 = arith.constant 1.000000e+00 : f32
    %265 = vector.broadcast %cst_86 : f32 to vector<1x64xf32>
    %266 = arith.addf %265, %264 : vector<1x64xf32>
    %267 = arith.divf %265, %266 : vector<1x64xf32>
    %268 = vector.extract_strided_slice %267 {offsets = [0, 0], sizes = [1, 32], strides = [1, 1]} : vector<1x64xf32> to vector<1x32xf32>
    %269 = vector.extract_strided_slice %267 {offsets = [0, 32], sizes = [1, 32], strides = [1, 1]} : vector<1x64xf32> to vector<1x32xf32>
    %270 = vector.extract_strided_slice %206 {offsets = [2, 64], sizes = [1, 32], strides = [1, 1]} : vector<8x128xf32> to vector<1x32xf32>
    %271 = vector.extract_strided_slice %259 {offsets = [0, 64], sizes = [1, 32], strides = [1, 1]} : vector<1x128xf32> to vector<1x32xf32>
    %272 = arith.mulf %268, %271 : vector<1x32xf32>
    %273 = arith.addf %270, %272 : vector<1x32xf32>
    %274 = math.tanh %273 : vector<1x32xf32>
    %cst_87 = arith.constant 1.000000e+00 : f32
    %275 = vector.broadcast %cst_87 : f32 to vector<1x32xf32>
    %276 = arith.subf %275, %269 : vector<1x32xf32>
    %277 = arith.mulf %276, %274 : vector<1x32xf32>
    %278 = arith.mulf %269, %256 : vector<1x32xf32>
    %279 = arith.addf %277, %278 : vector<1x32xf32>
    %c2_88 = arith.constant 2 : index
    %c0_89 = arith.constant 0 : index
    %280 = vector.load %arg7[%c2_88, %c0_89] : memref<8x32xf32, #tpu.memory_space<vmem>>, vector<1x32xf32>
    tpu.vector_store %arg7[%c2_88, %c0_89], %279 {strides = array<i32>} : memref<8x32xf32, #tpu.memory_space<vmem>>, vector<1x32xf32>,
    %cst_90 = arith.constant dense<0.000000e+00> : vector<1x128xf32>
    %281 = tpu.matmul %279, %208, %cst_90 {dimension_numbers = #tpu.dot_dimension_numbers<[1], [0], [0], [1], [0, 0, 1, 1], [], []>} : vector<1x32xf32>, vector<32x128xf32>, vector<1x128xf32> -> vector<1x128xf32>
    %282 = arith.addf %281, %210 : vector<1x128xf32>
    %283 = vector.extract_strided_slice %206 {offsets = [3, 0], sizes = [1, 64], strides = [1, 1]} : vector<8x128xf32> to vector<1x64xf32>
    %284 = vector.extract_strided_slice %282 {offsets = [0, 0], sizes = [1, 64], strides = [1, 1]} : vector<1x128xf32> to vector<1x64xf32>
    %285 = arith.addf %283, %284 : vector<1x64xf32>
    %286 = arith.negf %285 : vector<1x64xf32>
    %287 = math.exp %286 : vector<1x64xf32>
    %cst_91 = arith.constant 1.000000e+00 : f32
    %288 = vector.broadcast %cst_91 : f32 to vector<1x64xf32>
    %289 = arith.addf %288, %287 : vector<1x64xf32>
    %290 = arith.divf %288, %289 : vector<1x64xf32>
    %291 = vector.extract_strided_slice %290 {offsets = [0, 0], sizes = [1, 32], strides = [1, 1]} : vector<1x64xf32> to vector<1x32xf32>
    %292 = vector.extract_strided_slice %290 {offsets = [0, 32], sizes = [1, 32], strides = [1, 1]} : vector<1x64xf32> to vector<1x32xf32>
    %293 = vector.extract_strided_slice %206 {offsets = [3, 64], sizes = [1, 32], strides = [1, 1]} : vector<8x128xf32> to vector<1x32xf32>
    %294 = vector.extract_strided_slice %282 {offsets = [0, 64], sizes = [1, 32], strides = [1, 1]} : vector<1x128xf32> to vector<1x32xf32>
    %295 = arith.mulf %291, %294 : vector<1x32xf32>
    %296 = arith.addf %293, %295 : vector<1x32xf32>
    %297 = math.tanh %296 : vector<1x32xf32>
    %cst_92 = arith.constant 1.000000e+00 : f32
    %298 = vector.broadcast %cst_92 : f32 to vector<1x32xf32>
    %299 = arith.subf %298, %292 : vector<1x32xf32>
    %300 = arith.mulf %299, %297 : vector<1x32xf32>
    %301 = arith.mulf %292, %279 : vector<1x32xf32>
    %302 = arith.addf %300, %301 : vector<1x32xf32>
    %c3_93 = arith.constant 3 : index
    %c0_94 = arith.constant 0 : index
    %303 = vector.load %arg7[%c3_93, %c0_94] : memref<8x32xf32, #tpu.memory_space<vmem>>, vector<1x32xf32>
    tpu.vector_store %arg7[%c3_93, %c0_94], %302 {strides = array<i32>} : memref<8x32xf32, #tpu.memory_space<vmem>>, vector<1x32xf32>,
    %cst_95 = arith.constant dense<0.000000e+00> : vector<1x128xf32>
    %304 = tpu.matmul %302, %208, %cst_95 {dimension_numbers = #tpu.dot_dimension_numbers<[1], [0], [0], [1], [0, 0, 1, 1], [], []>} : vector<1x32xf32>, vector<32x128xf32>, vector<1x128xf32> -> vector<1x128xf32>
    %305 = arith.addf %304, %210 : vector<1x128xf32>
    %306 = vector.extract_strided_slice %206 {offsets = [4, 0], sizes = [1, 64], strides = [1, 1]} : vector<8x128xf32> to vector<1x64xf32>
    %307 = vector.extract_strided_slice %305 {offsets = [0, 0], sizes = [1, 64], strides = [1, 1]} : vector<1x128xf32> to vector<1x64xf32>
    %308 = arith.addf %306, %307 : vector<1x64xf32>
    %309 = arith.negf %308 : vector<1x64xf32>
    %310 = math.exp %309 : vector<1x64xf32>
    %cst_96 = arith.constant 1.000000e+00 : f32
    %311 = vector.broadcast %cst_96 : f32 to vector<1x64xf32>
    %312 = arith.addf %311, %310 : vector<1x64xf32>
    %313 = arith.divf %311, %312 : vector<1x64xf32>
    %314 = vector.extract_strided_slice %313 {offsets = [0, 0], sizes = [1, 32], strides = [1, 1]} : vector<1x64xf32> to vector<1x32xf32>
    %315 = vector.extract_strided_slice %313 {offsets = [0, 32], sizes = [1, 32], strides = [1, 1]} : vector<1x64xf32> to vector<1x32xf32>
    %316 = vector.extract_strided_slice %206 {offsets = [4, 64], sizes = [1, 32], strides = [1, 1]} : vector<8x128xf32> to vector<1x32xf32>
    %317 = vector.extract_strided_slice %305 {offsets = [0, 64], sizes = [1, 32], strides = [1, 1]} : vector<1x128xf32> to vector<1x32xf32>
    %318 = arith.mulf %314, %317 : vector<1x32xf32>
    %319 = arith.addf %316, %318 : vector<1x32xf32>
    %320 = math.tanh %319 : vector<1x32xf32>
    %cst_97 = arith.constant 1.000000e+00 : f32
    %321 = vector.broadcast %cst_97 : f32 to vector<1x32xf32>
    %322 = arith.subf %321, %315 : vector<1x32xf32>
    %323 = arith.mulf %322, %320 : vector<1x32xf32>
    %324 = arith.mulf %315, %302 : vector<1x32xf32>
    %325 = arith.addf %323, %324 : vector<1x32xf32>
    %c4_98 = arith.constant 4 : index
    %c0_99 = arith.constant 0 : index
    %326 = vector.load %arg7[%c4_98, %c0_99] : memref<8x32xf32, #tpu.memory_space<vmem>>, vector<1x32xf32>
    tpu.vector_store %arg7[%c4_98, %c0_99], %325 {strides = array<i32>} : memref<8x32xf32, #tpu.memory_space<vmem>>, vector<1x32xf32>,
    %cst_100 = arith.constant dense<0.000000e+00> : vector<1x128xf32>
    %327 = tpu.matmul %325, %208, %cst_100 {dimension_numbers = #tpu.dot_dimension_numbers<[1], [0], [0], [1], [0, 0, 1, 1], [], []>} : vector<1x32xf32>, vector<32x128xf32>, vector<1x128xf32> -> vector<1x128xf32>
    %328 = arith.addf %327, %210 : vector<1x128xf32>
    %329 = vector.extract_strided_slice %206 {offsets = [5, 0], sizes = [1, 64], strides = [1, 1]} : vector<8x128xf32> to vector<1x64xf32>
    %330 = vector.extract_strided_slice %328 {offsets = [0, 0], sizes = [1, 64], strides = [1, 1]} : vector<1x128xf32> to vector<1x64xf32>
    %331 = arith.addf %329, %330 : vector<1x64xf32>
    %332 = arith.negf %331 : vector<1x64xf32>
    %333 = math.exp %332 : vector<1x64xf32>
    %cst_101 = arith.constant 1.000000e+00 : f32
    %334 = vector.broadcast %cst_101 : f32 to vector<1x64xf32>
    %335 = arith.addf %334, %333 : vector<1x64xf32>
    %336 = arith.divf %334, %335 : vector<1x64xf32>
    %337 = vector.extract_strided_slice %336 {offsets = [0, 0], sizes = [1, 32], strides = [1, 1]} : vector<1x64xf32> to vector<1x32xf32>
    %338 = vector.extract_strided_slice %336 {offsets = [0, 32], sizes = [1, 32], strides = [1, 1]} : vector<1x64xf32> to vector<1x32xf32>
    %339 = vector.extract_strided_slice %206 {offsets = [5, 64], sizes = [1, 32], strides = [1, 1]} : vector<8x128xf32> to vector<1x32xf32>
    %340 = vector.extract_strided_slice %328 {offsets = [0, 64], sizes = [1, 32], strides = [1, 1]} : vector<1x128xf32> to vector<1x32xf32>
    %341 = arith.mulf %337, %340 : vector<1x32xf32>
    %342 = arith.addf %339, %341 : vector<1x32xf32>
    %343 = math.tanh %342 : vector<1x32xf32>
    %cst_102 = arith.constant 1.000000e+00 : f32
    %344 = vector.broadcast %cst_102 : f32 to vector<1x32xf32>
    %345 = arith.subf %344, %338 : vector<1x32xf32>
    %346 = arith.mulf %345, %343 : vector<1x32xf32>
    %347 = arith.mulf %338, %325 : vector<1x32xf32>
    %348 = arith.addf %346, %347 : vector<1x32xf32>
    %c5_103 = arith.constant 5 : index
    %c0_104 = arith.constant 0 : index
    %349 = vector.load %arg7[%c5_103, %c0_104] : memref<8x32xf32, #tpu.memory_space<vmem>>, vector<1x32xf32>
    tpu.vector_store %arg7[%c5_103, %c0_104], %348 {strides = array<i32>} : memref<8x32xf32, #tpu.memory_space<vmem>>, vector<1x32xf32>,
    %cst_105 = arith.constant dense<0.000000e+00> : vector<1x128xf32>
    %350 = tpu.matmul %348, %208, %cst_105 {dimension_numbers = #tpu.dot_dimension_numbers<[1], [0], [0], [1], [0, 0, 1, 1], [], []>} : vector<1x32xf32>, vector<32x128xf32>, vector<1x128xf32> -> vector<1x128xf32>
    %351 = arith.addf %350, %210 : vector<1x128xf32>
    %352 = vector.extract_strided_slice %206 {offsets = [6, 0], sizes = [1, 64], strides = [1, 1]} : vector<8x128xf32> to vector<1x64xf32>
    %353 = vector.extract_strided_slice %351 {offsets = [0, 0], sizes = [1, 64], strides = [1, 1]} : vector<1x128xf32> to vector<1x64xf32>
    %354 = arith.addf %352, %353 : vector<1x64xf32>
    %355 = arith.negf %354 : vector<1x64xf32>
    %356 = math.exp %355 : vector<1x64xf32>
    %cst_106 = arith.constant 1.000000e+00 : f32
    %357 = vector.broadcast %cst_106 : f32 to vector<1x64xf32>
    %358 = arith.addf %357, %356 : vector<1x64xf32>
    %359 = arith.divf %357, %358 : vector<1x64xf32>
    %360 = vector.extract_strided_slice %359 {offsets = [0, 0], sizes = [1, 32], strides = [1, 1]} : vector<1x64xf32> to vector<1x32xf32>
    %361 = vector.extract_strided_slice %359 {offsets = [0, 32], sizes = [1, 32], strides = [1, 1]} : vector<1x64xf32> to vector<1x32xf32>
    %362 = vector.extract_strided_slice %206 {offsets = [6, 64], sizes = [1, 32], strides = [1, 1]} : vector<8x128xf32> to vector<1x32xf32>
    %363 = vector.extract_strided_slice %351 {offsets = [0, 64], sizes = [1, 32], strides = [1, 1]} : vector<1x128xf32> to vector<1x32xf32>
    %364 = arith.mulf %360, %363 : vector<1x32xf32>
    %365 = arith.addf %362, %364 : vector<1x32xf32>
    %366 = math.tanh %365 : vector<1x32xf32>
    %cst_107 = arith.constant 1.000000e+00 : f32
    %367 = vector.broadcast %cst_107 : f32 to vector<1x32xf32>
    %368 = arith.subf %367, %361 : vector<1x32xf32>
    %369 = arith.mulf %368, %366 : vector<1x32xf32>
    %370 = arith.mulf %361, %348 : vector<1x32xf32>
    %371 = arith.addf %369, %370 : vector<1x32xf32>
    %c6_108 = arith.constant 6 : index
    %c0_109 = arith.constant 0 : index
    %372 = vector.load %arg7[%c6_108, %c0_109] : memref<8x32xf32, #tpu.memory_space<vmem>>, vector<1x32xf32>
    tpu.vector_store %arg7[%c6_108, %c0_109], %371 {strides = array<i32>} : memref<8x32xf32, #tpu.memory_space<vmem>>, vector<1x32xf32>,
    %cst_110 = arith.constant dense<0.000000e+00> : vector<1x128xf32>
    %373 = tpu.matmul %371, %208, %cst_110 {dimension_numbers = #tpu.dot_dimension_numbers<[1], [0], [0], [1], [0, 0, 1, 1], [], []>} : vector<1x32xf32>, vector<32x128xf32>, vector<1x128xf32> -> vector<1x128xf32>
    %374 = arith.addf %373, %210 : vector<1x128xf32>
    %375 = vector.extract_strided_slice %206 {offsets = [7, 0], sizes = [1, 64], strides = [1, 1]} : vector<8x128xf32> to vector<1x64xf32>
    %376 = vector.extract_strided_slice %374 {offsets = [0, 0], sizes = [1, 64], strides = [1, 1]} : vector<1x128xf32> to vector<1x64xf32>
    %377 = arith.addf %375, %376 : vector<1x64xf32>
    %378 = arith.negf %377 : vector<1x64xf32>
    %379 = math.exp %378 : vector<1x64xf32>
    %cst_111 = arith.constant 1.000000e+00 : f32
    %380 = vector.broadcast %cst_111 : f32 to vector<1x64xf32>
    %381 = arith.addf %380, %379 : vector<1x64xf32>
    %382 = arith.divf %380, %381 : vector<1x64xf32>
    %383 = vector.extract_strided_slice %382 {offsets = [0, 0], sizes = [1, 32], strides = [1, 1]} : vector<1x64xf32> to vector<1x32xf32>
    %384 = vector.extract_strided_slice %382 {offsets = [0, 32], sizes = [1, 32], strides = [1, 1]} : vector<1x64xf32> to vector<1x32xf32>
    %385 = vector.extract_strided_slice %206 {offsets = [7, 64], sizes = [1, 32], strides = [1, 1]} : vector<8x128xf32> to vector<1x32xf32>
    %386 = vector.extract_strided_slice %374 {offsets = [0, 64], sizes = [1, 32], strides = [1, 1]} : vector<1x128xf32> to vector<1x32xf32>
    %387 = arith.mulf %383, %386 : vector<1x32xf32>
    %388 = arith.addf %385, %387 : vector<1x32xf32>
    %389 = math.tanh %388 : vector<1x32xf32>
    %cst_112 = arith.constant 1.000000e+00 : f32
    %390 = vector.broadcast %cst_112 : f32 to vector<1x32xf32>
    %391 = arith.subf %390, %384 : vector<1x32xf32>
    %392 = arith.mulf %391, %389 : vector<1x32xf32>
    %393 = arith.mulf %384, %371 : vector<1x32xf32>
    %394 = arith.addf %392, %393 : vector<1x32xf32>
    %c7_113 = arith.constant 7 : index
    %c0_114 = arith.constant 0 : index
    %395 = vector.load %arg7[%c7_113, %c0_114] : memref<8x32xf32, #tpu.memory_space<vmem>>, vector<1x32xf32>
    tpu.vector_store %arg7[%c7_113, %c0_114], %394 {strides = array<i32>} : memref<8x32xf32, #tpu.memory_space<vmem>>, vector<1x32xf32>,
    %c0_115 = arith.constant 0 : index
    %c0_116 = arith.constant 0 : index
    %396 = vector.load %arg7[%c0_115, %c0_116] : memref<8x32xf32, #tpu.memory_space<vmem>>, vector<8x32xf32>
    %c2_117 = arith.constant 2 : index
    %c0_118 = arith.constant 0 : index
    %c0_119 = arith.constant 0 : index
    %c0_120 = arith.constant 0 : index
    %397 = vector.load %arg1[%c2_117, %c0_118, %c0_119, %c0_120] : memref<3x2x32x128xf32, #tpu.memory_space<vmem>>, vector<1x1x32x128xf32>
    %398 = vector.shape_cast %397 : vector<1x1x32x128xf32> to vector<32x128xf32>
    %cst_121 = arith.constant dense<0.000000e+00> : vector<8x128xf32>
    %399 = tpu.matmul %396, %398, %cst_121 {dimension_numbers = #tpu.dot_dimension_numbers<[1], [0], [0], [1], [0, 0, 1, 1], [], []>} : vector<8x32xf32>, vector<32x128xf32>, vector<8x128xf32> -> vector<8x128xf32>
    %c2_122 = arith.constant 2 : index
    %c0_123 = arith.constant 0 : index
    %c0_124 = arith.constant 0 : index
    %c0_125 = arith.constant 0 : index
    %400 = vector.load %arg2[%c2_122, %c0_123, %c0_124, %c0_125] : memref<3x2x1x128xf32, #tpu.memory_space<vmem>>, vector<1x1x1x128xf32>
    %401 = vector.shape_cast %400 : vector<1x1x1x128xf32> to vector<1x128xf32>
    %402 = vector.broadcast %401 : vector<1x128xf32> to vector<8x128xf32>
    %403 = arith.addf %399, %402 : vector<8x128xf32>
    %c2_126 = arith.constant 2 : index
    %c1_127 = arith.constant 1 : index
    %c0_128 = arith.constant 0 : index
    %c0_129 = arith.constant 0 : index
    %404 = vector.load %arg1[%c2_126, %c1_127, %c0_128, %c0_129] : memref<3x2x32x128xf32, #tpu.memory_space<vmem>>, vector<1x1x32x128xf32>
    %405 = vector.shape_cast %404 : vector<1x1x32x128xf32> to vector<32x128xf32>
    %c2_130 = arith.constant 2 : index
    %c1_131 = arith.constant 1 : index
    %c0_132 = arith.constant 0 : index
    %c0_133 = arith.constant 0 : index
    %406 = vector.load %arg2[%c2_130, %c1_131, %c0_132, %c0_133] : memref<3x2x1x128xf32, #tpu.memory_space<vmem>>, vector<1x1x1x128xf32>
    %407 = vector.shape_cast %406 : vector<1x1x1x128xf32> to vector<1x128xf32>
    %cst_134 = arith.constant 0.000000e+00 : f32
    %408 = vector.broadcast %cst_134 : f32 to vector<1x32xf32>
    %cst_135 = arith.constant dense<0.000000e+00> : vector<1x128xf32>
    %409 = tpu.matmul %408, %405, %cst_135 {dimension_numbers = #tpu.dot_dimension_numbers<[1], [0], [0], [1], [0, 0, 1, 1], [], []>} : vector<1x32xf32>, vector<32x128xf32>, vector<1x128xf32> -> vector<1x128xf32>
    %410 = arith.addf %409, %407 : vector<1x128xf32>
    %411 = vector.extract_strided_slice %403 {offsets = [0, 0], sizes = [1, 64], strides = [1, 1]} : vector<8x128xf32> to vector<1x64xf32>
    %412 = vector.extract_strided_slice %410 {offsets = [0, 0], sizes = [1, 64], strides = [1, 1]} : vector<1x128xf32> to vector<1x64xf32>
    %413 = arith.addf %411, %412 : vector<1x64xf32>
    %414 = arith.negf %413 : vector<1x64xf32>
    %415 = math.exp %414 : vector<1x64xf32>
    %cst_136 = arith.constant 1.000000e+00 : f32
    %416 = vector.broadcast %cst_136 : f32 to vector<1x64xf32>
    %417 = arith.addf %416, %415 : vector<1x64xf32>
    %418 = arith.divf %416, %417 : vector<1x64xf32>
    %419 = vector.extract_strided_slice %418 {offsets = [0, 0], sizes = [1, 32], strides = [1, 1]} : vector<1x64xf32> to vector<1x32xf32>
    %420 = vector.extract_strided_slice %418 {offsets = [0, 32], sizes = [1, 32], strides = [1, 1]} : vector<1x64xf32> to vector<1x32xf32>
    %421 = vector.extract_strided_slice %403 {offsets = [0, 64], sizes = [1, 32], strides = [1, 1]} : vector<8x128xf32> to vector<1x32xf32>
    %422 = vector.extract_strided_slice %410 {offsets = [0, 64], sizes = [1, 32], strides = [1, 1]} : vector<1x128xf32> to vector<1x32xf32>
    %423 = arith.mulf %419, %422 : vector<1x32xf32>
    %424 = arith.addf %421, %423 : vector<1x32xf32>
    %425 = math.tanh %424 : vector<1x32xf32>
    %cst_137 = arith.constant 1.000000e+00 : f32
    %426 = vector.broadcast %cst_137 : f32 to vector<1x32xf32>
    %427 = arith.subf %426, %420 : vector<1x32xf32>
    %428 = arith.mulf %427, %425 : vector<1x32xf32>
    %429 = arith.mulf %420, %408 : vector<1x32xf32>
    %430 = arith.addf %428, %429 : vector<1x32xf32>
    %c0_138 = arith.constant 0 : index
    %c0_139 = arith.constant 0 : index
    %431 = vector.load %arg7[%c0_138, %c0_139] : memref<8x32xf32, #tpu.memory_space<vmem>>, vector<1x32xf32>
    tpu.vector_store %arg7[%c0_138, %c0_139], %430 {strides = array<i32>} : memref<8x32xf32, #tpu.memory_space<vmem>>, vector<1x32xf32>,
    %cst_140 = arith.constant dense<0.000000e+00> : vector<1x128xf32>
    %432 = tpu.matmul %430, %405, %cst_140 {dimension_numbers = #tpu.dot_dimension_numbers<[1], [0], [0], [1], [0, 0, 1, 1], [], []>} : vector<1x32xf32>, vector<32x128xf32>, vector<1x128xf32> -> vector<1x128xf32>
    %433 = arith.addf %432, %407 : vector<1x128xf32>
    %434 = vector.extract_strided_slice %403 {offsets = [1, 0], sizes = [1, 64], strides = [1, 1]} : vector<8x128xf32> to vector<1x64xf32>
    %435 = vector.extract_strided_slice %433 {offsets = [0, 0], sizes = [1, 64], strides = [1, 1]} : vector<1x128xf32> to vector<1x64xf32>
    %436 = arith.addf %434, %435 : vector<1x64xf32>
    %437 = arith.negf %436 : vector<1x64xf32>
    %438 = math.exp %437 : vector<1x64xf32>
    %cst_141 = arith.constant 1.000000e+00 : f32
    %439 = vector.broadcast %cst_141 : f32 to vector<1x64xf32>
    %440 = arith.addf %439, %438 : vector<1x64xf32>
    %441 = arith.divf %439, %440 : vector<1x64xf32>
    %442 = vector.extract_strided_slice %441 {offsets = [0, 0], sizes = [1, 32], strides = [1, 1]} : vector<1x64xf32> to vector<1x32xf32>
    %443 = vector.extract_strided_slice %441 {offsets = [0, 32], sizes = [1, 32], strides = [1, 1]} : vector<1x64xf32> to vector<1x32xf32>
    %444 = vector.extract_strided_slice %403 {offsets = [1, 64], sizes = [1, 32], strides = [1, 1]} : vector<8x128xf32> to vector<1x32xf32>
    %445 = vector.extract_strided_slice %433 {offsets = [0, 64], sizes = [1, 32], strides = [1, 1]} : vector<1x128xf32> to vector<1x32xf32>
    %446 = arith.mulf %442, %445 : vector<1x32xf32>
    %447 = arith.addf %444, %446 : vector<1x32xf32>
    %448 = math.tanh %447 : vector<1x32xf32>
    %cst_142 = arith.constant 1.000000e+00 : f32
    %449 = vector.broadcast %cst_142 : f32 to vector<1x32xf32>
    %450 = arith.subf %449, %443 : vector<1x32xf32>
    %451 = arith.mulf %450, %448 : vector<1x32xf32>
    %452 = arith.mulf %443, %430 : vector<1x32xf32>
    %453 = arith.addf %451, %452 : vector<1x32xf32>
    %c1_143 = arith.constant 1 : index
    %c0_144 = arith.constant 0 : index
    %454 = vector.load %arg7[%c1_143, %c0_144] : memref<8x32xf32, #tpu.memory_space<vmem>>, vector<1x32xf32>
    tpu.vector_store %arg7[%c1_143, %c0_144], %453 {strides = array<i32>} : memref<8x32xf32, #tpu.memory_space<vmem>>, vector<1x32xf32>,
    %cst_145 = arith.constant dense<0.000000e+00> : vector<1x128xf32>
    %455 = tpu.matmul %453, %405, %cst_145 {dimension_numbers = #tpu.dot_dimension_numbers<[1], [0], [0], [1], [0, 0, 1, 1], [], []>} : vector<1x32xf32>, vector<32x128xf32>, vector<1x128xf32> -> vector<1x128xf32>
    %456 = arith.addf %455, %407 : vector<1x128xf32>
    %457 = vector.extract_strided_slice %403 {offsets = [2, 0], sizes = [1, 64], strides = [1, 1]} : vector<8x128xf32> to vector<1x64xf32>
    %458 = vector.extract_strided_slice %456 {offsets = [0, 0], sizes = [1, 64], strides = [1, 1]} : vector<1x128xf32> to vector<1x64xf32>
    %459 = arith.addf %457, %458 : vector<1x64xf32>
    %460 = arith.negf %459 : vector<1x64xf32>
    %461 = math.exp %460 : vector<1x64xf32>
    %cst_146 = arith.constant 1.000000e+00 : f32
    %462 = vector.broadcast %cst_146 : f32 to vector<1x64xf32>
    %463 = arith.addf %462, %461 : vector<1x64xf32>
    %464 = arith.divf %462, %463 : vector<1x64xf32>
    %465 = vector.extract_strided_slice %464 {offsets = [0, 0], sizes = [1, 32], strides = [1, 1]} : vector<1x64xf32> to vector<1x32xf32>
    %466 = vector.extract_strided_slice %464 {offsets = [0, 32], sizes = [1, 32], strides = [1, 1]} : vector<1x64xf32> to vector<1x32xf32>
    %467 = vector.extract_strided_slice %403 {offsets = [2, 64], sizes = [1, 32], strides = [1, 1]} : vector<8x128xf32> to vector<1x32xf32>
    %468 = vector.extract_strided_slice %456 {offsets = [0, 64], sizes = [1, 32], strides = [1, 1]} : vector<1x128xf32> to vector<1x32xf32>
    %469 = arith.mulf %465, %468 : vector<1x32xf32>
    %470 = arith.addf %467, %469 : vector<1x32xf32>
    %471 = math.tanh %470 : vector<1x32xf32>
    %cst_147 = arith.constant 1.000000e+00 : f32
    %472 = vector.broadcast %cst_147 : f32 to vector<1x32xf32>
    %473 = arith.subf %472, %466 : vector<1x32xf32>
    %474 = arith.mulf %473, %471 : vector<1x32xf32>
    %475 = arith.mulf %466, %453 : vector<1x32xf32>
    %476 = arith.addf %474, %475 : vector<1x32xf32>
    %c2_148 = arith.constant 2 : index
    %c0_149 = arith.constant 0 : index
    %477 = vector.load %arg7[%c2_148, %c0_149] : memref<8x32xf32, #tpu.memory_space<vmem>>, vector<1x32xf32>
    tpu.vector_store %arg7[%c2_148, %c0_149], %476 {strides = array<i32>} : memref<8x32xf32, #tpu.memory_space<vmem>>, vector<1x32xf32>,
    %cst_150 = arith.constant dense<0.000000e+00> : vector<1x128xf32>
    %478 = tpu.matmul %476, %405, %cst_150 {dimension_numbers = #tpu.dot_dimension_numbers<[1], [0], [0], [1], [0, 0, 1, 1], [], []>} : vector<1x32xf32>, vector<32x128xf32>, vector<1x128xf32> -> vector<1x128xf32>
    %479 = arith.addf %478, %407 : vector<1x128xf32>
    %480 = vector.extract_strided_slice %403 {offsets = [3, 0], sizes = [1, 64], strides = [1, 1]} : vector<8x128xf32> to vector<1x64xf32>
    %481 = vector.extract_strided_slice %479 {offsets = [0, 0], sizes = [1, 64], strides = [1, 1]} : vector<1x128xf32> to vector<1x64xf32>
    %482 = arith.addf %480, %481 : vector<1x64xf32>
    %483 = arith.negf %482 : vector<1x64xf32>
    %484 = math.exp %483 : vector<1x64xf32>
    %cst_151 = arith.constant 1.000000e+00 : f32
    %485 = vector.broadcast %cst_151 : f32 to vector<1x64xf32>
    %486 = arith.addf %485, %484 : vector<1x64xf32>
    %487 = arith.divf %485, %486 : vector<1x64xf32>
    %488 = vector.extract_strided_slice %487 {offsets = [0, 0], sizes = [1, 32], strides = [1, 1]} : vector<1x64xf32> to vector<1x32xf32>
    %489 = vector.extract_strided_slice %487 {offsets = [0, 32], sizes = [1, 32], strides = [1, 1]} : vector<1x64xf32> to vector<1x32xf32>
    %490 = vector.extract_strided_slice %403 {offsets = [3, 64], sizes = [1, 32], strides = [1, 1]} : vector<8x128xf32> to vector<1x32xf32>
    %491 = vector.extract_strided_slice %479 {offsets = [0, 64], sizes = [1, 32], strides = [1, 1]} : vector<1x128xf32> to vector<1x32xf32>
    %492 = arith.mulf %488, %491 : vector<1x32xf32>
    %493 = arith.addf %490, %492 : vector<1x32xf32>
    %494 = math.tanh %493 : vector<1x32xf32>
    %cst_152 = arith.constant 1.000000e+00 : f32
    %495 = vector.broadcast %cst_152 : f32 to vector<1x32xf32>
    %496 = arith.subf %495, %489 : vector<1x32xf32>
    %497 = arith.mulf %496, %494 : vector<1x32xf32>
    %498 = arith.mulf %489, %476 : vector<1x32xf32>
    %499 = arith.addf %497, %498 : vector<1x32xf32>
    %c3_153 = arith.constant 3 : index
    %c0_154 = arith.constant 0 : index
    %500 = vector.load %arg7[%c3_153, %c0_154] : memref<8x32xf32, #tpu.memory_space<vmem>>, vector<1x32xf32>
    tpu.vector_store %arg7[%c3_153, %c0_154], %499 {strides = array<i32>} : memref<8x32xf32, #tpu.memory_space<vmem>>, vector<1x32xf32>,
    %cst_155 = arith.constant dense<0.000000e+00> : vector<1x128xf32>
    %501 = tpu.matmul %499, %405, %cst_155 {dimension_numbers = #tpu.dot_dimension_numbers<[1], [0], [0], [1], [0, 0, 1, 1], [], []>} : vector<1x32xf32>, vector<32x128xf32>, vector<1x128xf32> -> vector<1x128xf32>
    %502 = arith.addf %501, %407 : vector<1x128xf32>
    %503 = vector.extract_strided_slice %403 {offsets = [4, 0], sizes = [1, 64], strides = [1, 1]} : vector<8x128xf32> to vector<1x64xf32>
    %504 = vector.extract_strided_slice %502 {offsets = [0, 0], sizes = [1, 64], strides = [1, 1]} : vector<1x128xf32> to vector<1x64xf32>
    %505 = arith.addf %503, %504 : vector<1x64xf32>
    %506 = arith.negf %505 : vector<1x64xf32>
    %507 = math.exp %506 : vector<1x64xf32>
    %cst_156 = arith.constant 1.000000e+00 : f32
    %508 = vector.broadcast %cst_156 : f32 to vector<1x64xf32>
    %509 = arith.addf %508, %507 : vector<1x64xf32>
    %510 = arith.divf %508, %509 : vector<1x64xf32>
    %511 = vector.extract_strided_slice %510 {offsets = [0, 0], sizes = [1, 32], strides = [1, 1]} : vector<1x64xf32> to vector<1x32xf32>
    %512 = vector.extract_strided_slice %510 {offsets = [0, 32], sizes = [1, 32], strides = [1, 1]} : vector<1x64xf32> to vector<1x32xf32>
    %513 = vector.extract_strided_slice %403 {offsets = [4, 64], sizes = [1, 32], strides = [1, 1]} : vector<8x128xf32> to vector<1x32xf32>
    %514 = vector.extract_strided_slice %502 {offsets = [0, 64], sizes = [1, 32], strides = [1, 1]} : vector<1x128xf32> to vector<1x32xf32>
    %515 = arith.mulf %511, %514 : vector<1x32xf32>
    %516 = arith.addf %513, %515 : vector<1x32xf32>
    %517 = math.tanh %516 : vector<1x32xf32>
    %cst_157 = arith.constant 1.000000e+00 : f32
    %518 = vector.broadcast %cst_157 : f32 to vector<1x32xf32>
    %519 = arith.subf %518, %512 : vector<1x32xf32>
    %520 = arith.mulf %519, %517 : vector<1x32xf32>
    %521 = arith.mulf %512, %499 : vector<1x32xf32>
    %522 = arith.addf %520, %521 : vector<1x32xf32>
    %c4_158 = arith.constant 4 : index
    %c0_159 = arith.constant 0 : index
    %523 = vector.load %arg7[%c4_158, %c0_159] : memref<8x32xf32, #tpu.memory_space<vmem>>, vector<1x32xf32>
    tpu.vector_store %arg7[%c4_158, %c0_159], %522 {strides = array<i32>} : memref<8x32xf32, #tpu.memory_space<vmem>>, vector<1x32xf32>,
    %cst_160 = arith.constant dense<0.000000e+00> : vector<1x128xf32>
    %524 = tpu.matmul %522, %405, %cst_160 {dimension_numbers = #tpu.dot_dimension_numbers<[1], [0], [0], [1], [0, 0, 1, 1], [], []>} : vector<1x32xf32>, vector<32x128xf32>, vector<1x128xf32> -> vector<1x128xf32>
    %525 = arith.addf %524, %407 : vector<1x128xf32>
    %526 = vector.extract_strided_slice %403 {offsets = [5, 0], sizes = [1, 64], strides = [1, 1]} : vector<8x128xf32> to vector<1x64xf32>
    %527 = vector.extract_strided_slice %525 {offsets = [0, 0], sizes = [1, 64], strides = [1, 1]} : vector<1x128xf32> to vector<1x64xf32>
    %528 = arith.addf %526, %527 : vector<1x64xf32>
    %529 = arith.negf %528 : vector<1x64xf32>
    %530 = math.exp %529 : vector<1x64xf32>
    %cst_161 = arith.constant 1.000000e+00 : f32
    %531 = vector.broadcast %cst_161 : f32 to vector<1x64xf32>
    %532 = arith.addf %531, %530 : vector<1x64xf32>
    %533 = arith.divf %531, %532 : vector<1x64xf32>
    %534 = vector.extract_strided_slice %533 {offsets = [0, 0], sizes = [1, 32], strides = [1, 1]} : vector<1x64xf32> to vector<1x32xf32>
    %535 = vector.extract_strided_slice %533 {offsets = [0, 32], sizes = [1, 32], strides = [1, 1]} : vector<1x64xf32> to vector<1x32xf32>
    %536 = vector.extract_strided_slice %403 {offsets = [5, 64], sizes = [1, 32], strides = [1, 1]} : vector<8x128xf32> to vector<1x32xf32>
    %537 = vector.extract_strided_slice %525 {offsets = [0, 64], sizes = [1, 32], strides = [1, 1]} : vector<1x128xf32> to vector<1x32xf32>
    %538 = arith.mulf %534, %537 : vector<1x32xf32>
    %539 = arith.addf %536, %538 : vector<1x32xf32>
    %540 = math.tanh %539 : vector<1x32xf32>
    %cst_162 = arith.constant 1.000000e+00 : f32
    %541 = vector.broadcast %cst_162 : f32 to vector<1x32xf32>
    %542 = arith.subf %541, %535 : vector<1x32xf32>
    %543 = arith.mulf %542, %540 : vector<1x32xf32>
    %544 = arith.mulf %535, %522 : vector<1x32xf32>
    %545 = arith.addf %543, %544 : vector<1x32xf32>
    %c5_163 = arith.constant 5 : index
    %c0_164 = arith.constant 0 : index
    %546 = vector.load %arg7[%c5_163, %c0_164] : memref<8x32xf32, #tpu.memory_space<vmem>>, vector<1x32xf32>
    tpu.vector_store %arg7[%c5_163, %c0_164], %545 {strides = array<i32>} : memref<8x32xf32, #tpu.memory_space<vmem>>, vector<1x32xf32>,
    %cst_165 = arith.constant dense<0.000000e+00> : vector<1x128xf32>
    %547 = tpu.matmul %545, %405, %cst_165 {dimension_numbers = #tpu.dot_dimension_numbers<[1], [0], [0], [1], [0, 0, 1, 1], [], []>} : vector<1x32xf32>, vector<32x128xf32>, vector<1x128xf32> -> vector<1x128xf32>
    %548 = arith.addf %547, %407 : vector<1x128xf32>
    %549 = vector.extract_strided_slice %403 {offsets = [6, 0], sizes = [1, 64], strides = [1, 1]} : vector<8x128xf32> to vector<1x64xf32>
    %550 = vector.extract_strided_slice %548 {offsets = [0, 0], sizes = [1, 64], strides = [1, 1]} : vector<1x128xf32> to vector<1x64xf32>
    %551 = arith.addf %549, %550 : vector<1x64xf32>
    %552 = arith.negf %551 : vector<1x64xf32>
    %553 = math.exp %552 : vector<1x64xf32>
    %cst_166 = arith.constant 1.000000e+00 : f32
    %554 = vector.broadcast %cst_166 : f32 to vector<1x64xf32>
    %555 = arith.addf %554, %553 : vector<1x64xf32>
    %556 = arith.divf %554, %555 : vector<1x64xf32>
    %557 = vector.extract_strided_slice %556 {offsets = [0, 0], sizes = [1, 32], strides = [1, 1]} : vector<1x64xf32> to vector<1x32xf32>
    %558 = vector.extract_strided_slice %556 {offsets = [0, 32], sizes = [1, 32], strides = [1, 1]} : vector<1x64xf32> to vector<1x32xf32>
    %559 = vector.extract_strided_slice %403 {offsets = [6, 64], sizes = [1, 32], strides = [1, 1]} : vector<8x128xf32> to vector<1x32xf32>
    %560 = vector.extract_strided_slice %548 {offsets = [0, 64], sizes = [1, 32], strides = [1, 1]} : vector<1x128xf32> to vector<1x32xf32>
    %561 = arith.mulf %557, %560 : vector<1x32xf32>
    %562 = arith.addf %559, %561 : vector<1x32xf32>
    %563 = math.tanh %562 : vector<1x32xf32>
    %cst_167 = arith.constant 1.000000e+00 : f32
    %564 = vector.broadcast %cst_167 : f32 to vector<1x32xf32>
    %565 = arith.subf %564, %558 : vector<1x32xf32>
    %566 = arith.mulf %565, %563 : vector<1x32xf32>
    %567 = arith.mulf %558, %545 : vector<1x32xf32>
    %568 = arith.addf %566, %567 : vector<1x32xf32>
    %c6_168 = arith.constant 6 : index
    %c0_169 = arith.constant 0 : index
    %569 = vector.load %arg7[%c6_168, %c0_169] : memref<8x32xf32, #tpu.memory_space<vmem>>, vector<1x32xf32>
    tpu.vector_store %arg7[%c6_168, %c0_169], %568 {strides = array<i32>} : memref<8x32xf32, #tpu.memory_space<vmem>>, vector<1x32xf32>,
    %cst_170 = arith.constant dense<0.000000e+00> : vector<1x128xf32>
    %570 = tpu.matmul %568, %405, %cst_170 {dimension_numbers = #tpu.dot_dimension_numbers<[1], [0], [0], [1], [0, 0, 1, 1], [], []>} : vector<1x32xf32>, vector<32x128xf32>, vector<1x128xf32> -> vector<1x128xf32>
    %571 = arith.addf %570, %407 : vector<1x128xf32>
    %572 = vector.extract_strided_slice %403 {offsets = [7, 0], sizes = [1, 64], strides = [1, 1]} : vector<8x128xf32> to vector<1x64xf32>
    %573 = vector.extract_strided_slice %571 {offsets = [0, 0], sizes = [1, 64], strides = [1, 1]} : vector<1x128xf32> to vector<1x64xf32>
    %574 = arith.addf %572, %573 : vector<1x64xf32>
    %575 = arith.negf %574 : vector<1x64xf32>
    %576 = math.exp %575 : vector<1x64xf32>
    %cst_171 = arith.constant 1.000000e+00 : f32
    %577 = vector.broadcast %cst_171 : f32 to vector<1x64xf32>
    %578 = arith.addf %577, %576 : vector<1x64xf32>
    %579 = arith.divf %577, %578 : vector<1x64xf32>
    %580 = vector.extract_strided_slice %579 {offsets = [0, 0], sizes = [1, 32], strides = [1, 1]} : vector<1x64xf32> to vector<1x32xf32>
    %581 = vector.extract_strided_slice %579 {offsets = [0, 32], sizes = [1, 32], strides = [1, 1]} : vector<1x64xf32> to vector<1x32xf32>
    %582 = vector.extract_strided_slice %403 {offsets = [7, 64], sizes = [1, 32], strides = [1, 1]} : vector<8x128xf32> to vector<1x32xf32>
    %583 = vector.extract_strided_slice %571 {offsets = [0, 64], sizes = [1, 32], strides = [1, 1]} : vector<1x128xf32> to vector<1x32xf32>
    %584 = arith.mulf %580, %583 : vector<1x32xf32>
    %585 = arith.addf %582, %584 : vector<1x32xf32>
    %586 = math.tanh %585 : vector<1x32xf32>
    %cst_172 = arith.constant 1.000000e+00 : f32
    %587 = vector.broadcast %cst_172 : f32 to vector<1x32xf32>
    %588 = arith.subf %587, %581 : vector<1x32xf32>
    %589 = arith.mulf %588, %586 : vector<1x32xf32>
    %590 = arith.mulf %581, %568 : vector<1x32xf32>
    %591 = arith.addf %589, %590 : vector<1x32xf32>
    %c7_173 = arith.constant 7 : index
    %c0_174 = arith.constant 0 : index
    %592 = vector.load %arg7[%c7_173, %c0_174] : memref<8x32xf32, #tpu.memory_space<vmem>>, vector<1x32xf32>
    tpu.vector_store %arg7[%c7_173, %c0_174], %591 {strides = array<i32>} : memref<8x32xf32, #tpu.memory_space<vmem>>, vector<1x32xf32>,
    %c0_175 = arith.constant 0 : index
    %593 = memref.load %arg5[%c0_175] : memref<2xf32, #tpu.memory_space<smem>>
    %c1_176 = arith.constant 1 : index
    %594 = memref.load %arg5[%c1_176] : memref<2xf32, #tpu.memory_space<smem>>
    %c0_177 = arith.constant 0 : index
    %c0_178 = arith.constant 0 : index
    %595 = vector.load %arg7[%c0_177, %c0_178] : memref<8x32xf32, #tpu.memory_space<vmem>>, vector<8x32xf32>
    %c0_179 = arith.constant 0 : index
    %c0_180 = arith.constant 0 : index
    %596 = vector.load %arg3[%c0_179, %c0_180] : memref<32x1024xf32, #tpu.memory_space<vmem>>, vector<32x1024xf32>
    %cst_181 = arith.constant dense<0.000000e+00> : vector<8x1024xf32>
    %597 = tpu.matmul %595, %596, %cst_181 {dimension_numbers = #tpu.dot_dimension_numbers<[1], [0], [0], [1], [0, 0, 1, 1], [], []>} : vector<8x32xf32>, vector<32x1024xf32>, vector<8x1024xf32> -> vector<8x1024xf32>
    %c0_182 = arith.constant 0 : index
    %c0_183 = arith.constant 0 : index
    %598 = vector.load %arg4[%c0_182, %c0_183] : memref<2x1024xf32, #tpu.memory_space<vmem>>, vector<1x1024xf32>
    %599 = vector.broadcast %598 : vector<1x1024xf32> to vector<8x1024xf32>
    %600 = arith.addf %597, %599 : vector<8x1024xf32>
    %cst_184 = arith.constant 0.000000e+00 : f32
    %601 = vector.broadcast %cst_184 : f32 to vector<8x1024xf32>
    %602 = arith.cmpf ogt, %600, %601 : vector<8x1024xf32>
    %603 = vector.broadcast %593 : f32 to vector<8x1024xf32>
    %604 = arith.mulf %603, %600 : vector<8x1024xf32>
    %605 = arith.select %602, %600, %604 : vector<8x1024xi1>, vector<8x1024xf32>
    %c1_185 = arith.constant 1 : index
    %c0_186 = arith.constant 0 : index
    %606 = vector.load %arg4[%c1_185, %c0_186] : memref<2x1024xf32, #tpu.memory_space<vmem>>, vector<1x1024xf32>
    %607 = vector.broadcast %606 : vector<1x1024xf32> to vector<8x1024xf32>
    %608 = arith.mulf %605, %607 : vector<8x1024xf32>
    %cst_187 = arith.constant dense<0.000000e+00> : vector<8xf32>
    %609 = vector.multi_reduction <add>, %608, %cst_187 [1] : vector<8x1024xf32> to vector<8xf32>
    %610 = vector.shape_cast %609 : vector<8xf32> to vector<8x1xf32>
    %611 = vector.broadcast %594 : f32 to vector<8x1xf32>
    %612 = arith.addf %610, %611 : vector<8x1xf32>
    %cst_188 = arith.constant 0.000000e+00 : f32
    %613 = vector.broadcast %cst_188 : f32 to vector<8x1xf32>
    %614 = arith.cmpf ogt, %612, %613 : vector<8x1xf32>
    %615 = vector.broadcast %593 : f32 to vector<8x1xf32>
    %616 = arith.mulf %615, %612 : vector<8x1xf32>
    %617 = arith.select %614, %612, %616 : vector<8x1xi1>, vector<8x1xf32>
    %618 = vector.shape_cast %617 : vector<8x1xf32> to vector<8x1xf32>
    %619 = vector.broadcast %618 : vector<8x1xf32> to vector<8x128xf32>
    %c0_189 = arith.constant 0 : index
    %c0_190 = arith.constant 0 : index
    %620 = vector.load %arg6[%c0_189, %c0_190] : memref<8x128xf32, #tpu.memory_space<vmem>>, vector<8x128xf32>
    tpu.vector_store %arg6[%c0_189, %c0_190], %619 {strides = array<i32>} : memref<8x128xf32, #tpu.memory_space<vmem>>, vector<8x128xf32>,
    return
  }
}

</mosaic_0001>

<bundles_post_ra>
// kernel: tpu_custom_call.1
= control target key start
LH: loop header
LB: loop body
LE: loop exit
PB: predicated region body
PF: predicated region fallthrough
CT: control target
= control target key end

     0   :  { %11 = vsyncpa [#allocation4], 0  ;;  %s5104_s0 = inlined_call_operand.hbm [shape: f32[8,32], index: 0, kind: input, shape index: {}]   ;;  %s5105_s1 = inlined_call_operand.hbm [shape: f32[3,2,32,128], index: 1, kind: input, shape index: {}]   ;;  %s5106_s2 = inlined_call_operand.vmem [shape: f32[3,2,1,128], index: 2, kind: input, shape index: {}]   ;;  %s5107_s3 = inlined_call_operand.hbm [shape: f32[32,1024], index: 3, kind: input, shape index: {}]   ;;  %s5108_s4 = inlined_call_operand.hbm [shape: f32[2,1024], index: 4, kind: input, shape index: {}]   ;;  %s5109_s5 = inlined_call_operand.vmem [shape: f32[2], index: 5, kind: input, shape index: {}]   ;;  %s5110_s6 = inlined_call_operand.hbm [shape: f32[8,128], index: 6, kind: output, shape index: {}]  }
   0x1   :  { %12 = vsyncpa [#allocation8], 0 }
   0x2   :  { %13 = vsyncpa [#allocation11], 0 }
   0x3   :  { %14 = vsyncpa [#allocation6], 0 }
   0x4   :  { %15 = vsyncpa [#allocation5], 0  ;;  %s4436_s21 = smov [#allocation7]   ;;  %s4304_s25 = scalar_lea.hbm %s5105_s1, 3072 }
   0x5   :  { %s31_s22 = sshll.u32 %s4436_s21, 4  ;;  %p4305_p0 = scmp.ne.s32.totalorder %s5105_s1, %s4304_s25  ;;  %s32_s22 = int_to_ptr.vmem [resolvable:$true] %s31_s22 }
   0x6   :  { %p4308_p1 = scmp.lt.u32.totalorder %s4304_s25, %s5105_s1 }
   0x8   :  { %p4310_p2 = pnand %p4308_p1, %p4305_p0 }
   0xa   :  { %4313 = shalt.err (!%p4310_p2)
}
   0xb   :  { %s4314_s30 = scalar_lea.vmem %s32_s22, 3072  ;;  %p4319_p4 = scmp.lt.s32.totalorder %s32_s22, %s32_s22 }
   0xc   :  { %p4315_p3 = scmp.ne.s32.totalorder %s32_s22, %s4314_s30  ;;  %p4320_p5 = scmp.lt.s32.totalorder %s4314_s30, %s4314_s30 }
   0xe   :  { %p4321_p6 = por %p4320_p5, %p4319_p4 }
  0x10   :  { %p4322_p7 = pnand %p4321_p6, %p4315_p3 }
  0x12   :  { %4325 = shalt.err (!%p4322_p7)
}
  0x13   :  { %s4437_s7 = smov 128   ;;  %s4438_s8 = smov 8  }
  0x14   :  { %37 = dma.hbm_to_vmem [thread:$0]  %s5105_s1, 3072, %s32_s22, [#allocation8], %s4437_s7, %s4437_s7, %s4438_s8  }
  0x15   :  { %s4439_s11 = smov [#allocation3]   ;;  %s4440_s13 = smov [#allocation9]  }
  0x16   :  { %s22_s12 = sshll.u32 %s4439_s11, 4  ;;  %s45_s14 = sshll.u32 %s4440_s13, 4  ;;  %s23_s12 = int_to_ptr.vmem [resolvable:$true] %s22_s12  ;;  %s46_s14 = int_to_ptr.vmem [resolvable:$true] %s45_s14 }
  0x17   :  { %s4326_s17 = scalar_lea.hbm %s5104_s0, 128 }
  0x18   :  { %p4327_p8 = scmp.ne.s32.totalorder %s5104_s0, %s4326_s17  ;;  %p4330_p9 = scmp.lt.u32.totalorder %s4326_s17, %s5104_s0 }
  0x1a   :  { %p4332_p10 = pnand %p4330_p9, %p4327_p8 }
  0x1c   :  { %4335 = shalt.err (!%p4332_p10)
}
  0x1d   :  { %s4336_s1 = scalar_lea.vmem %s23_s12, 128  ;;  %p4341_p12 = scmp.lt.s32.totalorder %s23_s12, %s23_s12 }
  0x1e   :  { %p4337_p11 = scmp.ne.s32.totalorder %s23_s12, %s4336_s1  ;;  %p4342_p13 = scmp.lt.s32.totalorder %s4336_s1, %s4336_s1 }
  0x20   :  { %p4343_p0 = por %p4342_p13, %p4341_p12 }
  0x22   :  { %p4344_p1 = pnand %p4343_p0, %p4337_p11 }
  0x24   :  { %4347 = shalt.err (!%p4344_p1)
}
  0x25   :  { %25 = dma.hbm_to_vmem [thread:$0]  %s5104_s0, 128, %s23_s12, [#allocation4]  }
  0x26   :  { %s4348_s26 = scalar_lea.hbm %s5107_s3, 4096 }
  0x27   :  { %p4349_p2 = scmp.ne.s32.totalorder %s5107_s3, %s4348_s26  ;;  %p4352_p3 = scmp.lt.u32.totalorder %s4348_s26, %s5107_s3 }
  0x29   :  { %p4354_p4 = pnand %p4352_p3, %p4349_p2 }
  0x2b   :  { %4357 = shalt.err (!%p4354_p4)
}
  0x2c   :  { %s4358_s7 = scalar_lea.vmem %s46_s14, 4096  ;;  %p4363_p6 = scmp.lt.s32.totalorder %s46_s14, %s46_s14 }
  0x2d   :  { %p4359_p5 = scmp.ne.s32.totalorder %s46_s14, %s4358_s7  ;;  %p4364_p7 = scmp.lt.s32.totalorder %s4358_s7, %s4358_s7 }
  0x2f   :  { %p4365_p8 = por %p4364_p7, %p4363_p6 }
  0x31   :  { %p4366_p9 = pnand %p4365_p8, %p4359_p5 }
  0x33   :  { %4369 = shalt.err (!%p4366_p9)
}
  0x34   :  { %s4441_s0 = smov 1024   ;;  %s4442_s8 = smov 64  }
  0x35   :  { %51 = dma.hbm_to_vmem [thread:$0]  %s5107_s3, 4096, %s46_s14, [#allocation8], %s4441_s0, %s4441_s0, %s4442_s8  }
  0x36   :  { %s4443_s11 = smov [#allocation10]   ;;  %s68_s16 = sshll.u32 %s5109_s5, 4  ;;  %s69_s16 = int_to_ptr.vmem [resolvable:$true] %s68_s16 }
  0x37   :  { %s58_s12 = sshll.u32 %s4443_s11, 4  ;;  %s4370_s19 = scalar_lea.hbm %s5108_s4, 256  ;;  %s59_s12 = int_to_ptr.vmem [resolvable:$true] %s58_s12 }
  0x38   :  { %p4371_p10 = scmp.ne.s32.totalorder %s5108_s4, %s4370_s19  ;;  %p4374_p11 = scmp.lt.u32.totalorder %s4370_s19, %s5108_s4 }
  0x3a   :  { %p4376_p12 = pnand %p4374_p11, %p4371_p10 }
  0x3c   :  { %4379 = shalt.err (!%p4376_p12)
}
  0x3d   :  { %s4380_s3 = scalar_lea.vmem %s59_s12, 256  ;;  %p4385_p0 = scmp.lt.s32.totalorder %s59_s12, %s59_s12 }
  0x3e   :  { %p4381_p13 = scmp.ne.s32.totalorder %s59_s12, %s4380_s3  ;;  %p4386_p1 = scmp.lt.s32.totalorder %s4380_s3, %s4380_s3 }
  0x40   :  { %p4387_p2 = por %p4386_p1, %p4385_p0 }
  0x42   :  { %p4388_p3 = pnand %p4387_p2, %p4381_p13 }
  0x44   :  { %4391 = shalt.err (!%p4388_p3)
}
  0x45   :  { %61 = dma.hbm_to_vmem [thread:$0]  %s5108_s4, 256, %s59_s12, [#allocation11]  }
  0x46   :  { %s4392_s23 = scalar_lea.vmem %s69_s16, 16  ;;  %p4397_p5 = scmp.lt.s32.totalorder %s69_s16, %s69_s16 }
  0x47   :  { %p4393_p4 = scmp.ne.s32.totalorder %s69_s16, %s4392_s23  ;;  %p4398_p6 = scmp.lt.s32.totalorder %s4392_s23, %s4392_s23 }
  0x49   :  { %p4399_p7 = por %p4398_p6, %p4397_p5 }
  0x4b   :  { %p4400_p8 = pnand %p4399_p7, %p4393_p4 }
  0x4d   :  { %4403 = shalt.err (!%p4400_p8)
}
  0x4e   :  { %s4444_s24 = smov [#allocation12]  }
  0x4f   :  { %71 = dma.vmem_to_smem %s69_s16, 16, %s4444_s24, [#allocation6]  }
  0x50   :  { %4426 = dma.done.wait [#allocation4], 128  }
  0x51   :  { %4427 = vsyncadd [#allocation4], 4294967168 }
  0x52   :  { %4428 = dma.done.wait [#allocation8], 7168  }
  0x53   :  { %4429 = vsyncadd [#allocation8], 4294960128 }
  0x54   :  { %4430 = dma.done.wait [#allocation11], 256  }
  0x55   :  { %4431 = vsyncadd [#allocation11], 4294967040 }
  0x56   :  { %4432 = dma.done.wait [#allocation6], 16  }
  0x57   :  { %4433 = vsyncadd [#allocation6], 4294967280 }
  0x58   :  { %87 = sfence }
  0x59   :  { %v92_v0 = vld [vmem:[#allocation7] sm:$0xff]  ;;  %v93_v1 = vld [vmem:[#allocation7 + $0x8] sm:$0xff]  ;;  %v4445_v3 = vmov 0.0|0.0   ;;  %v94_v6 = vld [vmem:[#allocation7 + $0x10] sm:$0xff]  ;;  %vm89_vm0 = vcmask 261120   ;;  %vm4446_vm1 = vmmov 0  }
  0x5a   :  { %v177_v2 = vld [vmem:[#allocation7 + $0x20] sm:$0xff]  ;;  %3952 = vmatprep.subr.bf16.mxu0 %v4445_v3  ;;  %3958 = vmatprep.subr.bf16.mxu1 %v4445_v3  ;;  %v3953_v4 = vpack.c.bf16 %v93_v1, %v92_v0  ;;  %v178_v5 = vld [vmem:[#allocation7 + $0x28] sm:$0xff]  ;;  %v95_v7 = vld [vmem:[#allocation7 + $0x18] sm:$0xff]  ;;  %v4447_v11 = vmov 0.0   ;;  %s4448_s28 = smov 96   ;;  %vm286_vm2 = vcmask 253952  }
  0x5b   :  { %v4539_v8 = vpack.c.bf16 %v178_v5, %v177_v2  ;;  %v179_v9 = vld [vmem:[#allocation7 + $0x30] sm:$0xff]  ;;  %v180_v10 = vld [vmem:[#allocation7 + $0x38] sm:$0xff]  ;;  %3663 = vmatprep.mubr.msk.f32.mxu0 %vm4446_vm1, %v4447_v11  ;;  %3674 = vmatprep.mubr.msk.f32.mxu1 %vm4446_vm1, %v4447_v11  ;;  %v3956_v13 = vpack.c.bf16 %v95_v7, %v94_v6  ;;  %vm394_vm3 = vcmask 254977   ;;  %vm616_vm4 = vcmask 257027   ;;  %s4449_s13 = smov [#allocation13]  }
  0x5c   :  { %v88_v12 = vld [vmem:[#allocation3] sm:$0xff]  ;;  %3954 = vmatpush3.bf16.msra.mxu0 %v3953_v4  ;;  %v4548_v14 = vpack.c.bf16 %v180_v10, %v179_v9  ;;  %v4571_v16 = vld [vmem:[%s5106_s2 + $0x1] sm:$0x1]  ;;  %v3459_v22 = vld [vmem:[%s5106_s2] ss:$0 sm:$0xff]  ;;  %vm838_vm5 = vcmask 259077  }
  0x5d   :  { %90 = vst.msk [vmem:[#allocation2] sm:$0xff] %vm89_vm0, %v88_v12  ;;  %3960 = vmatpush3.bf16.msra.mxu1 %v4539_v8  ;;  %3955 = vmatprep.subr.bf16.mxu0 %v4445_v3  ;;  %vm505_vm6 = vcmask 256002   ;;  %vm727_vm7 = vcmask 258052   ;;  %vm949_vm8 = vcmask 260102   ;;  %vm1060_vm9 = vcmask 261127   ;;  %s3447_s15 = sshll.u32 %s4449_s13, 4  ;;  %s3448_s15 = int_to_ptr.vmem [resolvable:$true] %s3447_s15 }
  0x5e   :  { %3961 = vmatprep.subr.bf16.mxu1 %v4445_v3  ;;  %s4404_s16 = scalar_lea.vmem %s3448_s15, 128  ;;  %p4409_p10 = scmp.lt.s32.totalorder %s3448_s15, %s3448_s15 }
  0x5f   :  { %p4405_p9 = scmp.ne.s32.totalorder %s3448_s15, %s4404_s16  ;;  %p4410_p11 = scmp.lt.s32.totalorder %s4404_s16, %s4404_s16 }
  0x60   :  { %3957 = vmatpush3.bf16.msra.mxu0 %v3956_v13 }
  0x61   :  { %3963 = vmatpush3.bf16.msra.mxu1 %v4548_v14  ;;  %3964 = vmatprep.subr.bf16.mxu0 %v4445_v3  ;;  %p4411_p12 = por %p4410_p11, %p4409_p10 }
  0x62   :  { %3970 = vmatprep.subr.bf16.mxu1 %v4445_v3 }
  0x63   :  { %p4412_p13 = pnand %p4411_p12, %p4405_p9 }
  0x64   :  { %v91_v15 = vld [vmem:[#allocation2] sm:$0xff]  ;;  %3675 = vmatmul.mubr.f32.vlgmr.msra.gmra.mrb[0].mxu1 %v4447_v11 }
  0x65   :  { %3664 = vmatmul.mubr.msk.f32.vlgmr.msra.gmra.mrb[0].mxu0 %vm89_vm0, %v91_v15  ;;  %3972 = vmatpush3.bf16.msra.mxu1 %v4539_v8 }
  0x66   :  { %3966 = vmatpush3.bf16.msra.mxu0 %v4539_v8  ;;  %3685 = vmatprep.mubr.msk.f32.mxu0 %vm4446_vm1, %v4447_v11 }
  0x67   :  { %3967 = vmatprep.subr.bf16.mxu0 %v4445_v3  ;;  %3973 = vmatprep.subr.bf16.mxu1 %v4445_v3 }
  0x68   :  { %3696 = vmatprep.mubr.msk.f32.mxu1 %vm4446_vm1, %v4447_v11 }
  0x69   :  { %3975 = vmatpush3.bf16.msra.mxu1 %v4548_v14 }
  0x6a   :  { %3969 = vmatpush3.bf16.msra.mxu0 %v4548_v14  ;;  %3982 = vmatprep.subr.bf16.mxu1 %v4445_v3 }
  0x6b   :  { %3976 = vmatprep.subr.bf16.mxu0 %v4445_v3 }
 0x137   :  { %v252_v18 = vpop.f32.mrb[0].mxu1 }
 0x138   :  { %v172_v17 = vpop.f32.mrb[0].mxu0  ;;  %v253_v19 = vadd.f32 %v4571_v16, %v252_v18  ;;  %v3676_v20 = vpop.f32.mrb[1].mxu1 }
 0x139   :  { %v3665_v21 = vpop.f32.mrb[1].mxu0  ;;  %v4578_v23 = vadd.f32 %v3459_v22, %v172_v17 }
 0x13a   :  { %264 = vrot.lane.b32.xlu0 %v253_v19, %s4442_s8 }
 0x13b   :  { %v256_v24 = vadd.f32 %v253_v19, %v4578_v23 }
 0x13d   :  { %v3462_v25 = vmul.f32 -1.442695, %v256_v24 }
 0x13f   :  { %4160 = vpow2.f32 %v3462_v25 }
 0x149   :  { %v4161_v26 = vpop.eup %4160 }
 0x14a   :  { %v260_v27 = vadd.f32 1.0, %v4161_v26 }
 0x14c   :  { %4162 = vrcp.f32 %v260_v27 }
 0x156   :  { %v4163_v28 = vpop.eup %4162 }
 0x157   :  { %v274_v34 = vsub.f32 1.0, %v4163_v28  ;;  %v280_v36 = vmul.f32 0.0, %v4163_v28 }
 0x1ac   :  { %v265_v29 = vpop.permute.xlu0 %264 }
 0x1ad   :  { %v267_v30 = vmul.f32 %v4163_v28, %v265_v29 }
 0x1af   :  { %269 = vrot.lane.b32.xlu0 %v267_v30, %s4442_s8 }
 0x221   :  { %v270_v31 = vpop.permute.xlu0 %269 }
 0x222   :  { %v272_v32 = vadd.f32 %v270_v31, %v4578_v23 }
 0x224   :  { %4164 = vtanh.f32 %v272_v32 }
 0x22e   :  { %v4165_v33 = vpop.eup %4164 }
 0x22f   :  { %276 = vrot.lane.b32.xlu1 %v4165_v33, %s4448_s28 }
 0x2a1   :  { %v277_v35 = vpop.permute.xlu1 %276 }
 0x2a2   :  { %v279_v37 = vmul.f32 %v277_v35, %v274_v34 }
 0x2a4   :  { %v281_v38 = vadd.f32 %v280_v36, %v279_v37 }
 0x2a6   :  { %283 = vrot.lane.b32.xlu1 %v281_v38, %s4448_s28  ;;  %v386_v54 = vrot.slane %v281_v38, 7 }
 0x318   :  { %v284_v39 = vpop.permute.xlu1 %283 }
 0x319   :  { %287 = vst.msk [vmem:[#allocation2] sm:$0x1] %vm286_vm2, %v284_v39  ;;  %3686 = vmatmul.mubr.msk.f32.vlgmr.msra.gmra.mrb[2].mxu0 %vm89_vm0, %v284_v39 }
 0x31a   :  { %3978 = vmatpush3.bf16.msra.mxu0 %v4539_v8  ;;  %3707 = vmatprep.mubr.msk.f32.mxu0 %vm4446_vm1, %v4447_v11 }
 0x31b   :  { %3979 = vmatprep.subr.bf16.mxu0 %v4445_v3 }
 0x31e   :  { %3981 = vmatpush3.bf16.msra.mxu0 %v4548_v14 }
 0x31f   :  { %3988 = vmatprep.subr.bf16.mxu0 %v4445_v3 }
 0x3ec   :  { %v356_v40 = vpop.f32.mrb[2].mxu0 }
 0x3ed   :  { %v357_v41 = vadd.f32 %v4571_v16, %v356_v40  ;;  %v3687_v42 = vpop.f32.mrb[3].mxu0 }
 0x3ef   :  { %v361_v43 = vrot.slane %v357_v41, 7 }
 0x3f1   :  { %370 = vrot.lane.b32.xlu0 %v361_v43, %s4442_s8  ;;  %v363_v44 = vadd.f32 %v361_v43, %v4578_v23 }
 0x3f3   :  { %v3464_v45 = vmul.f32 -1.442695, %v363_v44 }
 0x3f5   :  { %4166 = vpow2.f32 %v3464_v45 }
 0x3ff   :  { %v4167_v46 = vpop.eup %4166 }
 0x400   :  { %v367_v47 = vadd.f32 1.0, %v4167_v46 }
 0x402   :  { %4168 = vrcp.f32 %v367_v47 }
 0x40c   :  { %v4169_v48 = vpop.eup %4168 }
 0x40d   :  { %v380_v55 = vsub.f32 1.0, %v4169_v48  ;;  %v388_v57 = vmul.f32 %v4169_v48, %v386_v54 }
 0x463   :  { %v371_v49 = vpop.permute.xlu0 %370 }
 0x464   :  { %v373_v50 = vmul.f32 %v4169_v48, %v371_v49 }
 0x466   :  { %375 = vrot.lane.b32.xlu1 %v373_v50, %s4442_s8 }
 0x4d8   :  { %v376_v51 = vpop.permute.xlu1 %375 }
 0x4d9   :  { %v378_v52 = vadd.f32 %v376_v51, %v4578_v23 }
 0x4db   :  { %4170 = vtanh.f32 %v378_v52 }
 0x4e5   :  { %v4171_v53 = vpop.eup %4170 }
 0x4e6   :  { %382 = vrot.lane.b32.xlu0 %v4171_v53, %s4448_s28 }
 0x558   :  { %v383_v56 = vpop.permute.xlu0 %382 }
 0x559   :  { %v385_v58 = vmul.f32 %v383_v56, %v380_v55 }
 0x55b   :  { %v4599_v59 = vadd.f32 %v388_v57, %v385_v58 }
 0x55d   :  { %v396_v60 = vrot.slane %v4599_v59, 1  ;;  %v497_v18 = vrot.slane %v4599_v59, 7 }
 0x55f   :  { %397 = vrot.lane.b32.xlu1 %v396_v60, %s4448_s28 }
 0x5d1   :  { %v398_v61 = vpop.permute.xlu1 %397 }
 0x5d2   :  { %3697 = vmatmul.mubr.msk.f32.vlgmr.msra.gmra.mrb[2].mxu1 %vm89_vm0, %v398_v61 }
 0x5d3   :  { %3984 = vmatpush3.bf16.msra.mxu1 %v4539_v8  ;;  %3718 = vmatprep.mubr.msk.f32.mxu1 %vm4446_vm1, %v4447_v11 }
 0x5d4   :  { %3985 = vmatprep.subr.bf16.mxu1 %v4445_v3 }
 0x5d7   :  { %3987 = vmatpush3.bf16.msra.mxu1 %v4548_v14 }
 0x5d8   :  { %3994 = vmatprep.subr.bf16.mxu1 %v4445_v3 }
 0x6a5   :  { %v467_v62 = vpop.f32.mrb[2].mxu1 }
 0x6a6   :  { %v468_v63 = vadd.f32 %v4571_v16, %v467_v62  ;;  %v3698_v0 = vpop.f32.mrb[3].mxu1 }
 0x6a8   :  { %v472_v1 = vrot.slane %v468_v63, 6 }
 0x6aa   :  { %481 = vrot.lane.b32.xlu0 %v472_v1, %s4442_s8  ;;  %v474_v2 = vadd.f32 %v472_v1, %v4578_v23 }
 0x6ac   :  { %v3466_v4 = vmul.f32 -1.442695, %v474_v2 }
 0x6ae   :  { %4172 = vpow2.f32 %v3466_v4 }
 0x6b8   :  { %v4173_v5 = vpop.eup %4172 }
 0x6b9   :  { %v478_v6 = vadd.f32 1.0, %v4173_v5 }
 0x6bb   :  { %4174 = vrcp.f32 %v478_v6 }
 0x6c5   :  { %v4175_v7 = vpop.eup %4174 }
 0x6c6   :  { %v491_v17 = vsub.f32 1.0, %v4175_v7  ;;  %v499_v20 = vmul.f32 %v4175_v7, %v497_v18 }
 0x71c   :  { %v482_v9 = vpop.permute.xlu0 %481 }
 0x71d   :  { %v484_v10 = vmul.f32 %v4175_v7, %v482_v9 }
 0x71f   :  { %486 = vrot.lane.b32.xlu1 %v484_v10, %s4442_s8 }
 0x791   :  { %v487_v12 = vpop.permute.xlu1 %486 }
 0x792   :  { %v489_v13 = vadd.f32 %v487_v12, %v4578_v23 }
 0x794   :  { %4176 = vtanh.f32 %v489_v13 }
 0x79e   :  { %v4177_v15 = vpop.eup %4176 }
 0x79f   :  { %493 = vrot.lane.b32.xlu0 %v4177_v15, %s4448_s28 }
 0x811   :  { %v494_v19 = vpop.permute.xlu0 %493 }
 0x812   :  { %v496_v21 = vmul.f32 %v494_v19, %v491_v17 }
 0x814   :  { %v4617_v22 = vadd.f32 %v499_v20, %v496_v21 }
 0x816   :  { %v507_v24 = vrot.slane %v4617_v22, 2  ;;  %v608_v41 = vrot.slane %v4617_v22, 7 }
 0x818   :  { %508 = vrot.lane.b32.xlu1 %v507_v24, %s4448_s28 }
 0x88a   :  { %v509_v25 = vpop.permute.xlu1 %508 }
 0x88b   :  { %3708 = vmatmul.mubr.msk.f32.vlgmr.msra.gmra.mrb[4].mxu0 %vm89_vm0, %v509_v25 }
 0x88c   :  { %3990 = vmatpush3.bf16.msra.mxu0 %v4539_v8  ;;  %3729 = vmatprep.mubr.msk.f32.mxu0 %vm4446_vm1, %v4447_v11 }
 0x88d   :  { %3991 = vmatprep.subr.bf16.mxu0 %v4445_v3 }
 0x890   :  { %3993 = vmatpush3.bf16.msra.mxu0 %v4548_v14 }
 0x891   :  { %4000 = vmatprep.subr.bf16.mxu0 %v4445_v3 }
 0x95e   :  { %v578_v26 = vpop.f32.mrb[4].mxu0 }
 0x95f   :  { %v579_v27 = vadd.f32 %v4571_v16, %v578_v26  ;;  %v3709_v28 = vpop.f32.mrb[5].mxu0 }
 0x961   :  { %v583_v29 = vrot.slane %v579_v27, 5 }
 0x963   :  { %592 = vrot.lane.b32.xlu0 %v583_v29, %s4442_s8  ;;  %v585_v30 = vadd.f32 %v583_v29, %v4578_v23 }
 0x965   :  { %v3468_v31 = vmul.f32 -1.442695, %v585_v30 }
 0x967   :  { %4178 = vpow2.f32 %v3468_v31 }
 0x971   :  { %v4179_v32 = vpop.eup %4178 }
 0x972   :  { %v589_v33 = vadd.f32 1.0, %v4179_v32 }
 0x974   :  { %4180 = vrcp.f32 %v589_v33 }
 0x97e   :  { %v4181_v34 = vpop.eup %4180 }
 0x97f   :  { %v602_v40 = vsub.f32 1.0, %v4181_v34  ;;  %v610_v43 = vmul.f32 %v4181_v34, %v608_v41 }
 0x9d5   :  { %v593_v35 = vpop.permute.xlu0 %592 }
 0x9d6   :  { %v595_v36 = vmul.f32 %v4181_v34, %v593_v35 }
 0x9d8   :  { %597 = vrot.lane.b32.xlu1 %v595_v36, %s4442_s8 }
 0xa4a   :  { %v598_v37 = vpop.permute.xlu1 %597 }
 0xa4b   :  { %v600_v38 = vadd.f32 %v598_v37, %v4578_v23 }
 0xa4d   :  { %4182 = vtanh.f32 %v600_v38 }
 0xa57   :  { %v4183_v39 = vpop.eup %4182 }
 0xa58   :  { %604 = vrot.lane.b32.xlu0 %v4183_v39, %s4448_s28 }
 0xaca   :  { %v605_v42 = vpop.permute.xlu0 %604 }
 0xacb   :  { %v607_v44 = vmul.f32 %v605_v42, %v602_v40 }
 0xacd   :  { %v4635_v45 = vadd.f32 %v610_v43, %v607_v44 }
 0xacf   :  { %v618_v46 = vrot.slane %v4635_v45, 3  ;;  %v719_v0 = vrot.slane %v4635_v45, 7 }
 0xad1   :  { %619 = vrot.lane.b32.xlu1 %v618_v46, %s4448_s28 }
 0xb43   :  { %v620_v47 = vpop.permute.xlu1 %619 }
 0xb44   :  { %3719 = vmatmul.mubr.msk.f32.vlgmr.msra.gmra.mrb[4].mxu1 %vm89_vm0, %v620_v47 }
 0xb45   :  { %3996 = vmatpush3.bf16.msra.mxu1 %v4539_v8  ;;  %3740 = vmatprep.mubr.msk.f32.mxu1 %vm4446_vm1, %v4447_v11 }
 0xb46   :  { %3997 = vmatprep.subr.bf16.mxu1 %v4445_v3 }
 0xb49   :  { %3999 = vmatpush3.bf16.msra.mxu1 %v4548_v14 }
 0xb4a   :  { %4006 = vmatprep.subr.bf16.mxu1 %v4445_v3 }
 0xc17   :  { %v689_v48 = vpop.f32.mrb[4].mxu1 }
 0xc18   :  { %v690_v49 = vadd.f32 %v4571_v16, %v689_v48  ;;  %v3720_v50 = vpop.f32.mrb[5].mxu1 }
 0xc1a   :  { %v694_v51 = vrot.slane %v690_v49, 4 }
 0xc1c   :  { %703 = vrot.lane.b32.xlu0 %v694_v51, %s4442_s8  ;;  %v696_v52 = vadd.f32 %v694_v51, %v4578_v23 }
 0xc1e   :  { %v3470_v53 = vmul.f32 -1.442695, %v696_v52 }
 0xc20   :  { %4184 = vpow2.f32 %v3470_v53 }
 0xc2a   :  { %v4185_v54 = vpop.eup %4184 }
 0xc2b   :  { %v700_v55 = vadd.f32 1.0, %v4185_v54 }
 0xc2d   :  { %4186 = vrcp.f32 %v700_v55 }
 0xc37   :  { %v4187_v56 = vpop.eup %4186 }
 0xc38   :  { %v713_v63 = vsub.f32 1.0, %v4187_v56  ;;  %v721_v2 = vmul.f32 %v4187_v56, %v719_v0 }
 0xc8e   :  { %v704_v57 = vpop.permute.xlu0 %703 }
 0xc8f   :  { %v706_v58 = vmul.f32 %v4187_v56, %v704_v57 }
 0xc91   :  { %708 = vrot.lane.b32.xlu1 %v706_v58, %s4442_s8 }
 0xd03   :  { %v709_v60 = vpop.permute.xlu1 %708 }
 0xd04   :  { %v711_v61 = vadd.f32 %v709_v60, %v4578_v23 }
 0xd06   :  { %4188 = vtanh.f32 %v711_v61 }
 0xd10   :  { %v4189_v62 = vpop.eup %4188 }
 0xd11   :  { %715 = vrot.lane.b32.xlu0 %v4189_v62, %s4448_s28 }
 0xd83   :  { %v716_v1 = vpop.permute.xlu0 %715 }
 0xd84   :  { %v718_v4 = vmul.f32 %v716_v1, %v713_v63 }
 0xd86   :  { %v4653_v5 = vadd.f32 %v721_v2, %v718_v4 }
 0xd88   :  { %v729_v6 = vrot.slane %v4653_v5, 4  ;;  %v830_v27 = vrot.slane %v4653_v5, 7 }
 0xd8a   :  { %730 = vrot.lane.b32.xlu1 %v729_v6, %s4448_s28 }
 0xdfc   :  { %v731_v7 = vpop.permute.xlu1 %730 }
 0xdfd   :  { %3730 = vmatmul.mubr.msk.f32.vlgmr.msra.gmra.mrb[6].mxu0 %vm89_vm0, %v731_v7 }
 0xdfe   :  { %4002 = vmatpush3.bf16.msra.mxu0 %v4539_v8  ;;  %3751 = vmatprep.mubr.msk.f32.mxu0 %vm4446_vm1, %v4447_v11 }
 0xdff   :  { %4003 = vmatprep.subr.bf16.mxu0 %v4445_v3 }
 0xe02   :  { %4005 = vmatpush3.bf16.msra.mxu0 %v4548_v14 }
 0xe03   :  { %4012 = vmatprep.subr.bf16.mxu0 %v4445_v3 }
 0xed0   :  { %v800_v9 = vpop.f32.mrb[6].mxu0 }
 0xed1   :  { %v801_v10 = vadd.f32 %v4571_v16, %v800_v9  ;;  %v3731_v12 = vpop.f32.mrb[7].mxu0 }
 0xed3   :  { %v805_v13 = vrot.slane %v801_v10, 3 }
 0xed5   :  { %814 = vrot.lane.b32.xlu0 %v805_v13, %s4442_s8  ;;  %v807_v15 = vadd.f32 %v805_v13, %v4578_v23  ;;  %v1151_v13 = vld [vmem:[#allocation7 + $0x68] sm:$0xff] }
 0xed7   :  { %v3472_v17 = vmul.f32 -1.442695, %v807_v15  ;;  %v1152_v15 = vld [vmem:[#allocation7 + $0x70] sm:$0xff] }
 0xed9   :  { %4190 = vpow2.f32 %v3472_v17  ;;  %v1153_v17 = vld [vmem:[#allocation7 + $0x78] sm:$0xff] }
 0xee3   :  { %v4191_v8 = vpop.eup %4190 }
 0xee4   :  { %v811_v18 = vadd.f32 1.0, %v4191_v8  ;;  %v4705_v8 = vpack.c.bf16 %v1153_v17, %v1152_v15 }
 0xee6   :  { %4192 = vrcp.f32 %v811_v18  ;;  %v1065_v18 = vld [vmem:[#allocation7 + $0x48] sm:$0xff] }
 0xef0   :  { %v4193_v19 = vpop.eup %4192 }
 0xef1   :  { %v824_v26 = vsub.f32 1.0, %v4193_v19  ;;  %v832_v29 = vmul.f32 %v4193_v19, %v830_v27 }
 0xf47   :  { %v815_v20 = vpop.permute.xlu0 %814 }
 0xf48   :  { %v817_v21 = vmul.f32 %v4193_v19, %v815_v20  ;;  %v1067_v20 = vld [vmem:[#allocation7 + $0x58] sm:$0xff] }
 0xf4a   :  { %819 = vrot.lane.b32.xlu1 %v817_v21, %s4442_s8 }
 0xfbc   :  { %v820_v14 = vpop.permute.xlu1 %819 }
 0xfbd   :  { %v822_v24 = vadd.f32 %v820_v14, %v4578_v23 }
 0xfbf   :  { %4194 = vtanh.f32 %v822_v24 }
 0xfc9   :  { %v4195_v25 = vpop.eup %4194 }
 0xfca   :  { %826 = vrot.lane.b32.xlu0 %v4195_v25, %s4448_s28 }
0x103c   :  { %v827_v28 = vpop.permute.xlu0 %826 }
0x103d   :  { %v829_v30 = vmul.f32 %v827_v28, %v824_v26 }
0x103f   :  { %v833_v31 = vadd.f32 %v832_v29, %v829_v30 }
0x1041   :  { %v840_v32 = vrot.slane %v833_v31, 5  ;;  %v941_v50 = vrot.slane %v833_v31, 7 }
0x1043   :  { %841 = vrot.lane.b32.xlu1 %v840_v32, %s4448_s28  ;;  %v4733_v32 = vld [vmem:[%s5106_s2 + $0x3] sm:$0x1] }
0x10b5   :  { %v842_v33 = vpop.permute.xlu1 %841 }
0x10b6   :  { %3741 = vmatmul.mubr.msk.f32.vlgmr.msra.gmra.mrb[6].mxu1 %vm89_vm0, %v842_v33 }
0x10b7   :  { %3762 = vmatprep.mubr.msk.f32.mxu1 %vm4446_vm1, %v4447_v11 }
0x1189   :  { %v911_v34 = vpop.f32.mrb[6].mxu1 }
0x118a   :  { %v912_v35 = vadd.f32 %v4571_v16, %v911_v34  ;;  %v3742_v36 = vpop.f32.mrb[7].mxu1 }
0x118c   :  { %v916_v37 = vrot.slane %v912_v35, 2 }
0x118e   :  { %925 = vrot.lane.b32.xlu0 %v916_v37, %s4442_s8  ;;  %v918_v38 = vadd.f32 %v916_v37, %v4578_v23 }
0x1190   :  { %v3474_v39 = vmul.f32 -1.442695, %v918_v38  ;;  %v3478_v38 = vld [vmem:[%s5106_s2 + $0x2] ss:$0 sm:$0xff] }
0x1192   :  { %4196 = vpow2.f32 %v3474_v39 }
0x119c   :  { %v4197_v40 = vpop.eup %4196 }
0x119d   :  { %v922_v41 = vadd.f32 1.0, %v4197_v40 }
0x119f   :  { %4198 = vrcp.f32 %v922_v41 }
0x11a9   :  { %v4199_v42 = vpop.eup %4198 }
0x11aa   :  { %v935_v49 = vsub.f32 1.0, %v4199_v42  ;;  %v943_v52 = vmul.f32 %v4199_v42, %v941_v50 }
0x1200   :  { %v926_v43 = vpop.permute.xlu0 %925 }
0x1201   :  { %v928_v44 = vmul.f32 %v4199_v42, %v926_v43 }
0x1203   :  { %930 = vrot.lane.b32.xlu1 %v928_v44, %s4442_s8 }
0x1275   :  { %v931_v46 = vpop.permute.xlu1 %930 }
0x1276   :  { %v933_v47 = vadd.f32 %v931_v46, %v4578_v23 }
0x1278   :  { %4200 = vtanh.f32 %v933_v47 }
0x1282   :  { %v4201_v48 = vpop.eup %4200 }
0x1283   :  { %937 = vrot.lane.b32.xlu0 %v4201_v48, %s4448_s28 }
0x12f5   :  { %v938_v51 = vpop.permute.xlu0 %937 }
0x12f6   :  { %v940_v53 = vmul.f32 %v938_v51, %v935_v49 }
0x12f8   :  { %v4681_v54 = vadd.f32 %v943_v52, %v940_v53 }
0x12fa   :  { %v951_v55 = vrot.slane %v4681_v54, 6  ;;  %v1052_v24 = vrot.slane %v4681_v54, 7 }
0x12fc   :  { %952 = vrot.lane.b32.xlu1 %v951_v55, %s4448_s28 }
0x136e   :  { %v953_v56 = vpop.permute.xlu1 %952 }
0x136f   :  { %3752 = vmatmul.mubr.msk.f32.vlgmr.msra.gmra.mrb[8].mxu0 %vm89_vm0, %v953_v56 }
0x1370   :  { %3773 = vmatprep.mubr.msk.f32.mxu0 %vm4446_vm1, %v4447_v11 }
0x1442   :  { %v1022_v57 = vpop.f32.mrb[8].mxu0 }
0x1443   :  { %v1023_v58 = vadd.f32 %v4571_v16, %v1022_v57  ;;  %v3753_v60 = vpop.f32.mrb[9].mxu0 }
0x1445   :  { %v1027_v61 = vrot.slane %v1023_v58, 1 }
0x1447   :  { %1036 = vrot.lane.b32.xlu0 %v1027_v61, %s4442_s8  ;;  %v1029_v62 = vadd.f32 %v1027_v61, %v4578_v23 }
0x1449   :  { %v3476_v63 = vmul.f32 -1.442695, %v1029_v62 }
0x144b   :  { %4202 = vpow2.f32 %v3476_v63 }
0x1455   :  { %v4203_v0 = vpop.eup %4202 }
0x1456   :  { %v1033_v1 = vadd.f32 1.0, %v4203_v0 }
0x1458   :  { %4204 = vrcp.f32 %v1033_v1 }
0x1462   :  { %v4205_v2 = vpop.eup %4204 }
0x1463   :  { %v1046_v14 = vsub.f32 1.0, %v4205_v2  ;;  %v1054_v26 = vmul.f32 %v4205_v2, %v1052_v24 }
0x14b9   :  { %v1037_v4 = vpop.permute.xlu0 %1036 }
0x14ba   :  { %v1039_v6 = vmul.f32 %v4205_v2, %v1037_v4 }
0x14bc   :  { %1041 = vrot.lane.b32.xlu1 %v1039_v6, %s4442_s8 }
0x14c0   :  { %391 = vrot.lane.b32.xlu1 %v4599_v59, %s4448_s28 }
0x14c4   :  { %613 = vrot.lane.b32.xlu1 %v4635_v45, %s4448_s28  ;;  %v1150_v45 = vld [vmem:[#allocation7 + $0x60] sm:$0xff] }
0x14c8   :  { %835 = vrot.lane.b32.xlu1 %v833_v31, %s4448_s28 }
0x152e   :  { %v1042_v16 = vpop.permute.xlu1 %1041 }
0x152f   :  { %v1044_v7 = vadd.f32 %v1042_v16, %v4578_v23  ;;  %v4702_v23 = vpack.c.bf16 %v1151_v13, %v1150_v45 }
0x1531   :  { %4206 = vtanh.f32 %v1044_v7  ;;  %4014 = vmatpush3.bf16.msra.mxu0 %v4702_v23 }
0x1532   :  { %v392_v9 = vpop.permute.xlu1 %391  ;;  %4015 = vmatprep.subr.bf16.mxu0 %v4445_v3 }
0x1533   :  { %395 = vst.msk [vmem:[#allocation2] sm:$0x2] %vm394_vm3, %v392_v9 }
0x1535   :  { %4017 = vmatpush3.bf16.msra.mxu0 %v4705_v8 }
0x1536   :  { %v614_v10 = vpop.permute.xlu1 %613  ;;  %4024 = vmatprep.subr.bf16.mxu0 %v4445_v3 }
0x1537   :  { %617 = vst.msk [vmem:[#allocation2] sm:$0x8] %vm616_vm4, %v614_v10 }
0x1538   :  { %3774 = vmatmul.mubr.f32.vlgmr.msra.gmra.mrb[10].mxu0 %v4447_v11 }
0x1539   :  { %4026 = vmatpush3.bf16.msra.mxu0 %v4702_v23  ;;  %3795 = vmatprep.mubr.msk.f32.mxu0 %vm4446_vm1, %v4447_v11 }
0x153a   :  { %v836_v12 = vpop.permute.xlu1 %835  ;;  %4027 = vmatprep.subr.bf16.mxu0 %v4445_v3 }
0x153b   :  { %v4207_v59 = vpop.eup %4206  ;;  %839 = vst.msk [vmem:[#allocation2] sm:$0x20] %vm838_vm5, %v836_v12 }
0x153c   :  { %1048 = vrot.lane.b32.xlu0 %v4207_v59, %s4448_s28 }
0x153d   :  { %4029 = vmatpush3.bf16.msra.mxu0 %v4705_v8 }
0x153e   :  { %4036 = vmatprep.subr.bf16.mxu0 %v4445_v3 }
0x1540   :  { %502 = vrot.lane.b32.xlu0 %v4617_v22, %s4448_s28  ;;  %v1064_v22 = vld [vmem:[#allocation7 + $0x40] sm:$0xff] }
0x1541   :  { %v4007_v19 = vpack.c.bf16 %v1065_v18, %v1064_v22 }
0x1543   :  { %4008 = vmatpush3.bf16.msra.mxu1 %v4007_v19 }
0x1544   :  { %724 = vrot.lane.b32.xlu0 %v4653_v5, %s4448_s28  ;;  %4009 = vmatprep.subr.bf16.mxu1 %v4445_v3  ;;  %v1066_v5 = vld [vmem:[#allocation7 + $0x50] sm:$0xff] }
0x1545   :  { %v4010_v21 = vpack.c.bf16 %v1067_v20, %v1066_v5 }
0x1547   :  { %4011 = vmatpush3.bf16.msra.mxu1 %v4010_v21 }
0x1548   :  { %946 = vrot.lane.b32.xlu0 %v4681_v54, %s4448_s28  ;;  %4018 = vmatprep.subr.bf16.mxu1 %v4445_v3 }
0x15ae   :  { %v1049_v25 = vpop.permute.xlu0 %1048 }
0x15af   :  { %v1051_v27 = vmul.f32 %v1049_v25, %v1046_v14 }
0x15b1   :  { %v1055_v28 = vadd.f32 %v1054_v26, %v1051_v27 }
0x15b2   :  { %v503_v29 = vpop.permute.xlu0 %502 }
0x15b3   :  { %506 = vst.msk [vmem:[#allocation2] sm:$0x4] %vm505_vm6, %v503_v29  ;;  %1057 = vrot.lane.b32.xlu1 %v1055_v28, %s4448_s28 }
0x15b6   :  { %v725_v30 = vpop.permute.xlu0 %724 }
0x15b7   :  { %728 = vst.msk [vmem:[#allocation2] sm:$0x10] %vm727_vm7, %v725_v30 }
0x15ba   :  { %v947_v31 = vpop.permute.xlu0 %946 }
0x15bb   :  { %950 = vst.msk [vmem:[#allocation2] sm:$0x40] %vm949_vm8, %v947_v31 }
0x160b   :  { %v1222_v33 = vpop.f32.mrb[10].mxu0 }
0x160c   :  { %v1223_v34 = vadd.f32 %v4733_v32, %v1222_v33  ;;  %v3775_v35 = vpop.f32.mrb[11].mxu0 }
0x160e   :  { %1234 = vrot.lane.b32.xlu0 %v1223_v34, %s4442_s8 }
0x1625   :  { %v1058_v36 = vpop.permute.xlu1 %1057 }
0x1626   :  { %1061 = vst.msk [vmem:[#allocation2] sm:$0x80] %vm1060_vm9, %v1058_v36 }
0x162d   :  { %v1062_v37 = vld [vmem:[#allocation2] sm:$0xff] }
0x162e   :  { %3763 = vmatmul.mubr.msk.f32.vlgmr.msra.gmra.mrb[8].mxu1 %vm89_vm0, %v1062_v37 }
0x162f   :  { %4020 = vmatpush3.bf16.msra.mxu1 %v4702_v23  ;;  %3784 = vmatprep.mubr.msk.f32.mxu1 %vm4446_vm1, %v4447_v11 }
0x1630   :  { %4021 = vmatprep.subr.bf16.mxu1 %v4445_v3 }
0x1633   :  { %4023 = vmatpush3.bf16.msra.mxu1 %v4705_v8 }
0x1634   :  { %4030 = vmatprep.subr.bf16.mxu1 %v4445_v3 }
0x1680   :  { %v1235_v47 = vpop.permute.xlu0 %1234 }
0x1701   :  { %v1145_v39 = vpop.f32.mrb[8].mxu1 }
0x1702   :  { %v4748_v40 = vadd.f32 %v3478_v38, %v1145_v39  ;;  %v3764_v41 = vpop.f32.mrb[9].mxu1 }
0x1704   :  { %v1226_v42 = vadd.f32 %v1223_v34, %v4748_v40 }
0x1706   :  { %v3481_v43 = vmul.f32 -1.442695, %v1226_v42 }
0x1708   :  { %4208 = vpow2.f32 %v3481_v43 }
0x1712   :  { %v4209_v44 = vpop.eup %4208 }
0x1713   :  { %v1230_v46 = vadd.f32 1.0, %v4209_v44 }
0x1715   :  { %4210 = vrcp.f32 %v1230_v46 }
0x171f   :  { %v4211_v48 = vpop.eup %4210 }
0x1720   :  { %v1237_v49 = vmul.f32 %v4211_v48, %v1235_v47  ;;  %v1244_v53 = vsub.f32 1.0, %v4211_v48  ;;  %v1250_v55 = vmul.f32 0.0, %v4211_v48 }
0x1722   :  { %1239 = vrot.lane.b32.xlu1 %v1237_v49, %s4442_s8 }
0x1794   :  { %v1240_v50 = vpop.permute.xlu1 %1239 }
0x1795   :  { %v1242_v51 = vadd.f32 %v1240_v50, %v4748_v40 }
0x1797   :  { %4212 = vtanh.f32 %v1242_v51 }
0x17a1   :  { %v4213_v52 = vpop.eup %4212 }
0x17a2   :  { %1246 = vrot.lane.b32.xlu0 %v4213_v52, %s4448_s28 }
0x1814   :  { %v1247_v54 = vpop.permute.xlu0 %1246 }
0x1815   :  { %v1249_v56 = vmul.f32 %v1247_v54, %v1244_v53 }
0x1817   :  { %v1251_v57 = vadd.f32 %v1250_v55, %v1249_v56 }
0x1819   :  { %1253 = vrot.lane.b32.xlu1 %v1251_v57, %s4448_s28  ;;  %v1355_v59 = vrot.slane %v1251_v57, 7 }
0x188b   :  { %v1254_v58 = vpop.permute.xlu1 %1253 }
0x188c   :  { %1256 = vst.msk [vmem:[#allocation2] sm:$0x1] %vm286_vm2, %v1254_v58  ;;  %3785 = vmatmul.mubr.msk.f32.vlgmr.msra.gmra.mrb[10].mxu1 %vm89_vm0, %v1254_v58 }
0x188d   :  { %4032 = vmatpush3.bf16.msra.mxu1 %v4702_v23  ;;  %3806 = vmatprep.mubr.msk.f32.mxu1 %vm4446_vm1, %v4447_v11 }
0x188e   :  { %4033 = vmatprep.subr.bf16.mxu1 %v4445_v3 }
0x1891   :  { %4035 = vmatpush3.bf16.msra.mxu1 %v4705_v8 }
0x1892   :  { %4042 = vmatprep.subr.bf16.mxu1 %v4445_v3 }
0x195f   :  { %v1325_v60 = vpop.f32.mrb[10].mxu1 }
0x1960   :  { %v1326_v61 = vadd.f32 %v4733_v32, %v1325_v60  ;;  %v3786_v62 = vpop.f32.mrb[11].mxu1 }
0x1962   :  { %v1330_v63 = vrot.slane %v1326_v61, 7 }
0x1964   :  { %1339 = vrot.lane.b32.xlu0 %v1330_v63, %s4442_s8  ;;  %v1332_v0 = vadd.f32 %v1330_v63, %v4748_v40 }
0x1966   :  { %v3483_v1 = vmul.f32 -1.442695, %v1332_v0 }
0x1968   :  { %4214 = vpow2.f32 %v3483_v1 }
0x1972   :  { %v4215_v2 = vpop.eup %4214 }
0x1973   :  { %v1336_v4 = vadd.f32 1.0, %v4215_v2 }
0x1975   :  { %4216 = vrcp.f32 %v1336_v4 }
0x197f   :  { %v4217_v6 = vpop.eup %4216 }
0x1980   :  { %v1349_v45 = vsub.f32 1.0, %v4217_v6  ;;  %v1357_v17 = vmul.f32 %v4217_v6, %v1355_v59 }
0x19d6   :  { %v1340_v16 = vpop.permute.xlu0 %1339 }
0x19d7   :  { %v1342_v7 = vmul.f32 %v4217_v6, %v1340_v16 }
0x19d9   :  { %1344 = vrot.lane.b32.xlu1 %v1342_v7, %s4442_s8 }
0x1a4b   :  { %v1345_v9 = vpop.permute.xlu1 %1344 }
0x1a4c   :  { %v1347_v10 = vadd.f32 %v1345_v9, %v4748_v40 }
0x1a4e   :  { %4218 = vtanh.f32 %v1347_v10 }
0x1a58   :  { %v4219_v12 = vpop.eup %4218 }
0x1a59   :  { %1351 = vrot.lane.b32.xlu0 %v4219_v12, %s4448_s28 }
0x1acb   :  { %v1352_v13 = vpop.permute.xlu0 %1351 }
0x1acc   :  { %v1354_v15 = vmul.f32 %v1352_v13, %v1349_v45 }
0x1ace   :  { %v4769_v22 = vadd.f32 %v1357_v17, %v1354_v15 }
0x1ad0   :  { %v1364_v18 = vrot.slane %v4769_v22, 1  ;;  %v1465_v36 = vrot.slane %v4769_v22, 7 }
0x1ad2   :  { %1365 = vrot.lane.b32.xlu1 %v1364_v18, %s4448_s28 }
0x1b44   :  { %v1366_v19 = vpop.permute.xlu1 %1365 }
0x1b45   :  { %3796 = vmatmul.mubr.msk.f32.vlgmr.msra.gmra.mrb[12].mxu0 %vm89_vm0, %v1366_v19 }
0x1b46   :  { %4038 = vmatpush3.bf16.msra.mxu0 %v4702_v23  ;;  %3817 = vmatprep.mubr.msk.f32.mxu0 %vm4446_vm1, %v4447_v11 }
0x1b47   :  { %4039 = vmatprep.subr.bf16.mxu0 %v4445_v3 }
0x1b4a   :  { %4041 = vmatpush3.bf16.msra.mxu0 %v4705_v8 }
0x1b4b   :  { %4048 = vmatprep.subr.bf16.mxu0 %v4445_v3 }
0x1c18   :  { %v1435_v5 = vpop.f32.mrb[12].mxu0 }
0x1c19   :  { %v1436_v20 = vadd.f32 %v4733_v32, %v1435_v5  ;;  %v3797_v21 = vpop.f32.mrb[13].mxu0 }
0x1c1b   :  { %v1440_v14 = vrot.slane %v1436_v20, 6 }
0x1c1d   :  { %1449 = vrot.lane.b32.xlu0 %v1440_v14, %s4442_s8  ;;  %v1442_v24 = vadd.f32 %v1440_v14, %v4748_v40 }
0x1c1f   :  { %v3485_v25 = vmul.f32 -1.442695, %v1442_v24 }
0x1c21   :  { %4220 = vpow2.f32 %v3485_v25 }
0x1c2b   :  { %v4221_v26 = vpop.eup %4220 }
0x1c2c   :  { %v1446_v27 = vadd.f32 1.0, %v4221_v26 }
0x1c2e   :  { %4222 = vrcp.f32 %v1446_v27 }
0x1c38   :  { %v4223_v28 = vpop.eup %4222 }
0x1c39   :  { %v1459_v35 = vsub.f32 1.0, %v4223_v28  ;;  %v1467_v38 = vmul.f32 %v4223_v28, %v1465_v36 }
0x1c8f   :  { %v1450_v29 = vpop.permute.xlu0 %1449 }
0x1c90   :  { %v1452_v30 = vmul.f32 %v4223_v28, %v1450_v29 }
0x1c92   :  { %1454 = vrot.lane.b32.xlu1 %v1452_v30, %s4442_s8 }
0x1d04   :  { %v1455_v31 = vpop.permute.xlu1 %1454 }
0x1d05   :  { %v1457_v33 = vadd.f32 %v1455_v31, %v4748_v40 }
0x1d07   :  { %4224 = vtanh.f32 %v1457_v33 }
0x1d11   :  { %v4225_v34 = vpop.eup %4224 }
0x1d12   :  { %1461 = vrot.lane.b32.xlu0 %v4225_v34, %s4448_s28 }
0x1d84   :  { %v1462_v37 = vpop.permute.xlu0 %1461 }
0x1d85   :  { %v1464_v39 = vmul.f32 %v1462_v37, %v1459_v35 }
0x1d87   :  { %v4787_v41 = vadd.f32 %v1467_v38, %v1464_v39 }
0x1d89   :  { %v1474_v42 = vrot.slane %v4787_v41, 2  ;;  %v1575_v61 = vrot.slane %v4787_v41, 7 }
0x1d8b   :  { %1475 = vrot.lane.b32.xlu1 %v1474_v42, %s4448_s28 }
0x1dfd   :  { %v1476_v43 = vpop.permute.xlu1 %1475 }
0x1dfe   :  { %3807 = vmatmul.mubr.msk.f32.vlgmr.msra.gmra.mrb[12].mxu1 %vm89_vm0, %v1476_v43 }
0x1dff   :  { %4044 = vmatpush3.bf16.msra.mxu1 %v4702_v23  ;;  %3828 = vmatprep.mubr.msk.f32.mxu1 %vm4446_vm1, %v4447_v11 }
0x1e00   :  { %4045 = vmatprep.subr.bf16.mxu1 %v4445_v3 }
0x1e03   :  { %4047 = vmatpush3.bf16.msra.mxu1 %v4705_v8 }
0x1e04   :  { %4054 = vmatprep.subr.bf16.mxu1 %v4445_v3 }
0x1ed1   :  { %v1545_v44 = vpop.f32.mrb[12].mxu1 }
0x1ed2   :  { %v1546_v46 = vadd.f32 %v4733_v32, %v1545_v44  ;;  %v3808_v47 = vpop.f32.mrb[13].mxu1 }
0x1ed4   :  { %v1550_v48 = vrot.slane %v1546_v46, 5 }
0x1ed6   :  { %1559 = vrot.lane.b32.xlu0 %v1550_v48, %s4442_s8  ;;  %v1552_v49 = vadd.f32 %v1550_v48, %v4748_v40 }
0x1ed8   :  { %v3487_v50 = vmul.f32 -1.442695, %v1552_v49 }
0x1eda   :  { %4226 = vpow2.f32 %v3487_v50 }
0x1ee4   :  { %v4227_v51 = vpop.eup %4226 }
0x1ee5   :  { %v1556_v52 = vadd.f32 1.0, %v4227_v51 }
0x1ee7   :  { %4228 = vrcp.f32 %v1556_v52 }
0x1ef1   :  { %v4229_v53 = vpop.eup %4228 }
0x1ef2   :  { %v1569_v60 = vsub.f32 1.0, %v4229_v53  ;;  %v1577_v63 = vmul.f32 %v4229_v53, %v1575_v61 }
0x1f48   :  { %v1560_v54 = vpop.permute.xlu0 %1559 }
0x1f49   :  { %v1562_v55 = vmul.f32 %v4229_v53, %v1560_v54 }
0x1f4b   :  { %1564 = vrot.lane.b32.xlu1 %v1562_v55, %s4442_s8 }
0x1fbd   :  { %v1565_v56 = vpop.permute.xlu1 %1564 }
0x1fbe   :  { %v1567_v57 = vadd.f32 %v1565_v56, %v4748_v40 }
0x1fc0   :  { %4230 = vtanh.f32 %v1567_v57 }
0x1fca   :  { %v4231_v58 = vpop.eup %4230 }
0x1fcb   :  { %1571 = vrot.lane.b32.xlu0 %v4231_v58, %s4448_s28 }
0x203d   :  { %v1572_v62 = vpop.permute.xlu0 %1571 }
0x203e   :  { %v1574_v0 = vmul.f32 %v1572_v62, %v1569_v60 }
0x2040   :  { %v4805_v1 = vadd.f32 %v1577_v63, %v1574_v0 }
0x2042   :  { %v1584_v2 = vrot.slane %v4805_v1, 3  ;;  %v1685_v21 = vrot.slane %v4805_v1, 7 }
0x2044   :  { %1585 = vrot.lane.b32.xlu1 %v1584_v2, %s4448_s28 }
0x20b6   :  { %v1586_v4 = vpop.permute.xlu1 %1585 }
0x20b7   :  { %3818 = vmatmul.mubr.msk.f32.vlgmr.msra.gmra.mrb[14].mxu0 %vm89_vm0, %v1586_v4 }
0x20b8   :  { %4050 = vmatpush3.bf16.msra.mxu0 %v4702_v23  ;;  %3839 = vmatprep.mubr.msk.f32.mxu0 %vm4446_vm1, %v4447_v11 }
0x20b9   :  { %4051 = vmatprep.subr.bf16.mxu0 %v4445_v3 }
0x20bc   :  { %4053 = vmatpush3.bf16.msra.mxu0 %v4705_v8 }
0x20bd   :  { %4060 = vmatprep.subr.bf16.mxu0 %v4445_v3 }
0x218a   :  { %v1655_v6 = vpop.f32.mrb[14].mxu0 }
0x218b   :  { %v1656_v16 = vadd.f32 %v4733_v32, %v1655_v6  ;;  %v3819_v7 = vpop.f32.mrb[15].mxu0 }
0x218d   :  { %v1660_v9 = vrot.slane %v1656_v16, 4 }
0x218f   :  { %1669 = vrot.lane.b32.xlu0 %v1660_v9, %s4442_s8  ;;  %v1662_v10 = vadd.f32 %v1660_v9, %v4748_v40 }
0x2191   :  { %v3489_v12 = vmul.f32 -1.442695, %v1662_v10 }
0x2193   :  { %4232 = vpow2.f32 %v3489_v12 }
0x219d   :  { %v4233_v59 = vpop.eup %4232 }
0x219e   :  { %v1666_v45 = vadd.f32 1.0, %v4233_v59 }
0x21a0   :  { %4234 = vrcp.f32 %v1666_v45 }
0x21aa   :  { %v4235_v13 = vpop.eup %4234 }
0x21ab   :  { %v1679_v20 = vsub.f32 1.0, %v4235_v13  ;;  %v1687_v24 = vmul.f32 %v4235_v13, %v1685_v21 }
0x2201   :  { %v1670_v15 = vpop.permute.xlu0 %1669 }
0x2202   :  { %v1672_v17 = vmul.f32 %v4235_v13, %v1670_v15 }
0x2204   :  { %1674 = vrot.lane.b32.xlu1 %v1672_v17, %s4442_s8 }
0x2276   :  { %v1675_v18 = vpop.permute.xlu1 %1674 }
0x2277   :  { %v1677_v19 = vadd.f32 %v1675_v18, %v4748_v40 }
0x2279   :  { %4236 = vtanh.f32 %v1677_v19 }
0x2283   :  { %v4237_v5 = vpop.eup %4236 }
0x2284   :  { %1681 = vrot.lane.b32.xlu0 %v4237_v5, %s4448_s28 }
0x22f6   :  { %v1682_v14 = vpop.permute.xlu0 %1681 }
0x22f7   :  { %v1684_v25 = vmul.f32 %v1682_v14, %v1679_v20 }
0x22f9   :  { %v4823_v26 = vadd.f32 %v1687_v24, %v1684_v25 }
0x22fb   :  { %v1694_v27 = vrot.slane %v4823_v26, 4  ;;  %v1795_v46 = vrot.slane %v4823_v26, 7 }
0x22fd   :  { %1695 = vrot.lane.b32.xlu1 %v1694_v27, %s4448_s28 }
0x236f   :  { %v1696_v28 = vpop.permute.xlu1 %1695 }
0x2370   :  { %3829 = vmatmul.mubr.msk.f32.vlgmr.msra.gmra.mrb[14].mxu1 %vm89_vm0, %v1696_v28 }
0x2371   :  { %4056 = vmatpush3.bf16.msra.mxu1 %v4702_v23  ;;  %3850 = vmatprep.mubr.msk.f32.mxu1 %vm4446_vm1, %v4447_v11 }
0x2372   :  { %4057 = vmatprep.subr.bf16.mxu1 %v4445_v3 }
0x2375   :  { %4059 = vmatpush3.bf16.msra.mxu1 %v4705_v8 }
0x2376   :  { %4066 = vmatprep.subr.bf16.mxu1 %v4445_v3 }
0x2443   :  { %v1765_v29 = vpop.f32.mrb[14].mxu1 }
0x2444   :  { %v1766_v30 = vadd.f32 %v4733_v32, %v1765_v29  ;;  %v3830_v31 = vpop.f32.mrb[15].mxu1 }
0x2446   :  { %v1770_v33 = vrot.slane %v1766_v30, 3 }
0x2448   :  { %1779 = vrot.lane.b32.xlu0 %v1770_v33, %s4442_s8  ;;  %v1772_v34 = vadd.f32 %v1770_v33, %v4748_v40 }
0x244a   :  { %v3491_v35 = vmul.f32 -1.442695, %v1772_v34  ;;  %v2113_v34 = vld [vmem:[#allocation7 + $0xa8] sm:$0xff] }
0x244c   :  { %4238 = vpow2.f32 %v3491_v35  ;;  %v2114_v35 = vld [vmem:[#allocation7 + $0xb0] sm:$0xff] }
0x2456   :  { %v4239_v23 = vpop.eup %4238 }
0x2457   :  { %v1776_v36 = vadd.f32 1.0, %v4239_v23  ;;  %v2115_v23 = vld [vmem:[#allocation7 + $0xb8] sm:$0xff] }
0x2459   :  { %4240 = vrcp.f32 %v1776_v36  ;;  %v2027_v36 = vld [vmem:[#allocation7 + $0x88] sm:$0xff] }
0x2463   :  { %v4241_v37 = vpop.eup %4240 }
0x2464   :  { %v1789_v44 = vsub.f32 1.0, %v4241_v37  ;;  %v1797_v48 = vmul.f32 %v4241_v37, %v1795_v46 }
0x24ba   :  { %v1780_v38 = vpop.permute.xlu0 %1779 }
0x24bb   :  { %v1782_v39 = vmul.f32 %v4241_v37, %v1780_v38  ;;  %v2029_v38 = vld [vmem:[#allocation7 + $0x98] sm:$0xff] }
0x24bd   :  { %1784 = vrot.lane.b32.xlu1 %v1782_v39, %s4442_s8 }
0x252f   :  { %v1785_v8 = vpop.permute.xlu1 %1784 }
0x2530   :  { %v1787_v42 = vadd.f32 %v1785_v8, %v4748_v40 }
0x2532   :  { %4242 = vtanh.f32 %v1787_v42 }
0x253c   :  { %v4243_v43 = vpop.eup %4242 }
0x253d   :  { %1791 = vrot.lane.b32.xlu0 %v4243_v43, %s4448_s28 }
0x25af   :  { %v1792_v47 = vpop.permute.xlu0 %1791 }
0x25b0   :  { %v1794_v49 = vmul.f32 %v1792_v47, %v1789_v44 }
0x25b2   :  { %v1798_v50 = vadd.f32 %v1797_v48, %v1794_v49 }
0x25b4   :  { %v1804_v51 = vrot.slane %v1798_v50, 5  ;;  %v1905_v7 = vrot.slane %v1798_v50, 7 }
0x25b6   :  { %1805 = vrot.lane.b32.xlu1 %v1804_v51, %s4448_s28  ;;  %v4903_v51 = vld [vmem:[%s5106_s2 + $0x5] sm:$0x1] }
0x2628   :  { %v1806_v52 = vpop.permute.xlu1 %1805 }
0x2629   :  { %3840 = vmatmul.mubr.msk.f32.vlgmr.msra.gmra.mrb[16].mxu0 %vm89_vm0, %v1806_v52 }
0x262a   :  { %3861 = vmatprep.mubr.msk.f32.mxu0 %vm4446_vm1, %v4447_v11 }
0x26fc   :  { %v1875_v53 = vpop.f32.mrb[16].mxu0 }
0x26fd   :  { %v1876_v54 = vadd.f32 %v4733_v32, %v1875_v53  ;;  %v3841_v55 = vpop.f32.mrb[17].mxu0 }
0x26ff   :  { %v1880_v56 = vrot.slane %v1876_v54, 2 }
0x2701   :  { %1889 = vrot.lane.b32.xlu0 %v1880_v56, %s4442_s8  ;;  %v1882_v57 = vadd.f32 %v1880_v56, %v4748_v40 }
0x2703   :  { %v3493_v58 = vmul.f32 -1.442695, %v1882_v57  ;;  %v3497_v57 = vld [vmem:[%s5106_s2 + $0x4] ss:$0 sm:$0xff]  ;;  %s2986_s2 = sld [smem:[#allocation12]] }
0x2705   :  { %4244 = vpow2.f32 %v3493_v58 }
0x270f   :  { %v4245_v60 = vpop.eup %4244 }
0x2710   :  { %v1886_v61 = vadd.f32 1.0, %v4245_v60 }
0x2712   :  { %4246 = vrcp.f32 %v1886_v61 }
0x271c   :  { %v4247_v62 = vpop.eup %4246 }
0x271d   :  { %v1899_v16 = vsub.f32 1.0, %v4247_v62  ;;  %v1907_v10 = vmul.f32 %v4247_v62, %v1905_v7 }
0x2773   :  { %v1890_v63 = vpop.permute.xlu0 %1889 }
0x2774   :  { %v1892_v0 = vmul.f32 %v4247_v62, %v1890_v63 }
0x2776   :  { %1894 = vrot.lane.b32.xlu1 %v1892_v0, %s4442_s8 }
0x27e8   :  { %v1895_v2 = vpop.permute.xlu1 %1894 }
0x27e9   :  { %v1897_v4 = vadd.f32 %v1895_v2, %v4748_v40 }
0x27eb   :  { %4248 = vtanh.f32 %v1897_v4 }
0x27f5   :  { %v4249_v6 = vpop.eup %4248 }
0x27f6   :  { %1901 = vrot.lane.b32.xlu0 %v4249_v6, %s4448_s28 }
0x2868   :  { %v1902_v9 = vpop.permute.xlu0 %1901 }
0x2869   :  { %v1904_v12 = vmul.f32 %v1902_v9, %v1899_v16 }
0x286b   :  { %v4851_v59 = vadd.f32 %v1907_v10, %v1904_v12 }
0x286d   :  { %v1914_v45 = vrot.slane %v4851_v59, 6  ;;  %v2015_v42 = vrot.slane %v4851_v59, 7 }
0x286f   :  { %1915 = vrot.lane.b32.xlu1 %v1914_v45, %s4448_s28 }
0x28e1   :  { %v1916_v13 = vpop.permute.xlu1 %1915 }
0x28e2   :  { %3851 = vmatmul.mubr.msk.f32.vlgmr.msra.gmra.mrb[16].mxu1 %vm89_vm0, %v1916_v13 }
0x28e3   :  { %3872 = vmatprep.mubr.msk.f32.mxu1 %vm4446_vm1, %v4447_v11 }
0x29b5   :  { %v1985_v15 = vpop.f32.mrb[16].mxu1 }
0x29b6   :  { %v1986_v17 = vadd.f32 %v4733_v32, %v1985_v15  ;;  %v3852_v18 = vpop.f32.mrb[17].mxu1 }
0x29b8   :  { %v1990_v19 = vrot.slane %v1986_v17, 1 }
0x29ba   :  { %1999 = vrot.lane.b32.xlu0 %v1990_v19, %s4442_s8  ;;  %v1992_v5 = vadd.f32 %v1990_v19, %v4748_v40 }
0x29bc   :  { %v3495_v20 = vmul.f32 -1.442695, %v1992_v5 }
0x29be   :  { %4250 = vpow2.f32 %v3495_v20 }
0x29c8   :  { %v4251_v21 = vpop.eup %4250 }
0x29c9   :  { %v1996_v14 = vadd.f32 1.0, %v4251_v21 }
0x29cb   :  { %4252 = vrcp.f32 %v1996_v14 }
0x29d5   :  { %v4253_v24 = vpop.eup %4252 }
0x29d6   :  { %v2009_v8 = vsub.f32 1.0, %v4253_v24  ;;  %v2017_v44 = vmul.f32 %v4253_v24, %v2015_v42 }
0x2a2c   :  { %v2000_v25 = vpop.permute.xlu0 %1999 }
0x2a2d   :  { %v2002_v27 = vmul.f32 %v4253_v24, %v2000_v25 }
0x2a2f   :  { %2004 = vrot.lane.b32.xlu1 %v2002_v27, %s4442_s8 }
0x2a33   :  { %1360 = vrot.lane.b32.xlu1 %v4769_v22, %s4448_s28  ;;  %v2112_v22 = vld [vmem:[#allocation7 + $0xa0] sm:$0xff] }
0x2a37   :  { %1580 = vrot.lane.b32.xlu1 %v4805_v1, %s4448_s28  ;;  %v4872_v1 = vpack.c.bf16 %v2113_v34, %v2112_v22 }
0x2a39   :  { %4068 = vmatpush3.bf16.msra.mxu1 %v4872_v1 }
0x2a3a   :  { %4069 = vmatprep.subr.bf16.mxu1 %v4445_v3 }
0x2a3b   :  { %1800 = vrot.lane.b32.xlu1 %v1798_v50, %s4448_s28 }
0x2aa1   :  { %v2005_v32 = vpop.permute.xlu1 %2004 }
0x2aa2   :  { %v2007_v28 = vadd.f32 %v2005_v32, %v4748_v40  ;;  %v4875_v40 = vpack.c.bf16 %v2115_v23, %v2114_v35 }
0x2aa4   :  { %4254 = vtanh.f32 %v2007_v28  ;;  %4071 = vmatpush3.bf16.msra.mxu1 %v4875_v40 }
0x2aa5   :  { %v1361_v29 = vpop.permute.xlu1 %1360  ;;  %4078 = vmatprep.subr.bf16.mxu1 %v4445_v3 }
0x2aa6   :  { %1363 = vst.msk [vmem:[#allocation2] sm:$0x2] %vm394_vm3, %v1361_v29 }
0x2aa7   :  { %3873 = vmatmul.mubr.f32.vlgmr.msra.gmra.mrb[18].mxu1 %v4447_v11 }
0x2aa8   :  { %4080 = vmatpush3.bf16.msra.mxu1 %v4872_v1  ;;  %3894 = vmatprep.mubr.msk.f32.mxu1 %vm4446_vm1, %v4447_v11 }
0x2aa9   :  { %v1581_v30 = vpop.permute.xlu1 %1580  ;;  %4081 = vmatprep.subr.bf16.mxu1 %v4445_v3 }
0x2aaa   :  { %1583 = vst.msk [vmem:[#allocation2] sm:$0x8] %vm616_vm4, %v1581_v30 }
0x2aac   :  { %4083 = vmatpush3.bf16.msra.mxu1 %v4875_v40 }
0x2aad   :  { %v1801_v31 = vpop.permute.xlu1 %1800  ;;  %4090 = vmatprep.subr.bf16.mxu1 %v4445_v3 }
0x2aae   :  { %v4255_v33 = vpop.eup %4254  ;;  %1803 = vst.msk [vmem:[#allocation2] sm:$0x20] %vm838_vm5, %v1801_v31 }
0x2aaf   :  { %2011 = vrot.lane.b32.xlu0 %v4255_v33, %s4448_s28 }
0x2ab3   :  { %1470 = vrot.lane.b32.xlu0 %v4787_v41, %s4448_s28  ;;  %v2026_v41 = vld [vmem:[#allocation7 + $0x80] sm:$0xff] }
0x2ab4   :  { %v4061_v37 = vpack.c.bf16 %v2027_v36, %v2026_v41 }
0x2ab6   :  { %4062 = vmatpush3.bf16.msra.mxu0 %v4061_v37 }
0x2ab7   :  { %1690 = vrot.lane.b32.xlu0 %v4823_v26, %s4448_s28  ;;  %v2028_v26 = vld [vmem:[#allocation7 + $0x90] sm:$0xff]  ;;  %4063 = vmatprep.subr.bf16.mxu0 %v4445_v3 }
0x2ab8   :  { %v4064_v39 = vpack.c.bf16 %v2029_v38, %v2028_v26 }
0x2aba   :  { %4065 = vmatpush3.bf16.msra.mxu0 %v4064_v39 }
0x2abb   :  { %1910 = vrot.lane.b32.xlu0 %v4851_v59, %s4448_s28  ;;  %4072 = vmatprep.subr.bf16.mxu0 %v4445_v3 }
0x2b21   :  { %v2012_v43 = vpop.permute.xlu0 %2011 }
0x2b22   :  { %v2014_v46 = vmul.f32 %v2012_v43, %v2009_v8 }
0x2b24   :  { %v2018_v47 = vadd.f32 %v2017_v44, %v2014_v46 }
0x2b25   :  { %v1471_v48 = vpop.permute.xlu0 %1470 }
0x2b26   :  { %1473 = vst.msk [vmem:[#allocation2] sm:$0x4] %vm505_vm6, %v1471_v48  ;;  %2020 = vrot.lane.b32.xlu1 %v2018_v47, %s4448_s28 }
0x2b29   :  { %v1691_v49 = vpop.permute.xlu0 %1690 }
0x2b2a   :  { %1693 = vst.msk [vmem:[#allocation2] sm:$0x10] %vm727_vm7, %v1691_v49 }
0x2b2d   :  { %v1911_v50 = vpop.permute.xlu0 %1910 }
0x2b2e   :  { %1913 = vst.msk [vmem:[#allocation2] sm:$0x40] %vm949_vm8, %v1911_v50 }
0x2b7a   :  { %v2184_v52 = vpop.f32.mrb[18].mxu1 }
0x2b7b   :  { %v2185_v53 = vadd.f32 %v4903_v51, %v2184_v52  ;;  %v3874_v54 = vpop.f32.mrb[19].mxu1 }
0x2b7d   :  { %2196 = vrot.lane.b32.xlu0 %v2185_v53, %s4442_s8 }
0x2b98   :  { %v2021_v55 = vpop.permute.xlu1 %2020 }
0x2b99   :  { %2023 = vst.msk [vmem:[#allocation2] sm:$0x80] %vm1060_vm9, %v2021_v55 }
0x2ba0   :  { %v2024_v56 = vld [vmem:[#allocation2] sm:$0xff] }
0x2ba1   :  { %3862 = vmatmul.mubr.msk.f32.vlgmr.msra.gmra.mrb[18].mxu0 %vm89_vm0, %v2024_v56 }
0x2ba2   :  { %4074 = vmatpush3.bf16.msra.mxu0 %v4872_v1  ;;  %3883 = vmatprep.mubr.msk.f32.mxu0 %vm4446_vm1, %v4447_v11 }
0x2ba3   :  { %4075 = vmatprep.subr.bf16.mxu0 %v4445_v3 }
0x2ba6   :  { %4077 = vmatpush3.bf16.msra.mxu0 %v4875_v40 }
0x2ba7   :  { %4084 = vmatprep.subr.bf16.mxu0 %v4445_v3 }
0x2bef   :  { %v2197_v4 = vpop.permute.xlu0 %2196 }
0x2c74   :  { %v2107_v58 = vpop.f32.mrb[18].mxu0 }
0x2c75   :  { %v4918_v60 = vadd.f32 %v3497_v57, %v2107_v58  ;;  %v3863_v61 = vpop.f32.mrb[19].mxu0 }
0x2c77   :  { %v2188_v62 = vadd.f32 %v2185_v53, %v4918_v60 }
0x2c79   :  { %v3500_v63 = vmul.f32 -1.442695, %v2188_v62 }
0x2c7b   :  { %4256 = vpow2.f32 %v3500_v63 }
0x2c85   :  { %v4257_v0 = vpop.eup %4256 }
0x2c86   :  { %v2192_v2 = vadd.f32 1.0, %v4257_v0 }
0x2c88   :  { %4258 = vrcp.f32 %v2192_v2 }
0x2c92   :  { %v4259_v6 = vpop.eup %4258 }
0x2c93   :  { %v2199_v16 = vmul.f32 %v4259_v6, %v2197_v4  ;;  %v2206_v12 = vsub.f32 1.0, %v4259_v6  ;;  %v2212_v45 = vmul.f32 0.0, %v4259_v6 }
0x2c95   :  { %2201 = vrot.lane.b32.xlu1 %v2199_v16, %s4442_s8 }
0x2d07   :  { %v2202_v7 = vpop.permute.xlu1 %2201 }
0x2d08   :  { %v2204_v9 = vadd.f32 %v2202_v7, %v4918_v60 }
0x2d0a   :  { %4260 = vtanh.f32 %v2204_v9 }
0x2d14   :  { %v4261_v10 = vpop.eup %4260 }
0x2d15   :  { %2208 = vrot.lane.b32.xlu0 %v4261_v10, %s4448_s28 }
0x2d87   :  { %v2209_v59 = vpop.permute.xlu0 %2208 }
0x2d88   :  { %v2211_v13 = vmul.f32 %v2209_v59, %v2206_v12 }
0x2d8a   :  { %v2213_v15 = vadd.f32 %v2212_v45, %v2211_v13 }
0x2d8c   :  { %2215 = vrot.lane.b32.xlu1 %v2213_v15, %s4448_s28  ;;  %v2317_v33 = vrot.slane %v2213_v15, 7 }
0x2dfe   :  { %v2216_v17 = vpop.permute.xlu1 %2215 }
0x2dff   :  { %2218 = vst.msk [vmem:[#allocation2] sm:$0x1] %vm286_vm2, %v2216_v17  ;;  %3884 = vmatmul.mubr.msk.f32.vlgmr.msra.gmra.mrb[20].mxu0 %vm89_vm0, %v2216_v17 }
0x2e00   :  { %4086 = vmatpush3.bf16.msra.mxu0 %v4872_v1  ;;  %3905 = vmatprep.mubr.msk.f32.mxu0 %vm4446_vm1, %v4447_v11 }
0x2e01   :  { %4087 = vmatprep.subr.bf16.mxu0 %v4445_v3 }
0x2e04   :  { %4089 = vmatpush3.bf16.msra.mxu0 %v4875_v40 }
0x2e05   :  { %4096 = vmatprep.subr.bf16.mxu0 %v4445_v3 }
0x2ed2   :  { %v2287_v18 = vpop.f32.mrb[20].mxu0 }
0x2ed3   :  { %v2288_v19 = vadd.f32 %v4903_v51, %v2287_v18  ;;  %v3885_v5 = vpop.f32.mrb[21].mxu0 }
0x2ed5   :  { %v2292_v20 = vrot.slane %v2288_v19, 7 }
0x2ed7   :  { %2301 = vrot.lane.b32.xlu0 %v2292_v20, %s4442_s8  ;;  %v2294_v21 = vadd.f32 %v2292_v20, %v4918_v60 }
0x2ed9   :  { %v3502_v14 = vmul.f32 -1.442695, %v2294_v21 }
0x2edb   :  { %4262 = vpow2.f32 %v3502_v14 }
0x2ee5   :  { %v4263_v24 = vpop.eup %4262 }
0x2ee6   :  { %v2298_v25 = vadd.f32 1.0, %v4263_v24 }
0x2ee8   :  { %4264 = vrcp.f32 %v2298_v25 }
0x2ef2   :  { %v4265_v27 = vpop.eup %4264 }
0x2ef3   :  { %v2311_v22 = vsub.f32 1.0, %v4265_v27  ;;  %v2319_v35 = vmul.f32 %v4265_v27, %v2317_v33 }
0x2f49   :  { %v2302_v32 = vpop.permute.xlu0 %2301 }
0x2f4a   :  { %v2304_v28 = vmul.f32 %v4265_v27, %v2302_v32 }
0x2f4c   :  { %2306 = vrot.lane.b32.xlu1 %v2304_v28, %s4442_s8 }
0x2fbe   :  { %v2307_v29 = vpop.permute.xlu1 %2306 }
0x2fbf   :  { %v2309_v30 = vadd.f32 %v2307_v29, %v4918_v60 }
0x2fc1   :  { %4266 = vtanh.f32 %v2309_v30 }
0x2fcb   :  { %v4267_v31 = vpop.eup %4266 }
0x2fcc   :  { %2313 = vrot.lane.b32.xlu0 %v4267_v31, %s4448_s28 }
0x303e   :  { %v2314_v34 = vpop.permute.xlu0 %2313 }
0x303f   :  { %v2316_v23 = vmul.f32 %v2314_v34, %v2311_v22 }
0x3041   :  { %v4939_v41 = vadd.f32 %v2319_v35, %v2316_v23 }
0x3043   :  { %v2326_v36 = vrot.slane %v4939_v41, 1  ;;  %v2427_v55 = vrot.slane %v4939_v41, 7 }
0x3045   :  { %2327 = vrot.lane.b32.xlu1 %v2326_v36, %s4448_s28 }
0x30b7   :  { %v2328_v37 = vpop.permute.xlu1 %2327 }
0x30b8   :  { %3895 = vmatmul.mubr.msk.f32.vlgmr.msra.gmra.mrb[20].mxu1 %vm89_vm0, %v2328_v37 }
0x30b9   :  { %4092 = vmatpush3.bf16.msra.mxu1 %v4872_v1  ;;  %3916 = vmatprep.mubr.msk.f32.mxu1 %vm4446_vm1, %v4447_v11 }
0x30ba   :  { %4093 = vmatprep.subr.bf16.mxu1 %v4445_v3 }
0x30bd   :  { %4095 = vmatpush3.bf16.msra.mxu1 %v4875_v40 }
0x30be   :  { %4102 = vmatprep.subr.bf16.mxu1 %v4445_v3 }
0x318b   :  { %v2397_v26 = vpop.f32.mrb[20].mxu1 }
0x318c   :  { %v2398_v38 = vadd.f32 %v4903_v51, %v2397_v26  ;;  %v3896_v39 = vpop.f32.mrb[21].mxu1 }
0x318e   :  { %v2402_v8 = vrot.slane %v2398_v38, 6 }
0x3190   :  { %2411 = vrot.lane.b32.xlu0 %v2402_v8, %s4442_s8  ;;  %v2404_v42 = vadd.f32 %v2402_v8, %v4918_v60 }
0x3192   :  { %v3504_v43 = vmul.f32 -1.442695, %v2404_v42 }
0x3194   :  { %4268 = vpow2.f32 %v3504_v43 }
0x319e   :  { %v4269_v44 = vpop.eup %4268 }
0x319f   :  { %v2408_v46 = vadd.f32 1.0, %v4269_v44 }
0x31a1   :  { %4270 = vrcp.f32 %v2408_v46 }
0x31ab   :  { %v4271_v47 = vpop.eup %4270 }
0x31ac   :  { %v2421_v54 = vsub.f32 1.0, %v4271_v47  ;;  %v2429_v57 = vmul.f32 %v4271_v47, %v2427_v55 }
0x3202   :  { %v2412_v48 = vpop.permute.xlu0 %2411 }
0x3203   :  { %v2414_v49 = vmul.f32 %v4271_v47, %v2412_v48 }
0x3205   :  { %2416 = vrot.lane.b32.xlu1 %v2414_v49, %s4442_s8 }
0x3277   :  { %v2417_v50 = vpop.permute.xlu1 %2416 }
0x3278   :  { %v2419_v52 = vadd.f32 %v2417_v50, %v4918_v60 }
0x327a   :  { %4272 = vtanh.f32 %v2419_v52 }
0x3284   :  { %v4273_v53 = vpop.eup %4272 }
0x3285   :  { %2423 = vrot.lane.b32.xlu0 %v4273_v53, %s4448_s28 }
0x32f7   :  { %v2424_v56 = vpop.permute.xlu0 %2423 }
0x32f8   :  { %v2426_v58 = vmul.f32 %v2424_v56, %v2421_v54 }
0x32fa   :  { %v4957_v61 = vadd.f32 %v2429_v57, %v2426_v58 }
0x32fc   :  { %v2436_v62 = vrot.slane %v4957_v61, 2  ;;  %v2537_v19 = vrot.slane %v4957_v61, 7 }
0x32fe   :  { %2437 = vrot.lane.b32.xlu1 %v2436_v62, %s4448_s28 }
0x3370   :  { %v2438_v63 = vpop.permute.xlu1 %2437 }
0x3371   :  { %3906 = vmatmul.mubr.msk.f32.vlgmr.msra.gmra.mrb[22].mxu0 %vm89_vm0, %v2438_v63 }
0x3372   :  { %4098 = vmatpush3.bf16.msra.mxu0 %v4872_v1  ;;  %3927 = vmatprep.mubr.msk.f32.mxu0 %vm4446_vm1, %v4447_v11 }
0x3373   :  { %4099 = vmatprep.subr.bf16.mxu0 %v4445_v3 }
0x3376   :  { %4101 = vmatpush3.bf16.msra.mxu0 %v4875_v40 }
0x3377   :  { %4108 = vmatprep.subr.bf16.mxu0 %v4445_v3 }
0x3444   :  { %v2507_v0 = vpop.f32.mrb[22].mxu0 }
0x3445   :  { %v2508_v2 = vadd.f32 %v4903_v51, %v2507_v0  ;;  %v3907_v4 = vpop.f32.mrb[23].mxu0 }
0x3447   :  { %v2512_v6 = vrot.slane %v2508_v2, 5 }
0x3449   :  { %2521 = vrot.lane.b32.xlu0 %v2512_v6, %s4442_s8  ;;  %v2514_v16 = vadd.f32 %v2512_v6, %v4918_v60 }
0x344b   :  { %v3506_v7 = vmul.f32 -1.442695, %v2514_v16 }
0x344d   :  { %4274 = vpow2.f32 %v3506_v7 }
0x3457   :  { %v4275_v9 = vpop.eup %4274 }
0x3458   :  { %v2518_v10 = vadd.f32 1.0, %v4275_v9 }
0x345a   :  { %4276 = vrcp.f32 %v2518_v10 }
0x3464   :  { %v4277_v12 = vpop.eup %4276 }
0x3465   :  { %v2531_v18 = vsub.f32 1.0, %v4277_v12  ;;  %v2539_v20 = vmul.f32 %v4277_v12, %v2537_v19 }
0x34bb   :  { %v2522_v59 = vpop.permute.xlu0 %2521 }
0x34bc   :  { %v2524_v45 = vmul.f32 %v4277_v12, %v2522_v59 }
0x34be   :  { %2526 = vrot.lane.b32.xlu1 %v2524_v45, %s4442_s8 }
0x3530   :  { %v2527_v13 = vpop.permute.xlu1 %2526 }
0x3531   :  { %v2529_v15 = vadd.f32 %v2527_v13, %v4918_v60 }
0x3533   :  { %4278 = vtanh.f32 %v2529_v15 }
0x353d   :  { %v4279_v17 = vpop.eup %4278 }
0x353e   :  { %2533 = vrot.lane.b32.xlu0 %v4279_v17, %s4448_s28 }
0x35b0   :  { %v2534_v5 = vpop.permute.xlu0 %2533 }
0x35b1   :  { %v2536_v21 = vmul.f32 %v2534_v5, %v2531_v18 }
0x35b3   :  { %v4975_v14 = vadd.f32 %v2539_v20, %v2536_v21 }
0x35b5   :  { %v2546_v24 = vrot.slane %v4975_v14, 3  ;;  %v2647_v39 = vrot.slane %v4975_v14, 7 }
0x35b7   :  { %2547 = vrot.lane.b32.xlu1 %v2546_v24, %s4448_s28 }
0x3629   :  { %v2548_v25 = vpop.permute.xlu1 %2547 }
0x362a   :  { %3917 = vmatmul.mubr.msk.f32.vlgmr.msra.gmra.mrb[22].mxu1 %vm89_vm0, %v2548_v25 }
0x362b   :  { %4104 = vmatpush3.bf16.msra.mxu1 %v4872_v1  ;;  %3938 = vmatprep.mubr.msk.f32.mxu1 %vm4446_vm1, %v4447_v11 }
0x362c   :  { %4105 = vmatprep.subr.bf16.mxu1 %v4445_v3 }
0x362f   :  { %4107 = vmatpush3.bf16.msra.mxu1 %v4875_v40 }
0x36fd   :  { %v2617_v27 = vpop.f32.mrb[22].mxu1 }
0x36fe   :  { %v2618_v32 = vadd.f32 %v4903_v51, %v2617_v27  ;;  %v3918_v28 = vpop.f32.mrb[23].mxu1 }
0x3700   :  { %v2622_v29 = vrot.slane %v2618_v32, 4 }
0x3702   :  { %2631 = vrot.lane.b32.xlu0 %v2622_v29, %s4442_s8  ;;  %v2624_v30 = vadd.f32 %v2622_v29, %v4918_v60 }
0x3704   :  { %v3508_v31 = vmul.f32 -1.442695, %v2624_v30 }
0x3706   :  { %4280 = vpow2.f32 %v3508_v31 }
0x3710   :  { %v4281_v33 = vpop.eup %4280 }
0x3711   :  { %v2628_v22 = vadd.f32 1.0, %v4281_v33 }
0x3713   :  { %4282 = vrcp.f32 %v2628_v22 }
0x371d   :  { %v4283_v34 = vpop.eup %4282 }
0x371e   :  { %v2641_v38 = vsub.f32 1.0, %v4283_v34  ;;  %v2649_v42 = vmul.f32 %v4283_v34, %v2647_v39 }
0x3774   :  { %v2632_v35 = vpop.permute.xlu0 %2631 }
0x3775   :  { %v2634_v23 = vmul.f32 %v4283_v34, %v2632_v35 }
0x3777   :  { %2636 = vrot.lane.b32.xlu1 %v2634_v23, %s4442_s8 }
0x37e9   :  { %v2637_v36 = vpop.permute.xlu1 %2636 }
0x37ea   :  { %v2639_v37 = vadd.f32 %v2637_v36, %v4918_v60 }
0x37ec   :  { %4284 = vtanh.f32 %v2639_v37 }
0x37f6   :  { %v4285_v26 = vpop.eup %4284 }
0x37f7   :  { %2643 = vrot.lane.b32.xlu0 %v4285_v26, %s4448_s28 }
0x3869   :  { %v2644_v8 = vpop.permute.xlu0 %2643 }
0x386a   :  { %v2646_v43 = vmul.f32 %v2644_v8, %v2641_v38 }
0x386c   :  { %v4992_v44 = vadd.f32 %v2649_v42, %v2646_v43 }
0x386e   :  { %v2656_v46 = vrot.slane %v4992_v44, 4  ;;  %v2757_v0 = vrot.slane %v4992_v44, 7 }
0x3870   :  { %2657 = vrot.lane.b32.xlu1 %v2656_v46, %s4448_s28 }
0x38e2   :  { %v2658_v47 = vpop.permute.xlu1 %2657 }
0x38e3   :  { %3928 = vmatmul.mubr.msk.f32.vlgmr.msra.gmra.mrb[24].mxu0 %vm89_vm0, %v2658_v47 }
0x38e4   :  { %4110 = vmatpush3.bf16.msra.mxu0 %v4872_v1  ;;  %3949 = vmatprep.mubr.msk.f32.mxu0 %vm4446_vm1, %v4447_v11 }
0x38e5   :  { %4111 = vmatprep.subr.bf16.mxu0 %v4445_v3 }
0x38e8   :  { %4113 = vmatpush3.bf16.msra.mxu0 %v4875_v40 }
0x39b6   :  { %v2727_v48 = vpop.f32.mrb[24].mxu0 }
0x39b7   :  { %v2728_v49 = vadd.f32 %v4903_v51, %v2727_v48  ;;  %v3929_v50 = vpop.f32.mrb[25].mxu0 }
0x39b9   :  { %v2732_v52 = vrot.slane %v2728_v49, 3 }
0x39bb   :  { %2741 = vrot.lane.b32.xlu0 %v2732_v52, %s4442_s8  ;;  %v2734_v53 = vadd.f32 %v2732_v52, %v4918_v60  ;;  %v2998_v52 = vld [vmem:[#allocation9 + $0x48] sm:$0xff] }
0x39bd   :  { %v3510_v54 = vmul.f32 -1.442695, %v2734_v53  ;;  %v2992_v53 = vld [vmem:[#allocation9 + $0x18] sm:$0xff] }
0x39bf   :  { %4286 = vpow2.f32 %v3510_v54  ;;  %v3000_v54 = vld [vmem:[#allocation9 + $0x58] sm:$0xff] }
0x39c9   :  { %v4287_v55 = vpop.eup %4286 }
0x39ca   :  { %v2738_v1 = vadd.f32 1.0, %v4287_v55  ;;  %v4122_v55 = vpack.c.bf16 %v3000_v54, %v2992_v53 }
0x39cc   :  { %4288 = vrcp.f32 %v2738_v1  ;;  %4123 = vmatprep.subr.bf16.mxu0 %v4122_v55  ;;  %v2997_v1 = vld [vmem:[#allocation9 + $0x40] sm:$0xff] }
0x39d6   :  { %v4289_v56 = vpop.eup %4288 }
0x39d7   :  { %v2751_v63 = vsub.f32 1.0, %v4289_v56  ;;  %v2759_v4 = vmul.f32 %v4289_v56, %v2757_v0 }
0x3a2d   :  { %v2742_v57 = vpop.permute.xlu0 %2741 }
0x3a2e   :  { %v2744_v58 = vmul.f32 %v4289_v56, %v2742_v57  ;;  %v2991_v56 = vld [vmem:[#allocation9 + $0x10] sm:$0xff] }
0x3a30   :  { %2746 = vrot.lane.b32.xlu1 %v2744_v58, %s4442_s8  ;;  %v2999_v58 = vld [vmem:[#allocation9 + $0x50] sm:$0xff] }
0x3aa2   :  { %v2747_v3 = vpop.permute.xlu1 %2746 }
0x3aa3   :  { %v2749_v40 = vadd.f32 %v2747_v3, %v4918_v60  ;;  %v4124_v3 = vpack.c.bf16 %v2999_v58, %v2991_v56  ;;  %v5069_v56 = vstv %s2986_s2 }
0x3aa5   :  { %4290 = vtanh.f32 %v2749_v40  ;;  %v3006_v40 = vld [vmem:[#allocation9 + $0x88] sm:$0xff] }
0x3aaf   :  { %v4291_v62 = vpop.eup %4290 }
0x3ab0   :  { %2753 = vrot.lane.b32.xlu0 %v4291_v62, %s4448_s28  ;;  %v3014_v62 = vld [vmem:[#allocation9 + $0xc8] sm:$0xff] }
0x3ab1   :  { %v4118_v0 = vpack.c.bf16 %v3014_v62, %v3006_v40 }
0x3b22   :  { %v2754_v2 = vpop.permute.xlu0 %2753 }
0x3b23   :  { %v2756_v6 = vmul.f32 %v2754_v2, %v2751_v63  ;;  %v3008_v63 = vld [vmem:[#allocation9 + $0x98] sm:$0xff] }
0x3b24   :  { %v3016_v2 = vld [vmem:[#allocation9 + $0xd8] sm:$0xff] }
0x3b25   :  { %v2760_v16 = vadd.f32 %v2759_v4, %v2756_v6  ;;  %v3013_v4 = vld [vmem:[#allocation9 + $0xc0] sm:$0xff]  ;;  %v4126_v6 = vpack.c.bf16 %v3016_v2, %v3008_v63 }
0x3b27   :  { %v2766_v7 = vrot.slane %v2760_v16, 5  ;;  %v2867_v32 = vrot.slane %v2760_v16, 7 }
0x3b29   :  { %2767 = vrot.lane.b32.xlu1 %v2766_v7, %s4448_s28  ;;  %v3015_v7 = vld [vmem:[#allocation9 + $0xd0] sm:$0xff] }
0x3b9b   :  { %v2768_v9 = vpop.permute.xlu1 %2767 }
0x3b9c   :  { %3939 = vmatmul.mubr.msk.f32.vlgmr.msra.gmra.mrb[24].mxu1 %vm89_vm0, %v2768_v9  ;;  %v2994_v9 = vld [vmem:[#allocation9 + $0x28] sm:$0xff] }
0x3b9d   :  { %3130 = vmatprep.mubr.f32.mxu1 %v4447_v11 }
0x3c6f   :  { %v2837_v10 = vpop.f32.mrb[24].mxu1 }
0x3c70   :  { %v2838_v12 = vadd.f32 %v4903_v51, %v2837_v10  ;;  %v3940_v59 = vpop.f32.mrb[25].mxu1 }
0x3c71   :  { %v2996_v59 = vld [vmem:[#allocation9 + $0x38] sm:$0xff] }
0x3c72   :  { %v2842_v45 = vrot.slane %v2838_v12, 2  ;;  %v3002_v12 = vld [vmem:[#allocation9 + $0x68] sm:$0xff] }
0x3c74   :  { %2851 = vrot.lane.b32.xlu0 %v2842_v45, %s4442_s8  ;;  %v2844_v13 = vadd.f32 %v2842_v45, %v4918_v60  ;;  %v3004_v45 = vld [vmem:[#allocation9 + $0x78] sm:$0xff] }
0x3c76   :  { %v3512_v15 = vmul.f32 -1.442695, %v2844_v13  ;;  %v4130_v13 = vpack.c.bf16 %v3002_v12, %v2994_v9 }
0x3c78   :  { %4292 = vpow2.f32 %v3512_v15  ;;  %v4138_v15 = vpack.c.bf16 %v3004_v45, %v2996_v59 }
0x3c82   :  { %v4293_v17 = vpop.eup %4292 }
0x3c83   :  { %v2848_v18 = vadd.f32 1.0, %v4293_v17 }
0x3c85   :  { %4294 = vrcp.f32 %v2848_v18 }
0x3c8f   :  { %v4295_v19 = vpop.eup %4294 }
0x3c90   :  { %v2861_v27 = vsub.f32 1.0, %v4295_v19  ;;  %v2869_v29 = vmul.f32 %v4295_v19, %v2867_v32 }
0x3ce6   :  { %v2852_v5 = vpop.permute.xlu0 %2851 }
0x3ce7   :  { %v2854_v20 = vmul.f32 %v4295_v19, %v2852_v5 }
0x3ce9   :  { %2856 = vrot.lane.b32.xlu1 %v2854_v20, %s4442_s8 }
0x3d5b   :  { %v2857_v21 = vpop.permute.xlu1 %2856 }
0x3d5c   :  { %v2859_v24 = vadd.f32 %v2857_v21, %v4918_v60 }
0x3d5e   :  { %4296 = vtanh.f32 %v2859_v24 }
0x3d68   :  { %v4297_v25 = vpop.eup %4296 }
0x3d69   :  { %2863 = vrot.lane.b32.xlu0 %v4297_v25, %s4448_s28 }
0x3ddb   :  { %v2864_v28 = vpop.permute.xlu0 %2863 }
0x3ddc   :  { %v2866_v30 = vmul.f32 %v2864_v28, %v2861_v27  ;;  %v2993_v28 = vld [vmem:[#allocation9 + $0x20] sm:$0xff] }
0x3dde   :  { %v5018_v31 = vadd.f32 %v2869_v29, %v2866_v30  ;;  %v3001_v29 = vld [vmem:[#allocation9 + $0x60] sm:$0xff]  ;;  %v2995_v30 = vld [vmem:[#allocation9 + $0x30] sm:$0xff] }
0x3de0   :  { %v2876_v33 = vrot.slane %v5018_v31, 6  ;;  %v2977_v18 = vrot.slane %v5018_v31, 7 }
0x3de2   :  { %2877 = vrot.lane.b32.xlu1 %v2876_v33, %s4448_s28  ;;  %v3010_v33 = vld [vmem:[#allocation9 + $0xa8] sm:$0xff] }
0x3e54   :  { %v2878_v22 = vpop.permute.xlu1 %2877 }
0x3e55   :  { %3950 = vmatmul.mubr.msk.f32.vlgmr.msra.gmra.mrb[26].mxu0 %vm89_vm0, %v2878_v22  ;;  %v3018_v22 = vld [vmem:[#allocation9 + $0xe8] sm:$0xff] }
0x3e56   :  { %3201 = vmatprep.mubr.f32.mxu0 %v4447_v11  ;;  %4125 = vmatpush1.bf16.msra.mxu0 %v4124_v3 }
0x3e57   :  { %4127 = vmatprep.subr.bf16.mxu0 %v4126_v6 }
0x3f28   :  { %v2947_v34 = vpop.f32.mrb[26].mxu0 }
0x3f29   :  { %v2948_v35 = vadd.f32 %v4903_v51, %v2947_v34  ;;  %v3951_v23 = vpop.f32.mrb[27].mxu0  ;;  %v3012_v34 = vld [vmem:[#allocation9 + $0xb8] sm:$0xff] }
0x3f2a   :  { %v4132_v23 = vpack.c.bf16 %v3001_v29, %v2993_v28 }
0x3f2b   :  { %v2952_v36 = vrot.slane %v2948_v35, 1  ;;  %v3020_v35 = vld [vmem:[#allocation9 + $0xf8] sm:$0xff] }
0x3f2d   :  { %2961 = vrot.lane.b32.xlu0 %v2952_v36, %s4442_s8  ;;  %v2954_v37 = vadd.f32 %v2952_v36, %v4918_v60 }
0x3f2f   :  { %v3514_v26 = vmul.f32 -1.442695, %v2954_v37  ;;  %v3009_v37 = vld [vmem:[#allocation9 + $0xa0] sm:$0xff] }
0x3f31   :  { %4298 = vpow2.f32 %v3514_v26  ;;  %v4134_v26 = vpack.c.bf16 %v3018_v22, %v3010_v33 }
0x3f3b   :  { %v4299_v38 = vpop.eup %4298 }
0x3f3c   :  { %v2958_v39 = vadd.f32 1.0, %v4299_v38  ;;  %v4142_v38 = vpack.c.bf16 %v3020_v35, %v3012_v34 }
0x3f3e   :  { %4300 = vrcp.f32 %v2958_v39  ;;  %v3017_v39 = vld [vmem:[#allocation9 + $0xe0] sm:$0xff] }
0x3f48   :  { %v5027_v8 = vpop.eup %4300 }
0x3f49   :  { %v2971_v17 = vsub.f32 1.0, %v5027_v8  ;;  %v2979_v5 = vmul.f32 %v5027_v8, %v2977_v18 }
0x3f9f   :  { %v2962_v42 = vpop.permute.xlu0 %2961 }
0x3fa0   :  { %v2964_v43 = vmul.f32 %v5027_v8, %v2962_v42  ;;  %v3011_v8 = vld [vmem:[#allocation9 + $0xb0] sm:$0xff] }
0x3fa1   :  { %v3019_v42 = vld [vmem:[#allocation9 + $0xf0] sm:$0xff] }
0x3fa2   :  { %2966 = vrot.lane.b32.xlu1 %v2964_v43, %s4442_s8  ;;  %s3515_s8 = sld [smem:[#allocation12 + $0x1]] }
0x3fa6   :  { %2322 = vrot.lane.b32.xlu1 %v4939_v41, %s4448_s28  ;;  %v2990_v41 = vld [vmem:[#allocation9 + $0x8] sm:$0xff] }
0x3faa   :  { %2542 = vrot.lane.b32.xlu1 %v4975_v14, %s4448_s28  ;;  %v4114_v14 = vpack.c.bf16 %v2998_v52, %v2990_v41  ;;  %v3021_v41 = vld [vmem:[#allocation10] ss:$2 sm:$0xff] }
0x3fac   :  { %4115 = vmatprep.subr.bf16.mxu1 %v4114_v14  ;;  %v5067_v14 = vld [vmem:[#allocation10 + $0x1] ss:$2 sm:$0xff] }
0x3fae   :  { %2762 = vrot.lane.b32.xlu1 %v2760_v16, %s4448_s28  ;;  %v3007_v16 = vld [vmem:[#allocation9 + $0x90] sm:$0xff] }
0x3faf   :  { %v4128_v10 = vpack.c.bf16 %v3015_v7, %v3007_v16 }
0x3fb1   :  { %4129 = vmatpush1.bf16.msra.mxu0 %v4128_v10 }
0x3fb2   :  { %4139 = vmatprep.subr.bf16.mxu0 %v4138_v15 }
0x4014   :  { %v2967_v51 = vpop.permute.xlu1 %2966 }
0x4015   :  { %v2969_v46 = vadd.f32 %v2967_v51, %v4918_v60  ;;  %v2989_v60 = vld [vmem:[#allocation9] sm:$0xff]  ;;  %v4136_v51 = vpack.c.bf16 %v3017_v39, %v3009_v37 }
0x4016   :  { %v4116_v57 = vpack.c.bf16 %v2997_v1, %v2989_v60 }
0x4017   :  { %4302 = vtanh.f32 %v2969_v46  ;;  %v4144_v46 = vpack.c.bf16 %v3019_v42, %v3011_v8 }
0x4018   :  { %v2323_v47 = vpop.permute.xlu1 %2322  ;;  %4117 = vmatpush1.bf16.msra.mxu1 %v4116_v57 }
0x4019   :  { %2325 = vst.msk [vmem:[#allocation2] sm:$0x2] %vm394_vm3, %v2323_v47  ;;  %4119 = vmatprep.subr.bf16.mxu1 %v4118_v0  ;;  %v3023_v47 = vlaneseq }
0x401c   :  { %v2543_v48 = vpop.permute.xlu1 %2542 }
0x401d   :  { %2545 = vst.msk [vmem:[#allocation2] sm:$0x8] %vm616_vm4, %v2543_v48  ;;  %v5061_v48 = vshrl.u32 %v3023_v47, 7 }
0x401f   :  { %v3029_v52 = vsub.s32 1, %v5061_v48  ;;  %v3037_v53 = vsub.s32 3, %v5061_v48  ;;  %v3041_v40 = vsub.s32 4, %v5061_v48  ;;  %v3053_v7 = vsub.s32 7, %v5061_v48 }
0x4020   :  { %v2763_v49 = vpop.permute.xlu1 %2762 }
0x4021   :  { %v4303_v50 = vpop.eup %4302  ;;  %2765 = vst.msk [vmem:[#allocation2] sm:$0x20] %vm838_vm5, %v2763_v49  ;;  %v3025_v49 = vsub.s32 0, %v5061_v48  ;;  %v3030_v55 = vrot.slane %v3021_v41, %v3029_v52  ;;  %v3038_v60 = vrot.slane %v3021_v41, %v3037_v53  ;;  %v3042_v45 = vrot.slane %v3021_v41, %v3041_v40 }
0x4022   :  { %2973 = vrot.lane.b32.xlu0 %v4303_v50, %s4448_s28  ;;  %v3033_v50 = vsub.s32 2, %v5061_v48  ;;  %v3397_v34 = vrot.slane %v5067_v14, %v3041_v40 }
0x4023   :  { %v3381_v57 = vrot.slane %v5067_v14, %v3025_v49 }
0x4024   :  { %v3034_v54 = vrot.slane %v3021_v41, %v3033_v50  ;;  %v3389_v3 = vrot.slane %v5067_v14, %v3033_v50 }
0x4026   :  { %2432 = vrot.lane.b32.xlu0 %v4957_v61, %s4448_s28  ;;  %v3005_v61 = vld [vmem:[#allocation9 + $0x80] sm:$0xff] }
0x402a   :  { %2652 = vrot.lane.b32.xlu0 %v4992_v44, %s4448_s28  ;;  %v4120_v44 = vpack.c.bf16 %v3013_v4, %v3005_v61  ;;  %v3049_v61 = vsub.s32 6, %v5061_v48  ;;  %v3045_v4 = vsub.s32 5, %v5061_v48 }
0x402c   :  { %4121 = vmatpush1.bf16.msra.mxu1 %v4120_v44  ;;  %v3385_v44 = vrot.slane %v5067_v14, %v3029_v52  ;;  %v3050_v15 = vrot.slane %v3021_v41, %v3049_v61  ;;  %v3405_v47 = vrot.slane %v5067_v14, %v3049_v61  ;;  %v3409_v52 = vrot.slane %v5067_v14, %v3053_v7 }
0x402d   :  { %4131 = vmatprep.subr.bf16.mxu1 %v4130_v13 }
0x402e   :  { %2872 = vrot.lane.b32.xlu0 %v5018_v31, %s4448_s28  ;;  %v3003_v31 = vld [vmem:[#allocation9 + $0x70] sm:$0xff] }
0x402f   :  { %v4140_v36 = vpack.c.bf16 %v3003_v31, %v2995_v30 }
0x4094   :  { %v2974_v19 = vpop.permute.xlu0 %2973 }
0x4095   :  { %v2976_v20 = vmul.f32 %v2974_v19, %v2971_v17  ;;  %v3046_v17 = vrot.slane %v3021_v41, %v3045_v4 }
0x4097   :  { %v2980_v21 = vadd.f32 %v2979_v5, %v2976_v20  ;;  %v3054_v20 = vrot.slane %v3021_v41, %v3053_v7 }
0x4098   :  { %v2433_v24 = vpop.permute.xlu0 %2432 }
0x4099   :  { %2435 = vst.msk [vmem:[#allocation2] sm:$0x4] %vm505_vm6, %v2433_v24  ;;  %2982 = vrot.lane.b32.xlu1 %v2980_v21, %s4448_s28  ;;  %v3393_v24 = vrot.slane %v5067_v14, %v3037_v53 }
0x409c   :  { %v2653_v25 = vpop.permute.xlu0 %2652 }
0x409d   :  { %2655 = vst.msk [vmem:[#allocation2] sm:$0x10] %vm727_vm7, %v2653_v25 }
0x40a0   :  { %v2873_v27 = vpop.permute.xlu0 %2872 }
0x40a1   :  { %2875 = vst.msk [vmem:[#allocation2] sm:$0x40] %vm949_vm8, %v2873_v27 }
0x410b   :  { %v2983_v32 = vpop.permute.xlu1 %2982 }
0x410c   :  { %2985 = vst.msk [vmem:[#allocation2] sm:$0x80] %vm1060_vm9, %v2983_v32 }
0x4113   :  { %v2988_v43 = vld [vmem:[#allocation2] sm:$0xff] }
0x4114   :  { %3516 = vmatmul.mubr.msk.f32.vlgmr.msra.gmra.mrb[26].mxu1 %vm89_vm0, %v2988_v43  ;;  %3517 = vmatmul.mubr.msk.f32.vlgmr.msra.gmra.mrb[28].mxu0 %vm89_vm0, %v2988_v43 }
0x4115   :  { %4133 = vmatpush1.bf16.msra.mxu1 %v4132_v23  ;;  %4141 = vmatpush1.bf16.msra.mxu0 %v4140_v36  ;;  %v3401_v23 = vrot.slane %v5067_v14, %v3045_v4 }
0x4116   :  { %4135 = vmatprep.subr.bf16.mxu1 %v4134_v26  ;;  %4143 = vmatprep.subr.bf16.mxu0 %v4142_v38 }
0x4117   :  { %3272 = vmatprep.mubr.f32.mxu1 %v4447_v11  ;;  %3343 = vmatprep.mubr.f32.mxu0 %v4447_v11  ;;  %v3026_v11 = vrot.slane %v3021_v41, %v3025_v49 }
0x4119   :  { %4137 = vmatpush1.bf16.msra.mxu1 %v4136_v51  ;;  %4145 = vmatpush1.bf16.msra.mxu0 %v4144_v46 }
0x411c   :  { %3518 = vmatmul.mubr.msk.f32.vlgmr.msra.gmra.mrb[28].mxu1 %vm89_vm0, %v2988_v43  ;;  %3519 = vmatmul.mubr.msk.f32.vlgmr.msra.gmra.mrb[30].mxu0 %vm89_vm0, %v2988_v43 }
0x41e7   :  { %v3132_v1 = vpop.f32.mrb[26].mxu1  ;;  %v3203_v58 = vpop.f32.mrb[28].mxu0 }
0x41e8   :  { %v3133_v62 = vadd.f32 %v3132_v1, %v3026_v11  ;;  %v3204_v63 = vadd.f32 %v3203_v58, %v3034_v54  ;;  %v3134_v0 = vpop.f32.mrb[27].mxu1  ;;  %v3205_v2 = vpop.f32.mrb[29].mxu0 }
0x41e9   :  { %v3135_v6 = vadd.f32 %v3134_v0, %v3030_v55  ;;  %v3206_v16 = vadd.f32 %v3205_v2, %v3038_v60 }
0x41ea   :  { %vm3350_vm10 = vcmp.gt.f32.partialorder %v3133_v62, 0.0  ;;  %v3359_v9 = vmul.f32 %v5069_v56, %v3133_v62  ;;  %vm3352_vm11 = vcmp.gt.f32.partialorder %v3204_v63, 0.0  ;;  %v3361_v10 = vmul.f32 %v5069_v56, %v3204_v63 }
0x41eb   :  { %vm3351_vm12 = vcmp.gt.f32.partialorder %v3135_v6, 0.0  ;;  %v3360_v12 = vmul.f32 %v5069_v56, %v3135_v6  ;;  %v3362_v59 = vmul.f32 %v5069_v56, %v3206_v16  ;;  %vm3353_vm13 = vcmp.gt.f32.partialorder %v3206_v16, 0.0 }
0x41ec   :  { %v3367_v13 = vsel %vm3350_vm10, %v3133_v62, %v3359_v9  ;;  %v3369_v19 = vsel %vm3352_vm11, %v3204_v63, %v3361_v10 }
0x41ed   :  { %v3418_v18 = vmul.f32 %v3381_v57, %v3367_v13  ;;  %v3368_v5 = vsel %vm3351_vm12, %v3135_v6, %v3360_v12  ;;  %v3370_v25 = vsel %vm3353_vm13, %v3206_v16, %v3362_v59  ;;  %v3420_v28 = vmul.f32 %v3389_v3, %v3369_v19 }
0x41ee   :  { %v3419_v21 = vmul.f32 %v3385_v44, %v3368_v5  ;;  %v3421_v37 = vmul.f32 %v3393_v24, %v3370_v25  ;;  %v3435_v57 = vstv %s3515_s8 }
0x41ef   :  { %v3274_v27 = vpop.f32.mrb[28].mxu1  ;;  %v3345_v32 = vpop.f32.mrb[30].mxu0 }
0x41f0   :  { %v3426_v29 = vadd.f32 %v3419_v21, %v3418_v18  ;;  %v3275_v30 = vadd.f32 %v3274_v27, %v3042_v45  ;;  %v3346_v31 = vadd.f32 %v3345_v32, %v3050_v15  ;;  %v3276_v33 = vpop.f32.mrb[29].mxu1  ;;  %v3347_v22 = vpop.f32.mrb[31].mxu0 }
0x41f1   :  { %v3277_v35 = vadd.f32 %v3276_v33, %v3046_v17  ;;  %v3348_v36 = vadd.f32 %v3347_v22, %v3054_v20 }
0x41f2   :  { %v3427_v26 = vadd.f32 %v3426_v29, %v3420_v28  ;;  %vm3354_vm14 = vcmp.gt.f32.partialorder %v3275_v30, 0.0  ;;  %v3363_v38 = vmul.f32 %v5069_v56, %v3275_v30  ;;  %vm3356_vm15 = vcmp.gt.f32.partialorder %v3346_v31, 0.0 }
0x41f3   :  { %v3365_v39 = vmul.f32 %v5069_v56, %v3346_v31  ;;  %vm3355_vm0 = vcmp.gt.f32.partialorder %v3277_v35, 0.0  ;;  %v3364_v8 = vmul.f32 %v5069_v56, %v3277_v35  ;;  %v3366_v51 = vmul.f32 %v5069_v56, %v3348_v36 }
0x41f4   :  { %v3428_v42 = vadd.f32 %v3427_v26, %v3421_v37  ;;  %v3371_v43 = vsel %vm3354_vm14, %v3275_v30, %v3363_v38  ;;  %vm3357_vm1 = vcmp.gt.f32.partialorder %v3348_v36, 0.0 }
0x41f5   :  { %v3422_v46 = vmul.f32 %v3397_v34, %v3371_v43  ;;  %v3372_v48 = vsel %vm3355_vm0, %v3277_v35, %v3364_v8  ;;  %v3373_v49 = vsel %vm3356_vm15, %v3346_v31, %v3365_v39  ;;  %v3374_v53 = vsel %vm3357_vm1, %v3348_v36, %v3366_v51 }
0x41f6   :  { %v3423_v50 = vmul.f32 %v3401_v23, %v3372_v48  ;;  %v3424_v11 = vmul.f32 %v3405_v47, %v3373_v49  ;;  %v3425_v55 = vmul.f32 %v3409_v52, %v3374_v53 }
0x41f7   :  { %v3429_v41 = vadd.f32 %v3428_v42, %v3422_v46 }
0x41f9   :  { %v3430_v54 = vadd.f32 %v3429_v41, %v3423_v50 }
0x41fb   :  { %v3431_v60 = vadd.f32 %v3430_v54, %v3424_v11 }
0x41fd   :  { %v3432_v1 = vadd.f32 %v3431_v60, %v3425_v55 }
0x41ff   :  { %3433 = vadd.xlane.f32.xlu0 %v3432_v1 }
0x428c   :  { %v3434_v58 = vpop.xlane.xlu0 %3433 }
0x428d   :  { %v3436_v3 = vadd.f32 %v3435_v57, %v3434_v58 }
0x428f   :  { %v3438_v40 = vmul.f32 %v3436_v3, %v5069_v56  ;;  %vm3437_vm2 = vcmp.gt.f32.partialorder %v3436_v3, 0.0 }
0x4291   :  { %v3439_v62 = vsel %vm3437_vm2, %v3436_v3, %v3438_v40 }
0x4292   :  { %3440 = vst [vmem:[#allocation13] sm:$0xff] %v3439_v62 }
0x4293   :  { %4415 = shalt.err (!%p4412_p13)
}
0x4294   :  { %s4416_s19 = scalar_lea.hbm %s5110_s6, 128 }
0x4295   :  { %p4417_p0 = scmp.ne.s32.totalorder %s5110_s6, %s4416_s19  ;;  %p4420_p1 = scmp.lt.u32.totalorder %s4416_s19, %s5110_s6 }
0x4297   :  { %p4422_p2 = pnand %p4420_p1, %p4417_p0 }
0x4299   :  { %4425 = shalt.err (!%p4422_p2)
}
0x429a   :  { %3450 = dma.vmem_to_hbm [thread:$0]  %s3448_s15, 128, %s5110_s6, [#allocation5]  }
0x429b   :  { %4434 = dma.done.wait [#allocation5], 128  }
0x429c   :  { %4435 = vsyncadd [#allocation5], 4294967168 }
0x429d   :  { %3454 = vsyncpa [#allocation4], 1 }
0x429e   :  { %3455 = vsyncpa [#allocation8], 1 }
0x429f   :  { %3456 = vsyncpa [#allocation11], 1 }
0x42a0   :  { %3457 = vsyncpa [#allocation5], 1 }
0x42a1   :  { %3458 = vsyncpa [#allocation6], 1 }

</bundles_post_ra>
